<compile_context>
chip_gen: v6e
topology: v6e:2x2x1
jax: 0.10.0
libtpu: 0.0.40
codegen_flags: <defaults>
</compile_context>

<pallas_src>
import functools

import jax
import jax.numpy as jnp
from jax import lax
from jax.experimental import pallas as pl
from jax.experimental.pallas import tpu as pltpu


def _round_up(x, m):
    return (x + m - 1) // m * m


@functools.lru_cache(maxsize=None)
def _vmem_limit_bytes():
    # 64 MiB of scoped VMEM on 128-MiB parts (v5e/v6e); conservative 32 MiB
    # elsewhere (v7x has only 64 MiB physical VMEM per TensorCore).
    try:
        cap = pltpu.get_tpu_info().vmem_capacity_bytes
        if cap >= 128 * 1024 * 1024:
            return 64 * 1024 * 1024
    except Exception:
        pass
    return 32 * 1024 * 1024


# ----------------------------------------------------------------------------
# Pass 1 kernel: 3x3 VALID conv on the flat W-stride grid (+ optional fused
# BN+ReLU of the *previous* layer on the input) + per-tile BN partial stats.
# ----------------------------------------------------------------------------
def _conv3x3_kernel(*refs, tm, tb, offs, fuse_in_bn):
    # a_ref    (1, tm, Cin_p)  bf16   rows [i*tm, i*tm+tm)
    # b_ref    (1, tb, Cin_p)  bf16   halo rows [(i+1)*tm, (i+1)*tm+tb) (clamped)
    # mask_ref (tm, 1)         f32    1.0 where the output row is a valid conv pos
    # [insc_ref, insh_ref (1, Cin_p) f32]   previous layer's BN scale/shift
    # w_ref    (9, Cin_p, Cp)  bf16   taps ordered to match `offs`
    # o_ref    (1, tm, Cp)     bf16   pre-BN conv activation
    # s_ref    (1, 1, 1, Cp)   f32    sum of valid activations
    # ss_ref   (1, 1, 1, Cp)   f32    sum of squared deviations from tile mean
    # win_ref  (tm + tb, Cin_p) bf16  assembled halo window (VMEM scratch)
    if fuse_in_bn:
        (a_ref, b_ref, mask_ref, insc_ref, insh_ref, w_ref,
         o_ref, s_ref, ss_ref, win_ref) = refs
    else:
        (a_ref, b_ref, mask_ref, w_ref,
         o_ref, s_ref, ss_ref, win_ref) = refs

    xa = a_ref[0, :, :]
    xb = b_ref[0, :, :]
    if fuse_in_bn:
        sc = insc_ref[...]
        sh = insh_ref[...]
        xa = jnp.maximum(xa.astype(jnp.float32) * sc + sh, 0.0).astype(jnp.bfloat16)
        xb = jnp.maximum(xb.astype(jnp.float32) * sc + sh, 0.0).astype(jnp.bfloat16)
    win_ref[pl.ds(0, tm), :] = xa
    win_ref[pl.ds(tm, tb), :] = xb

    # 9 row-shifted MXU matmuls with f32 accumulation (the in-kernel "im2col").
    acc = jnp.dot(win_ref[pl.ds(offs[0], tm), :], w_ref[0, :, :],
                  preferred_element_type=jnp.float32)
    for t in range(1, len(offs)):
        acc = acc + jnp.dot(win_ref[pl.ds(offs[t], tm), :], w_ref[t, :, :],
                            preferred_element_type=jnp.float32)

    o_ref[0, :, :] = acc.astype(o_ref.dtype)

    # Per-tile BN partial statistics, masked to valid conv output positions
    # (jnp.where, not multiply, so garbage rows can never leak in).
    m = mask_ref[...]
    cnt = jnp.sum(m, axis=0, keepdims=True)                       # (1, 1)
    s = jnp.sum(jnp.where(m > 0.0, acc, 0.0), axis=0, keepdims=True)
    mu = s / jnp.maximum(cnt, 1.0)
    d = jnp.where(m > 0.0, acc - mu, 0.0)
    s_ref[0, 0, :, :] = s
    ss_ref[0, 0, :, :] = jnp.sum(d * d, axis=0, keepdims=True)


# ----------------------------------------------------------------------------
# Final elementwise pass: y = relu(x * scale + shift)   (only for the last BN)
# ----------------------------------------------------------------------------
def _bn_relu_kernel(x_ref, sc_ref, sh_ref, o_ref):
    y = x_ref[0, :, :].astype(jnp.float32) * sc_ref[...] + sh_ref[...]
    o_ref[0, :, :] = jnp.maximum(y, 0.0).astype(o_ref.dtype)


def _valid_mask(w_grid, h_out, w_out, l_pad):
    m = jnp.arange(l_pad, dtype=jnp.int32)
    valid = ((m // w_grid) < h_out) & ((m % w_grid) < w_out)
    return valid.astype(jnp.float32)[:, None]                     # (Lp, 1)


# ----------------------------------------------------------------------------
# One conv layer: conv + exact BN batch stats; optionally fuses the previous
# layer's BN+ReLU into the input load.  Returns (pre-BN bf16 activation,
# this layer's BN scale, shift).
# ----------------------------------------------------------------------------
def _conv_layer(inp_flat, w_hwio, gamma, beta, mask_col, tiling,
                in_scale=None, in_shift=None, eps=1e-5):
    N, Lp, Cin_p = inp_flat.shape
    tm, tb, n_tiles, W = tiling
    assert tm % tb == 0 and Lp == n_tiles * tm
    Cin = int(w_hwio.shape[2])
    Cout = int(w_hwio.shape[3])
    Cp = _round_up(Cout, 128)

    # (3,3,Cin,Cout) -> (9, Cin_p, Cp); tap t = dh*3+dw matches offset dh*W+dw.
    w_taps = jnp.pad(w_hwio.reshape(9, Cin, Cout).astype(jnp.bfloat16),
                     ((0, 0), (0, Cin_p - Cin), (0, Cp - Cout)))
    offs = tuple(dh * W + dw for dh in range(3) for dw in range(3))

    fuse = in_scale is not None
    kernel = functools.partial(_conv3x3_kernel, tm=tm, tb=tb, offs=offs,
                               fuse_in_bn=fuse)

    blk_per_tile = tm // tb
    last_blk = (n_tiles - 1) * blk_per_tile

    a_spec = pl.BlockSpec((1, tm, Cin_p), lambda n, i: (n, i, 0))
    # Halo block: rows of the *next* tile; clamped for the last tile (valid
    # outputs in the last tile provably never read halo rows).
    b_spec = pl.BlockSpec(
        (1, tb, Cin_p),
        lambda n, i: (n, jnp.minimum((i + 1) * blk_per_tile, last_blk), 0))
    mask_spec = pl.BlockSpec((tm, 1), lambda n, i: (i, 0))
    w_spec = pl.BlockSpec((9, Cin_p, Cp), lambda n, i: (0, 0, 0))
    o_spec = pl.BlockSpec((1, tm, Cp), lambda n, i: (n, i, 0))
    st_spec = pl.BlockSpec((1, 1, 1, Cp), lambda n, i: (n, i, 0, 0))

    in_specs = [a_spec, b_spec, mask_spec]
    args = [inp_flat, inp_flat, mask_col]
    if fuse:
        sc_spec = pl.BlockSpec((1, Cin_p), lambda n, i: (0, 0))
        in_specs += [sc_spec, sc_spec]
        args += [in_scale, in_shift]
    in_specs.append(w_spec)
    args.append(w_taps)

    flops = 2 * N * Lp * Cin_p * Cp * 9
    bytes_acc = int(N * Lp * Cin_p * 2 * (1.0 + tb / tm) + w_taps.size * 2
                    + N * Lp * Cp * 2 + 2 * N * n_tiles * Cp * 4 + Lp * 4)

    out, s, ssc = pl.pallas_call(
        kernel,
        out_shape=(jax.ShapeDtypeStruct((N, Lp, Cp), jnp.bfloat16),
                   jax.ShapeDtypeStruct((N, n_tiles, 1, Cp), jnp.float32),
                   jax.ShapeDtypeStruct((N, n_tiles, 1, Cp), jnp.float32)),
        grid=(N, n_tiles),
        in_specs=in_specs,
        out_specs=(o_spec, st_spec, st_spec),
        scratch_shapes=[pltpu.VMEM((tm + tb, Cin_p), jnp.bfloat16)],
        compiler_params=pltpu.CompilerParams(
            dimension_semantics=("parallel", "parallel"),
            vmem_limit_bytes=_vmem_limit_bytes()),
        cost_estimate=pl.CostEstimate(flops=flops, transcendentals=0,
                                      bytes_accessed=bytes_acc),
    )(*args)

    # Exact global BN statistics (training mode, biased variance) via the
    # parallel-variance merge of per-tile mean-shifted partial sums.
    cnt_t = jnp.sum(mask_col.reshape(n_tiles, tm), axis=1)        # (n_tiles,)
    cnt = jnp.tile(cnt_t, (N,))[:, None]                          # (N*n_tiles, 1)
    s2 = s.reshape(N * n_tiles, Cp)
    ssc2 = ssc.reshape(N * n_tiles, Cp)
    total = jnp.sum(cnt)                                          # = N * Ho * Wo
    mean = jnp.sum(s2, axis=0) / total
    mu_t = s2 / jnp.maximum(cnt, 1.0)
    var = (jnp.sum(ssc2, axis=0)
           + jnp.sum(cnt * (mu_t - mean[None, :]) ** 2, axis=0)) / total
    var = jnp.maximum(var, 0.0)
    inv = lax.rsqrt(var + eps)
    g = jnp.pad(gamma.astype(jnp.float32), (0, Cp - Cout))
    b = jnp.pad(beta.astype(jnp.float32), (0, Cp - Cout))
    scale = (g * inv).reshape(1, Cp)
    shift = (b - mean * g * inv).reshape(1, Cp)
    return out, scale, shift


def _bn_relu(x_flat, scale, shift, tiling):
    N, Lp, Cp = x_flat.shape
    tm, _, n_tiles, _ = tiling
    return pl.pallas_call(
        _bn_relu_kernel,
        out_shape=jax.ShapeDtypeStruct((N, Lp, Cp), jnp.float32),
        grid=(N, n_tiles),
        in_specs=[pl.BlockSpec((1, tm, Cp), lambda n, i: (n, i, 0)),
                  pl.BlockSpec((1, Cp), lambda n, i: (0, 0)),
                  pl.BlockSpec((1, Cp), lambda n, i: (0, 0))],
        out_specs=pl.BlockSpec((1, tm, Cp), lambda n, i: (n, i, 0)),
        compiler_params=pltpu.CompilerParams(
            dimension_semantics=("parallel", "parallel"),
            vmem_limit_bytes=_vmem_limit_bytes()),
        cost_estimate=pl.CostEstimate(flops=2 * N * Lp * Cp, transcendentals=0,
                                      bytes_accessed=int(N * Lp * Cp * 6 + Cp * 8)),
    )(x_flat, scale, shift)


# ----------------------------------------------------------------------------
# Gather-free 2x bilinear upsample (PyTorch align_corners=False), NHWC, bf16.
# out[2i] = 0.25*x[i-1] + 0.75*x[i] (edge-clamped); out[2i+1] = 0.75*x[i] + 0.25*x[i+1].
# ----------------------------------------------------------------------------
def _upsample2x_bilinear_nhwc(x):
    def up(v, axis):
        n = v.shape[axis]
        first = lax.slice_in_dim(v, 0, 1, axis=axis)
        last = lax.slice_in_dim(v, n - 1, n, axis=axis)
        prev = jnp.concatenate([first, lax.slice_in_dim(v, 0, n - 1, axis=axis)], axis=axis)
        nxt = jnp.concatenate([lax.slice_in_dim(v, 1, n, axis=axis), last], axis=axis)
        even = 0.25 * prev + 0.75 * v
        odd = 0.75 * v + 0.25 * nxt
        out = jnp.stack([even, odd], axis=axis + 1)
        shape = list(v.shape)
        shape[axis] = 2 * n
        return out.reshape(shape)
    return up(up(x, 1), 2)


# ----------------------------------------------------------------------------
# ConvUp forward:  x: (N, Cx, H, W), y: (N, Cy, 2H, 2W); NCHW in / NCHW out.
# ----------------------------------------------------------------------------
def conv_up_forward(x, y, params, *, tm_target=512):
    N, _, Hx, Wx = x.shape
    H, W = 2 * Hx, 2 * Wx

    # Single NCHW<->NHWC transpose pair at the module boundary; bf16 inside.
    x_nhwc = jnp.transpose(x, (0, 2, 3, 1)).astype(jnp.bfloat16)
    y_nhwc = jnp.transpose(y, (0, 2, 3, 1)).astype(jnp.bfloat16)
    x_up = _upsample2x_bilinear_nhwc(x_nhwc)                       # (N, H, W, Cx)
    inp = jnp.concatenate([x_up, y_nhwc], axis=-1)                 # channel concat, once
    Cin = int(inp.shape[-1])
    Cout = int(params["w1"].shape[-1])
    Cin_p = _round_up(Cin, 128)

    # Shared flat W-stride grid for both convs: (h, w) -> m = h*W + w.
    L = H * W
    tb = _round_up(2 * W + 2, 16)                                  # halo rows
    k = max(1, min(tm_target // tb, max(1, L // (2 * tb))))        # keep >= 2 tiles
    tm = k * tb
    n_tiles = pl.cdiv(L, tm)
    Lp = n_tiles * tm
    tiling = (tm, tb, n_tiles, W)

    inp_flat = jnp.pad(inp.reshape(N, L, Cin),
                       ((0, 0), (0, Lp - L), (0, Cin_p - Cin)))

    mask1 = _valid_mask(W, H - 2, W - 2, Lp)                       # conv1 valid outputs
    mask2 = _valid_mask(W, H - 4, W - 4, Lp)                       # conv2 valid outputs

    # conv1 + BN1 batch stats (BN1+ReLU applied lazily, fused into conv2's load)
    h1, sc1, sh1 = _conv_layer(inp_flat, params["w1"], params["g1"], params["be1"],
                               mask1, tiling)
    # conv2 with fused BN1+ReLU on its input, + BN2 batch stats
    h2, sc2, sh2 = _conv_layer(h1, params["w2"], params["g2"], params["be2"],
                               mask2, tiling, in_scale=sc1, in_shift=sh1)
    # final BN2 + ReLU (nothing downstream to fuse it into)
    out_flat = _bn_relu(h2, sc2, sh2, tiling)                      # (N, Lp, Cp) f32

    out = out_flat[:, :L, :Cout].reshape(N, H, W, Cout)[:, :H - 4, :W - 4, :]
    return jnp.transpose(out, (0, 3, 1, 2))                        # NHWC -> NCHW


def init_params(key, c_in, c_out):
    k1, k2, k3, k4 = jax.random.split(key, 4)
    return {
        # conv weights in HWIO layout (torch OIHW transposed)
        "w1": jax.random.normal(k1, (3, 3, c_in, c_out), jnp.float32) * 0.1,
        "w2": jax.random.normal(k3, (3, 3, c_out, c_out), jnp.float32) * 0.1,
        # nn.Conv2d biases exist but are exactly cancelled by the training-mode
        # BatchNorm that follows, so they are not applied in the kernels.
        "b1": jax.random.normal(k2, (c_out,), jnp.float32) * 0.1,
        "b2": jax.random.normal(k4, (c_out,), jnp.float32) * 0.1,
        # BatchNorm affine params at nn.BatchNorm2d defaults
        "g1": jnp.ones((c_out,), jnp.float32),
        "be1": jnp.zeros((c_out,), jnp.float32),
        "g2": jnp.ones((c_out,), jnp.float32),
        "be2": jnp.zeros((c_out,), jnp.float32),
    }


if __name__ == "__main__":
    key = jax.random.PRNGKey(0)
    kx, ky, kp = jax.random.split(key, 3)

    N, Cx, H, W = 2, 4, 8, 8     # low-res skip input
    Cy = 4                       # high-res skip input channels
    c_in, c_out = Cx + Cy, 8

    x = jax.random.normal(kx, (N, Cx, H, W), jnp.float32)
    y = jax.random.normal(ky, (N, Cy, 2 * H, 2 * W), jnp.float32)
    params = init_params(kp, c_in, c_out)

    out = jax.jit(conv_up_forward)(x, y, params)
    out = jax.block_until_ready(out)

    # cat -> (2, 8, 16, 16); two VALID 3x3 convs -> (2, 8, 12, 12)
    assert out.shape == (N, c_out, 2 * H - 4, 2 * W - 4), out.shape
    assert out.dtype == jnp.float32
    assert bool(jnp.all(jnp.isfinite(out)))
    print("KERNEL_OK")
</pallas_src>

<mosaic_0001>
module attributes {stable_mosaic.version = 11 : i64} {
  func.func @_bn_relu_kernel(%arg0: i32, %arg1: i32, %arg2: memref<1x96x128xbf16, #tpu.memory_space<vmem>>, %arg3: memref<1x128xf32, #tpu.memory_space<vmem>>, %arg4: memref<1x128xf32, #tpu.memory_space<vmem>>, %arg5: memref<1x96x128xf32, #tpu.memory_space<vmem>>) attributes {dimension_semantics = [#tpu.dimension_semantics<parallel>, #tpu.dimension_semantics<parallel>], iteration_bounds = array<i64: 2, 3>, scalar_prefetch = 0 : i64, scratch_operands = 0 : i64, tpu.core_type = #tpu.core_type<tc>, window_params = [{transform_indices = @transform_0, window_bounds = array<i64: 1, 96, 128>}, {pipeline_mode = #tpu.pipeline_mode<synchronous>, transform_indices = @transform_1, window_bounds = array<i64: 1, 128>}, {pipeline_mode = #tpu.pipeline_mode<synchronous>, transform_indices = @transform_2, window_bounds = array<i64: 1, 128>}, {transform_indices = @transform_3, window_bounds = array<i64: 1, 96, 128>}]} {
    %c0 = arith.constant 0 : index
    %c0_0 = arith.constant 0 : index
    %c0_1 = arith.constant 0 : index
    %0 = vector.load %arg2[%c0, %c0_0, %c0_1] : memref<1x96x128xbf16, #tpu.memory_space<vmem>>, vector<1x96x128xbf16>
    %1 = vector.shape_cast %0 : vector<1x96x128xbf16> to vector<96x128xbf16>
    %2 = arith.extf %1 : vector<96x128xbf16> to vector<96x128xf32>
    %c0_2 = arith.constant 0 : index
    %c0_3 = arith.constant 0 : index
    %3 = vector.load %arg3[%c0_2, %c0_3] : memref<1x128xf32, #tpu.memory_space<vmem>>, vector<1x128xf32>
    %4 = vector.broadcast %3 : vector<1x128xf32> to vector<96x128xf32>
    %5 = arith.mulf %2, %4 : vector<96x128xf32>
    %c0_4 = arith.constant 0 : index
    %c0_5 = arith.constant 0 : index
    %6 = vector.load %arg4[%c0_4, %c0_5] : memref<1x128xf32, #tpu.memory_space<vmem>>, vector<1x128xf32>
    %7 = vector.broadcast %6 : vector<1x128xf32> to vector<96x128xf32>
    %8 = arith.addf %5, %7 : vector<96x128xf32>
    %cst = arith.constant 0.000000e+00 : f32
    %9 = vector.broadcast %cst : f32 to vector<96x128xf32>
    %10 = arith.maximumf %8, %9 : vector<96x128xf32>
    %c0_6 = arith.constant 0 : index
    %c0_7 = arith.constant 0 : index
    %c0_8 = arith.constant 0 : index
    %11 = vector.load %arg5[%c0_6, %c0_7, %c0_8] : memref<1x96x128xf32, #tpu.memory_space<vmem>>, vector<1x96x128xf32>
    %12 = vector.shape_cast %11 : vector<1x96x128xf32> to vector<96x128xf32>
    %13 = vector.shape_cast %10 : vector<96x128xf32> to vector<1x96x128xf32>
    tpu.vector_store %arg5[%c0_6, %c0_7, %c0_8], %13 {strides = array<i32>} : memref<1x96x128xf32, #tpu.memory_space<vmem>>, vector<1x96x128xf32>,
    return
  }
  func.func @transform_0(%arg0: i32, %arg1: i32) -> (i32, i32, i32) {
    %c0_i32 = arith.constant 0 : i32
    %c0_i32_0 = arith.constant 0 : i32
    return %arg0, %arg1, %c0_i32 : i32, i32, i32
  }
  func.func @transform_1(%arg0: i32, %arg1: i32) -> (i32, i32) {
    %c0_i32 = arith.constant 0 : i32
    %c0_i32_0 = arith.constant 0 : i32
    %c0_i32_1 = arith.constant 0 : i32
    return %c0_i32, %c0_i32_0 : i32, i32
  }
  func.func @transform_2(%arg0: i32, %arg1: i32) -> (i32, i32) {
    %c0_i32 = arith.constant 0 : i32
    %c0_i32_0 = arith.constant 0 : i32
    %c0_i32_1 = arith.constant 0 : i32
    return %c0_i32, %c0_i32_0 : i32, i32
  }
  func.func @transform_3(%arg0: i32, %arg1: i32) -> (i32, i32, i32) {
    %c0_i32 = arith.constant 0 : i32
    %c0_i32_0 = arith.constant 0 : i32
    return %arg0, %arg1, %c0_i32 : i32, i32, i32
  }
}

module attributes {stable_mosaic.version = 11 : i64} {
  func.func @_conv3x3_kernel(%arg0: i32, %arg1: i32, %arg2: memref<1x96x128xbf16, #tpu.memory_space<vmem>>, %arg3: memref<1x48x128xbf16, #tpu.memory_space<vmem>>, %arg4: memref<96x1xf32, #tpu.memory_space<vmem>>, %arg5: memref<1x128xf32, #tpu.memory_space<vmem>>, %arg6: memref<1x128xf32, #tpu.memory_space<vmem>>, %arg7: memref<9x128x128xbf16, #tpu.memory_space<vmem>>, %arg8: memref<1x96x128xbf16, #tpu.memory_space<vmem>>, %arg9: memref<1x1x1x128xf32, #tpu.memory_space<vmem>>, %arg10: memref<1x1x1x128xf32, #tpu.memory_space<vmem>>, %arg11: memref<144x128xbf16, #tpu.memory_space<vmem>>) attributes {dimension_semantics = [#tpu.dimension_semantics<parallel>, #tpu.dimension_semantics<parallel>], iteration_bounds = array<i64: 2, 3>, scalar_prefetch = 0 : i64, scratch_operands = 1 : i64, tpu.core_type = #tpu.core_type<tc>, window_params = [{transform_indices = @transform_0, window_bounds = array<i64: 1, 96, 128>}, {transform_indices = @transform_1, window_bounds = array<i64: 1, 48, 128>}, {transform_indices = @transform_2, window_bounds = array<i64: 96, 1>}, {pipeline_mode = #tpu.pipeline_mode<synchronous>, transform_indices = @transform_3, window_bounds = array<i64: 1, 128>}, {pipeline_mode = #tpu.pipeline_mode<synchronous>, transform_indices = @transform_4, window_bounds = array<i64: 1, 128>}, {pipeline_mode = #tpu.pipeline_mode<synchronous>, transform_indices = @transform_5, window_bounds = array<i64: 9, 128, 128>}, {transform_indices = @transform_6, window_bounds = array<i64: 1, 96, 128>}, {transform_indices = @transform_7, window_bounds = array<i64: 1, 1, 1, 128>}, {transform_indices = @transform_8, window_bounds = array<i64: 1, 1, 1, 128>}]} {
    %c0 = arith.constant 0 : index
    %c0_0 = arith.constant 0 : index
    %c0_1 = arith.constant 0 : index
    %0 = vector.load %arg2[%c0, %c0_0, %c0_1] : memref<1x96x128xbf16, #tpu.memory_space<vmem>>, vector<1x96x128xbf16>
    %1 = vector.shape_cast %0 : vector<1x96x128xbf16> to vector<96x128xbf16>
    %c0_2 = arith.constant 0 : index
    %c0_3 = arith.constant 0 : index
    %c0_4 = arith.constant 0 : index
    %2 = vector.load %arg3[%c0_2, %c0_3, %c0_4] : memref<1x48x128xbf16, #tpu.memory_space<vmem>>, vector<1x48x128xbf16>
    %3 = vector.shape_cast %2 : vector<1x48x128xbf16> to vector<48x128xbf16>
    %c0_5 = arith.constant 0 : index
    %c0_6 = arith.constant 0 : index
    %4 = vector.load %arg5[%c0_5, %c0_6] : memref<1x128xf32, #tpu.memory_space<vmem>>, vector<1x128xf32>
    %c0_7 = arith.constant 0 : index
    %c0_8 = arith.constant 0 : index
    %5 = vector.load %arg6[%c0_7, %c0_8] : memref<1x128xf32, #tpu.memory_space<vmem>>, vector<1x128xf32>
    %6 = arith.extf %1 : vector<96x128xbf16> to vector<96x128xf32>
    %7 = vector.broadcast %4 : vector<1x128xf32> to vector<96x128xf32>
    %8 = arith.mulf %6, %7 : vector<96x128xf32>
    %9 = vector.broadcast %5 : vector<1x128xf32> to vector<96x128xf32>
    %10 = arith.addf %8, %9 : vector<96x128xf32>
    %cst = arith.constant 0.000000e+00 : f32
    %11 = vector.broadcast %cst : f32 to vector<96x128xf32>
    %12 = arith.maximumf %10, %11 : vector<96x128xf32>
    %13 = arith.truncf %12 : vector<96x128xf32> to vector<96x128xbf16>
    %14 = arith.extf %3 : vector<48x128xbf16> to vector<48x128xf32>
    %15 = vector.broadcast %4 : vector<1x128xf32> to vector<48x128xf32>
    %16 = arith.mulf %14, %15 : vector<48x128xf32>
    %17 = vector.broadcast %5 : vector<1x128xf32> to vector<48x128xf32>
    %18 = arith.addf %16, %17 : vector<48x128xf32>
    %cst_9 = arith.constant 0.000000e+00 : f32
    %19 = vector.broadcast %cst_9 : f32 to vector<48x128xf32>
    %20 = arith.maximumf %18, %19 : vector<48x128xf32>
    %21 = arith.truncf %20 : vector<48x128xf32> to vector<48x128xbf16>
    %c0_10 = arith.constant 0 : index
    %c0_11 = arith.constant 0 : index
    %22 = vector.load %arg11[%c0_10, %c0_11] : memref<144x128xbf16, #tpu.memory_space<vmem>>, vector<96x128xbf16>
    tpu.vector_store %arg11[%c0_10, %c0_11], %13 {strides = array<i32>} : memref<144x128xbf16, #tpu.memory_space<vmem>>, vector<96x128xbf16>,
    %c96 = arith.constant 96 : index
    %c0_12 = arith.constant 0 : index
    %23 = vector.load %arg11[%c96, %c0_12] : memref<144x128xbf16, #tpu.memory_space<vmem>>, vector<48x128xbf16>
    tpu.vector_store %arg11[%c96, %c0_12], %21 {strides = array<i32>} : memref<144x128xbf16, #tpu.memory_space<vmem>>, vector<48x128xbf16>,
    %c0_13 = arith.constant 0 : index
    %c0_14 = arith.constant 0 : index
    %24 = vector.load %arg11[%c0_13, %c0_14] : memref<144x128xbf16, #tpu.memory_space<vmem>>, vector<96x128xbf16>
    %c0_15 = arith.constant 0 : index
    %c0_16 = arith.constant 0 : index
    %c0_17 = arith.constant 0 : index
    %25 = vector.load %arg7[%c0_15, %c0_16, %c0_17] : memref<9x128x128xbf16, #tpu.memory_space<vmem>>, vector<1x128x128xbf16>
    %26 = vector.shape_cast %25 : vector<1x128x128xbf16> to vector<128x128xbf16>
    %cst_18 = arith.constant dense<0.000000e+00> : vector<96x128xf32>
    %27 = tpu.matmul %24, %26, %cst_18 {dimension_numbers = #tpu.dot_dimension_numbers<[1], [0], [0], [1], [0, 0, 1, 1], [], []>} : vector<96x128xbf16>, vector<128x128xbf16>, vector<96x128xf32> -> vector<96x128xf32>
    %c1 = arith.constant 1 : index
    %c0_19 = arith.constant 0 : index
    %28 = vector.load %arg11[%c1, %c0_19] : memref<144x128xbf16, #tpu.memory_space<vmem>>, vector<96x128xbf16>
    %c1_20 = arith.constant 1 : index
    %c0_21 = arith.constant 0 : index
    %c0_22 = arith.constant 0 : index
    %29 = vector.load %arg7[%c1_20, %c0_21, %c0_22] : memref<9x128x128xbf16, #tpu.memory_space<vmem>>, vector<1x128x128xbf16>
    %30 = vector.shape_cast %29 : vector<1x128x128xbf16> to vector<128x128xbf16>
    %cst_23 = arith.constant dense<0.000000e+00> : vector<96x128xf32>
    %31 = tpu.matmul %28, %30, %cst_23 {dimension_numbers = #tpu.dot_dimension_numbers<[1], [0], [0], [1], [0, 0, 1, 1], [], []>} : vector<96x128xbf16>, vector<128x128xbf16>, vector<96x128xf32> -> vector<96x128xf32>
    %32 = arith.addf %27, %31 : vector<96x128xf32>
    %c2 = arith.constant 2 : index
    %c0_24 = arith.constant 0 : index
    %33 = vector.load %arg11[%c2, %c0_24] : memref<144x128xbf16, #tpu.memory_space<vmem>>, vector<96x128xbf16>
    %c2_25 = arith.constant 2 : index
    %c0_26 = arith.constant 0 : index
    %c0_27 = arith.constant 0 : index
    %34 = vector.load %arg7[%c2_25, %c0_26, %c0_27] : memref<9x128x128xbf16, #tpu.memory_space<vmem>>, vector<1x128x128xbf16>
    %35 = vector.shape_cast %34 : vector<1x128x128xbf16> to vector<128x128xbf16>
    %cst_28 = arith.constant dense<0.000000e+00> : vector<96x128xf32>
    %36 = tpu.matmul %33, %35, %cst_28 {dimension_numbers = #tpu.dot_dimension_numbers<[1], [0], [0], [1], [0, 0, 1, 1], [], []>} : vector<96x128xbf16>, vector<128x128xbf16>, vector<96x128xf32> -> vector<96x128xf32>
    %37 = arith.addf %32, %36 : vector<96x128xf32>
    %c16 = arith.constant 16 : index
    %c0_29 = arith.constant 0 : index
    %38 = vector.load %arg11[%c16, %c0_29] : memref<144x128xbf16, #tpu.memory_space<vmem>>, vector<96x128xbf16>
    %c3 = arith.constant 3 : index
    %c0_30 = arith.constant 0 : index
    %c0_31 = arith.constant 0 : index
    %39 = vector.load %arg7[%c3, %c0_30, %c0_31] : memref<9x128x128xbf16, #tpu.memory_space<vmem>>, vector<1x128x128xbf16>
    %40 = vector.shape_cast %39 : vector<1x128x128xbf16> to vector<128x128xbf16>
    %cst_32 = arith.constant dense<0.000000e+00> : vector<96x128xf32>
    %41 = tpu.matmul %38, %40, %cst_32 {dimension_numbers = #tpu.dot_dimension_numbers<[1], [0], [0], [1], [0, 0, 1, 1], [], []>} : vector<96x128xbf16>, vector<128x128xbf16>, vector<96x128xf32> -> vector<96x128xf32>
    %42 = arith.addf %37, %41 : vector<96x128xf32>
    %c17 = arith.constant 17 : index
    %c0_33 = arith.constant 0 : index
    %43 = vector.load %arg11[%c17, %c0_33] : memref<144x128xbf16, #tpu.memory_space<vmem>>, vector<96x128xbf16>
    %c4 = arith.constant 4 : index
    %c0_34 = arith.constant 0 : index
    %c0_35 = arith.constant 0 : index
    %44 = vector.load %arg7[%c4, %c0_34, %c0_35] : memref<9x128x128xbf16, #tpu.memory_space<vmem>>, vector<1x128x128xbf16>
    %45 = vector.shape_cast %44 : vector<1x128x128xbf16> to vector<128x128xbf16>
    %cst_36 = arith.constant dense<0.000000e+00> : vector<96x128xf32>
    %46 = tpu.matmul %43, %45, %cst_36 {dimension_numbers = #tpu.dot_dimension_numbers<[1], [0], [0], [1], [0, 0, 1, 1], [], []>} : vector<96x128xbf16>, vector<128x128xbf16>, vector<96x128xf32> -> vector<96x128xf32>
    %47 = arith.addf %42, %46 : vector<96x128xf32>
    %c18 = arith.constant 18 : index
    %c0_37 = arith.constant 0 : index
    %48 = vector.load %arg11[%c18, %c0_37] : memref<144x128xbf16, #tpu.memory_space<vmem>>, vector<96x128xbf16>
    %c5 = arith.constant 5 : index
    %c0_38 = arith.constant 0 : index
    %c0_39 = arith.constant 0 : index
    %49 = vector.load %arg7[%c5, %c0_38, %c0_39] : memref<9x128x128xbf16, #tpu.memory_space<vmem>>, vector<1x128x128xbf16>
    %50 = vector.shape_cast %49 : vector<1x128x128xbf16> to vector<128x128xbf16>
    %cst_40 = arith.constant dense<0.000000e+00> : vector<96x128xf32>
    %51 = tpu.matmul %48, %50, %cst_40 {dimension_numbers = #tpu.dot_dimension_numbers<[1], [0], [0], [1], [0, 0, 1, 1], [], []>} : vector<96x128xbf16>, vector<128x128xbf16>, vector<96x128xf32> -> vector<96x128xf32>
    %52 = arith.addf %47, %51 : vector<96x128xf32>
    %c32 = arith.constant 32 : index
    %c0_41 = arith.constant 0 : index
    %53 = vector.load %arg11[%c32, %c0_41] : memref<144x128xbf16, #tpu.memory_space<vmem>>, vector<96x128xbf16>
    %c6 = arith.constant 6 : index
    %c0_42 = arith.constant 0 : index
    %c0_43 = arith.constant 0 : index
    %54 = vector.load %arg7[%c6, %c0_42, %c0_43] : memref<9x128x128xbf16, #tpu.memory_space<vmem>>, vector<1x128x128xbf16>
    %55 = vector.shape_cast %54 : vector<1x128x128xbf16> to vector<128x128xbf16>
    %cst_44 = arith.constant dense<0.000000e+00> : vector<96x128xf32>
    %56 = tpu.matmul %53, %55, %cst_44 {dimension_numbers = #tpu.dot_dimension_numbers<[1], [0], [0], [1], [0, 0, 1, 1], [], []>} : vector<96x128xbf16>, vector<128x128xbf16>, vector<96x128xf32> -> vector<96x128xf32>
    %57 = arith.addf %52, %56 : vector<96x128xf32>
    %c33 = arith.constant 33 : index
    %c0_45 = arith.constant 0 : index
    %58 = vector.load %arg11[%c33, %c0_45] : memref<144x128xbf16, #tpu.memory_space<vmem>>, vector<96x128xbf16>
    %c7 = arith.constant 7 : index
    %c0_46 = arith.constant 0 : index
    %c0_47 = arith.constant 0 : index
    %59 = vector.load %arg7[%c7, %c0_46, %c0_47] : memref<9x128x128xbf16, #tpu.memory_space<vmem>>, vector<1x128x128xbf16>
    %60 = vector.shape_cast %59 : vector<1x128x128xbf16> to vector<128x128xbf16>
    %cst_48 = arith.constant dense<0.000000e+00> : vector<96x128xf32>
    %61 = tpu.matmul %58, %60, %cst_48 {dimension_numbers = #tpu.dot_dimension_numbers<[1], [0], [0], [1], [0, 0, 1, 1], [], []>} : vector<96x128xbf16>, vector<128x128xbf16>, vector<96x128xf32> -> vector<96x128xf32>
    %62 = arith.addf %57, %61 : vector<96x128xf32>
    %c34 = arith.constant 34 : index
    %c0_49 = arith.constant 0 : index
    %63 = vector.load %arg11[%c34, %c0_49] : memref<144x128xbf16, #tpu.memory_space<vmem>>, vector<96x128xbf16>
    %c8 = arith.constant 8 : index
    %c0_50 = arith.constant 0 : index
    %c0_51 = arith.constant 0 : index
    %64 = vector.load %arg7[%c8, %c0_50, %c0_51] : memref<9x128x128xbf16, #tpu.memory_space<vmem>>, vector<1x128x128xbf16>
    %65 = vector.shape_cast %64 : vector<1x128x128xbf16> to vector<128x128xbf16>
    %cst_52 = arith.constant dense<0.000000e+00> : vector<96x128xf32>
    %66 = tpu.matmul %63, %65, %cst_52 {dimension_numbers = #tpu.dot_dimension_numbers<[1], [0], [0], [1], [0, 0, 1, 1], [], []>} : vector<96x128xbf16>, vector<128x128xbf16>, vector<96x128xf32> -> vector<96x128xf32>
    %67 = arith.addf %62, %66 : vector<96x128xf32>
    %68 = arith.truncf %67 : vector<96x128xf32> to vector<96x128xbf16>
    %c0_53 = arith.constant 0 : index
    %c0_54 = arith.constant 0 : index
    %c0_55 = arith.constant 0 : index
    %69 = vector.load %arg8[%c0_53, %c0_54, %c0_55] : memref<1x96x128xbf16, #tpu.memory_space<vmem>>, vector<1x96x128xbf16>
    %70 = vector.shape_cast %69 : vector<1x96x128xbf16> to vector<96x128xbf16>
    %71 = vector.shape_cast %68 : vector<96x128xbf16> to vector<1x96x128xbf16>
    tpu.vector_store %arg8[%c0_53, %c0_54, %c0_55], %71 {strides = array<i32>} : memref<1x96x128xbf16, #tpu.memory_space<vmem>>, vector<1x96x128xbf16>,
    %c0_56 = arith.constant 0 : index
    %c0_57 = arith.constant 0 : index
    %72 = vector.load %arg4[%c0_56, %c0_57] : memref<96x1xf32, #tpu.memory_space<vmem>>, vector<96x1xf32>
    %cst_58 = arith.constant dense<0.000000e+00> : vector<1xf32>
    %73 = vector.multi_reduction <add>, %72, %cst_58 [0] : vector<96x1xf32> to vector<1xf32>
    %74 = vector.shape_cast %73 : vector<1xf32> to vector<1x1xf32>
    %cst_59 = arith.constant 0.000000e+00 : f32
    %75 = vector.broadcast %cst_59 : f32 to vector<96x1xf32>
    %76 = arith.cmpf ogt, %72, %75 : vector<96x1xf32>
    %cst_60 = arith.constant 0.000000e+00 : f32
    %77 = vector.shape_cast %76 : vector<96x1xi1> to vector<96x1xi1>
    %78 = vector.broadcast %77 : vector<96x1xi1> to vector<96x128xi1>
    %79 = vector.broadcast %cst_60 : f32 to vector<96x128xf32>
    %80 = arith.select %78, %67, %79 : vector<96x128xi1>, vector<96x128xf32>
    %cst_61 = arith.constant dense<0.000000e+00> : vector<128xf32>
    %81 = vector.multi_reduction <add>, %80, %cst_61 [0] : vector<96x128xf32> to vector<128xf32>
    %82 = vector.shape_cast %81 : vector<128xf32> to vector<1x128xf32>
    %cst_62 = arith.constant 1.000000e+00 : f32
    %83 = vector.broadcast %cst_62 : f32 to vector<1x1xf32>
    %84 = arith.maximumf %74, %83 : vector<1x1xf32>
    %85 = vector.broadcast %84 : vector<1x1xf32> to vector<1x128xf32>
    %86 = arith.divf %82, %85 : vector<1x128xf32>
    %cst_63 = arith.constant 0.000000e+00 : f32
    %87 = vector.broadcast %cst_63 : f32 to vector<96x1xf32>
    %88 = arith.cmpf ogt, %72, %87 : vector<96x1xf32>
    %89 = vector.broadcast %86 : vector<1x128xf32> to vector<96x128xf32>
    %90 = arith.subf %67, %89 : vector<96x128xf32>
    %cst_64 = arith.constant 0.000000e+00 : f32
    %91 = vector.shape_cast %88 : vector<96x1xi1> to vector<96x1xi1>
    %92 = vector.broadcast %91 : vector<96x1xi1> to vector<96x128xi1>
    %93 = vector.broadcast %cst_64 : f32 to vector<96x128xf32>
    %94 = arith.select %92, %90, %93 : vector<96x128xi1>, vector<96x128xf32>
    %c0_65 = arith.constant 0 : index
    %c0_66 = arith.constant 0 : index
    %c0_67 = arith.constant 0 : index
    %c0_68 = arith.constant 0 : index
    %95 = vector.load %arg9[%c0_65, %c0_66, %c0_67, %c0_68] : memref<1x1x1x128xf32, #tpu.memory_space<vmem>>, vector<1x1x1x128xf32>
    %96 = vector.shape_cast %95 : vector<1x1x1x128xf32> to vector<1x128xf32>
    %97 = vector.shape_cast %82 : vector<1x128xf32> to vector<1x1x1x128xf32>
    tpu.vector_store %arg9[%c0_65, %c0_66, %c0_67, %c0_68], %97 {strides = array<i32>} : memref<1x1x1x128xf32, #tpu.memory_space<vmem>>, vector<1x1x1x128xf32>,
    %98 = arith.mulf %94, %94 : vector<96x128xf32>
    %cst_69 = arith.constant dense<0.000000e+00> : vector<128xf32>
    %99 = vector.multi_reduction <add>, %98, %cst_69 [0] : vector<96x128xf32> to vector<128xf32>
    %100 = vector.shape_cast %99 : vector<128xf32> to vector<1x128xf32>
    %c0_70 = arith.constant 0 : index
    %c0_71 = arith.constant 0 : index
    %c0_72 = arith.constant 0 : index
    %c0_73 = arith.constant 0 : index
    %101 = vector.load %arg10[%c0_70, %c0_71, %c0_72, %c0_73] : memref<1x1x1x128xf32, #tpu.memory_space<vmem>>, vector<1x1x1x128xf32>
    %102 = vector.shape_cast %101 : vector<1x1x1x128xf32> to vector<1x128xf32>
    %103 = vector.shape_cast %100 : vector<1x128xf32> to vector<1x1x1x128xf32>
    tpu.vector_store %arg10[%c0_70, %c0_71, %c0_72, %c0_73], %103 {strides = array<i32>} : memref<1x1x1x128xf32, #tpu.memory_space<vmem>>, vector<1x1x1x128xf32>,
    return
  }
  func.func @transform_0(%arg0: i32, %arg1: i32) -> (i32, i32, i32) {
    %c0_i32 = arith.constant 0 : i32
    %c0_i32_0 = arith.constant 0 : i32
    return %arg0, %arg1, %c0_i32 : i32, i32, i32
  }
  func.func @transform_1(%arg0: i32, %arg1: i32) -> (i32, i32, i32) {
    %c1_i32 = arith.constant 1 : i32
    %0 = arith.addi %arg1, %c1_i32 : i32
    %c2_i32 = arith.constant 2 : i32
    %1 = arith.muli %0, %c2_i32 : i32
    %c4_i32 = arith.constant 4 : i32
    %2 = arith.minsi %1, %c4_i32 : i32
    %c0_i32 = arith.constant 0 : i32
    %c0_i32_0 = arith.constant 0 : i32
    return %arg0, %2, %c0_i32 : i32, i32, i32
  }
  func.func @transform_2(%arg0: i32, %arg1: i32) -> (i32, i32) {
    %c0_i32 = arith.constant 0 : i32
    %c0_i32_0 = arith.constant 0 : i32
    return %arg1, %c0_i32 : i32, i32
  }
  func.func @transform_3(%arg0: i32, %arg1: i32) -> (i32, i32) {
    %c0_i32 = arith.constant 0 : i32
    %c0_i32_0 = arith.constant 0 : i32
    %c0_i32_1 = arith.constant 0 : i32
    return %c0_i32, %c0_i32_0 : i32, i32
  }
  func.func @transform_4(%arg0: i32, %arg1: i32) -> (i32, i32) {
    %c0_i32 = arith.constant 0 : i32
    %c0_i32_0 = arith.constant 0 : i32
    %c0_i32_1 = arith.constant 0 : i32
    return %c0_i32, %c0_i32_0 : i32, i32
  }
  func.func @transform_5(%arg0: i32, %arg1: i32) -> (i32, i32, i32) {
    %c0_i32 = arith.constant 0 : i32
    %c0_i32_0 = arith.constant 0 : i32
    %c0_i32_1 = arith.constant 0 : i32
    %c0_i32_2 = arith.constant 0 : i32
    return %c0_i32, %c0_i32_0, %c0_i32_1 : i32, i32, i32
  }
  func.func @transform_6(%arg0: i32, %arg1: i32) -> (i32, i32, i32) {
    %c0_i32 = arith.constant 0 : i32
    %c0_i32_0 = arith.constant 0 : i32
    return %arg0, %arg1, %c0_i32 : i32, i32, i32
  }
  func.func @transform_7(%arg0: i32, %arg1: i32) -> (i32, i32, i32, i32) {
    %c0_i32 = arith.constant 0 : i32
    %c0_i32_0 = arith.constant 0 : i32
    %c0_i32_1 = arith.constant 0 : i32
    return %arg0, %arg1, %c0_i32, %c0_i32_0 : i32, i32, i32, i32
  }
  func.func @transform_8(%arg0: i32, %arg1: i32) -> (i32, i32, i32, i32) {
    %c0_i32 = arith.constant 0 : i32
    %c0_i32_0 = arith.constant 0 : i32
    %c0_i32_1 = arith.constant 0 : i32
    return %arg0, %arg1, %c0_i32, %c0_i32_0 : i32, i32, i32, i32
  }
}

module attributes {stable_mosaic.version = 11 : i64} {
  func.func @_conv3x3_kernel(%arg0: i32, %arg1: i32, %arg2: memref<1x96x128xbf16, #tpu.memory_space<vmem>>, %arg3: memref<1x48x128xbf16, #tpu.memory_space<vmem>>, %arg4: memref<96x1xf32, #tpu.memory_space<vmem>>, %arg5: memref<9x128x128xbf16, #tpu.memory_space<vmem>>, %arg6: memref<1x96x128xbf16, #tpu.memory_space<vmem>>, %arg7: memref<1x1x1x128xf32, #tpu.memory_space<vmem>>, %arg8: memref<1x1x1x128xf32, #tpu.memory_space<vmem>>, %arg9: memref<144x128xbf16, #tpu.memory_space<vmem>>) attributes {dimension_semantics = [#tpu.dimension_semantics<parallel>, #tpu.dimension_semantics<parallel>], iteration_bounds = array<i64: 2, 3>, scalar_prefetch = 0 : i64, scratch_operands = 1 : i64, tpu.core_type = #tpu.core_type<tc>, window_params = [{transform_indices = @transform_0, window_bounds = array<i64: 1, 96, 128>}, {transform_indices = @transform_1, window_bounds = array<i64: 1, 48, 128>}, {transform_indices = @transform_2, window_bounds = array<i64: 96, 1>}, {pipeline_mode = #tpu.pipeline_mode<synchronous>, transform_indices = @transform_3, window_bounds = array<i64: 9, 128, 128>}, {transform_indices = @transform_4, window_bounds = array<i64: 1, 96, 128>}, {transform_indices = @transform_5, window_bounds = array<i64: 1, 1, 1, 128>}, {transform_indices = @transform_6, window_bounds = array<i64: 1, 1, 1, 128>}]} {
    %c0 = arith.constant 0 : index
    %c0_0 = arith.constant 0 : index
    %c0_1 = arith.constant 0 : index
    %0 = vector.load %arg2[%c0, %c0_0, %c0_1] : memref<1x96x128xbf16, #tpu.memory_space<vmem>>, vector<1x96x128xbf16>
    %1 = vector.shape_cast %0 : vector<1x96x128xbf16> to vector<96x128xbf16>
    %c0_2 = arith.constant 0 : index
    %c0_3 = arith.constant 0 : index
    %c0_4 = arith.constant 0 : index
    %2 = vector.load %arg3[%c0_2, %c0_3, %c0_4] : memref<1x48x128xbf16, #tpu.memory_space<vmem>>, vector<1x48x128xbf16>
    %3 = vector.shape_cast %2 : vector<1x48x128xbf16> to vector<48x128xbf16>
    %c0_5 = arith.constant 0 : index
    %c0_6 = arith.constant 0 : index
    %4 = vector.load %arg9[%c0_5, %c0_6] : memref<144x128xbf16, #tpu.memory_space<vmem>>, vector<96x128xbf16>
    tpu.vector_store %arg9[%c0_5, %c0_6], %1 {strides = array<i32>} : memref<144x128xbf16, #tpu.memory_space<vmem>>, vector<96x128xbf16>,
    %c96 = arith.constant 96 : index
    %c0_7 = arith.constant 0 : index
    %5 = vector.load %arg9[%c96, %c0_7] : memref<144x128xbf16, #tpu.memory_space<vmem>>, vector<48x128xbf16>
    tpu.vector_store %arg9[%c96, %c0_7], %3 {strides = array<i32>} : memref<144x128xbf16, #tpu.memory_space<vmem>>, vector<48x128xbf16>,
    %c0_8 = arith.constant 0 : index
    %c0_9 = arith.constant 0 : index
    %6 = vector.load %arg9[%c0_8, %c0_9] : memref<144x128xbf16, #tpu.memory_space<vmem>>, vector<96x128xbf16>
    %c0_10 = arith.constant 0 : index
    %c0_11 = arith.constant 0 : index
    %c0_12 = arith.constant 0 : index
    %7 = vector.load %arg5[%c0_10, %c0_11, %c0_12] : memref<9x128x128xbf16, #tpu.memory_space<vmem>>, vector<1x128x128xbf16>
    %8 = vector.shape_cast %7 : vector<1x128x128xbf16> to vector<128x128xbf16>
    %cst = arith.constant dense<0.000000e+00> : vector<96x128xf32>
    %9 = tpu.matmul %6, %8, %cst {dimension_numbers = #tpu.dot_dimension_numbers<[1], [0], [0], [1], [0, 0, 1, 1], [], []>} : vector<96x128xbf16>, vector<128x128xbf16>, vector<96x128xf32> -> vector<96x128xf32>
    %c1 = arith.constant 1 : index
    %c0_13 = arith.constant 0 : index
    %10 = vector.load %arg9[%c1, %c0_13] : memref<144x128xbf16, #tpu.memory_space<vmem>>, vector<96x128xbf16>
    %c1_14 = arith.constant 1 : index
    %c0_15 = arith.constant 0 : index
    %c0_16 = arith.constant 0 : index
    %11 = vector.load %arg5[%c1_14, %c0_15, %c0_16] : memref<9x128x128xbf16, #tpu.memory_space<vmem>>, vector<1x128x128xbf16>
    %12 = vector.shape_cast %11 : vector<1x128x128xbf16> to vector<128x128xbf16>
    %cst_17 = arith.constant dense<0.000000e+00> : vector<96x128xf32>
    %13 = tpu.matmul %10, %12, %cst_17 {dimension_numbers = #tpu.dot_dimension_numbers<[1], [0], [0], [1], [0, 0, 1, 1], [], []>} : vector<96x128xbf16>, vector<128x128xbf16>, vector<96x128xf32> -> vector<96x128xf32>
    %14 = arith.addf %9, %13 : vector<96x128xf32>
    %c2 = arith.constant 2 : index
    %c0_18 = arith.constant 0 : index
    %15 = vector.load %arg9[%c2, %c0_18] : memref<144x128xbf16, #tpu.memory_space<vmem>>, vector<96x128xbf16>
    %c2_19 = arith.constant 2 : index
    %c0_20 = arith.constant 0 : index
    %c0_21 = arith.constant 0 : index
    %16 = vector.load %arg5[%c2_19, %c0_20, %c0_21] : memref<9x128x128xbf16, #tpu.memory_space<vmem>>, vector<1x128x128xbf16>
    %17 = vector.shape_cast %16 : vector<1x128x128xbf16> to vector<128x128xbf16>
    %cst_22 = arith.constant dense<0.000000e+00> : vector<96x128xf32>
    %18 = tpu.matmul %15, %17, %cst_22 {dimension_numbers = #tpu.dot_dimension_numbers<[1], [0], [0], [1], [0, 0, 1, 1], [], []>} : vector<96x128xbf16>, vector<128x128xbf16>, vector<96x128xf32> -> vector<96x128xf32>
    %19 = arith.addf %14, %18 : vector<96x128xf32>
    %c16 = arith.constant 16 : index
    %c0_23 = arith.constant 0 : index
    %20 = vector.load %arg9[%c16, %c0_23] : memref<144x128xbf16, #tpu.memory_space<vmem>>, vector<96x128xbf16>
    %c3 = arith.constant 3 : index
    %c0_24 = arith.constant 0 : index
    %c0_25 = arith.constant 0 : index
    %21 = vector.load %arg5[%c3, %c0_24, %c0_25] : memref<9x128x128xbf16, #tpu.memory_space<vmem>>, vector<1x128x128xbf16>
    %22 = vector.shape_cast %21 : vector<1x128x128xbf16> to vector<128x128xbf16>
    %cst_26 = arith.constant dense<0.000000e+00> : vector<96x128xf32>
    %23 = tpu.matmul %20, %22, %cst_26 {dimension_numbers = #tpu.dot_dimension_numbers<[1], [0], [0], [1], [0, 0, 1, 1], [], []>} : vector<96x128xbf16>, vector<128x128xbf16>, vector<96x128xf32> -> vector<96x128xf32>
    %24 = arith.addf %19, %23 : vector<96x128xf32>
    %c17 = arith.constant 17 : index
    %c0_27 = arith.constant 0 : index
    %25 = vector.load %arg9[%c17, %c0_27] : memref<144x128xbf16, #tpu.memory_space<vmem>>, vector<96x128xbf16>
    %c4 = arith.constant 4 : index
    %c0_28 = arith.constant 0 : index
    %c0_29 = arith.constant 0 : index
    %26 = vector.load %arg5[%c4, %c0_28, %c0_29] : memref<9x128x128xbf16, #tpu.memory_space<vmem>>, vector<1x128x128xbf16>
    %27 = vector.shape_cast %26 : vector<1x128x128xbf16> to vector<128x128xbf16>
    %cst_30 = arith.constant dense<0.000000e+00> : vector<96x128xf32>
    %28 = tpu.matmul %25, %27, %cst_30 {dimension_numbers = #tpu.dot_dimension_numbers<[1], [0], [0], [1], [0, 0, 1, 1], [], []>} : vector<96x128xbf16>, vector<128x128xbf16>, vector<96x128xf32> -> vector<96x128xf32>
    %29 = arith.addf %24, %28 : vector<96x128xf32>
    %c18 = arith.constant 18 : index
    %c0_31 = arith.constant 0 : index
    %30 = vector.load %arg9[%c18, %c0_31] : memref<144x128xbf16, #tpu.memory_space<vmem>>, vector<96x128xbf16>
    %c5 = arith.constant 5 : index
    %c0_32 = arith.constant 0 : index
    %c0_33 = arith.constant 0 : index
    %31 = vector.load %arg5[%c5, %c0_32, %c0_33] : memref<9x128x128xbf16, #tpu.memory_space<vmem>>, vector<1x128x128xbf16>
    %32 = vector.shape_cast %31 : vector<1x128x128xbf16> to vector<128x128xbf16>
    %cst_34 = arith.constant dense<0.000000e+00> : vector<96x128xf32>
    %33 = tpu.matmul %30, %32, %cst_34 {dimension_numbers = #tpu.dot_dimension_numbers<[1], [0], [0], [1], [0, 0, 1, 1], [], []>} : vector<96x128xbf16>, vector<128x128xbf16>, vector<96x128xf32> -> vector<96x128xf32>
    %34 = arith.addf %29, %33 : vector<96x128xf32>
    %c32 = arith.constant 32 : index
    %c0_35 = arith.constant 0 : index
    %35 = vector.load %arg9[%c32, %c0_35] : memref<144x128xbf16, #tpu.memory_space<vmem>>, vector<96x128xbf16>
    %c6 = arith.constant 6 : index
    %c0_36 = arith.constant 0 : index
    %c0_37 = arith.constant 0 : index
    %36 = vector.load %arg5[%c6, %c0_36, %c0_37] : memref<9x128x128xbf16, #tpu.memory_space<vmem>>, vector<1x128x128xbf16>
    %37 = vector.shape_cast %36 : vector<1x128x128xbf16> to vector<128x128xbf16>
    %cst_38 = arith.constant dense<0.000000e+00> : vector<96x128xf32>
    %38 = tpu.matmul %35, %37, %cst_38 {dimension_numbers = #tpu.dot_dimension_numbers<[1], [0], [0], [1], [0, 0, 1, 1], [], []>} : vector<96x128xbf16>, vector<128x128xbf16>, vector<96x128xf32> -> vector<96x128xf32>
    %39 = arith.addf %34, %38 : vector<96x128xf32>
    %c33 = arith.constant 33 : index
    %c0_39 = arith.constant 0 : index
    %40 = vector.load %arg9[%c33, %c0_39] : memref<144x128xbf16, #tpu.memory_space<vmem>>, vector<96x128xbf16>
    %c7 = arith.constant 7 : index
    %c0_40 = arith.constant 0 : index
    %c0_41 = arith.constant 0 : index
    %41 = vector.load %arg5[%c7, %c0_40, %c0_41] : memref<9x128x128xbf16, #tpu.memory_space<vmem>>, vector<1x128x128xbf16>
    %42 = vector.shape_cast %41 : vector<1x128x128xbf16> to vector<128x128xbf16>
    %cst_42 = arith.constant dense<0.000000e+00> : vector<96x128xf32>
    %43 = tpu.matmul %40, %42, %cst_42 {dimension_numbers = #tpu.dot_dimension_numbers<[1], [0], [0], [1], [0, 0, 1, 1], [], []>} : vector<96x128xbf16>, vector<128x128xbf16>, vector<96x128xf32> -> vector<96x128xf32>
    %44 = arith.addf %39, %43 : vector<96x128xf32>
    %c34 = arith.constant 34 : index
    %c0_43 = arith.constant 0 : index
    %45 = vector.load %arg9[%c34, %c0_43] : memref<144x128xbf16, #tpu.memory_space<vmem>>, vector<96x128xbf16>
    %c8 = arith.constant 8 : index
    %c0_44 = arith.constant 0 : index
    %c0_45 = arith.constant 0 : index
    %46 = vector.load %arg5[%c8, %c0_44, %c0_45] : memref<9x128x128xbf16, #tpu.memory_space<vmem>>, vector<1x128x128xbf16>
    %47 = vector.shape_cast %46 : vector<1x128x128xbf16> to vector<128x128xbf16>
    %cst_46 = arith.constant dense<0.000000e+00> : vector<96x128xf32>
    %48 = tpu.matmul %45, %47, %cst_46 {dimension_numbers = #tpu.dot_dimension_numbers<[1], [0], [0], [1], [0, 0, 1, 1], [], []>} : vector<96x128xbf16>, vector<128x128xbf16>, vector<96x128xf32> -> vector<96x128xf32>
    %49 = arith.addf %44, %48 : vector<96x128xf32>
    %50 = arith.truncf %49 : vector<96x128xf32> to vector<96x128xbf16>
    %c0_47 = arith.constant 0 : index
    %c0_48 = arith.constant 0 : index
    %c0_49 = arith.constant 0 : index
    %51 = vector.load %arg6[%c0_47, %c0_48, %c0_49] : memref<1x96x128xbf16, #tpu.memory_space<vmem>>, vector<1x96x128xbf16>
    %52 = vector.shape_cast %51 : vector<1x96x128xbf16> to vector<96x128xbf16>
    %53 = vector.shape_cast %50 : vector<96x128xbf16> to vector<1x96x128xbf16>
    tpu.vector_store %arg6[%c0_47, %c0_48, %c0_49], %53 {strides = array<i32>} : memref<1x96x128xbf16, #tpu.memory_space<vmem>>, vector<1x96x128xbf16>,
    %c0_50 = arith.constant 0 : index
    %c0_51 = arith.constant 0 : index
    %54 = vector.load %arg4[%c0_50, %c0_51] : memref<96x1xf32, #tpu.memory_space<vmem>>, vector<96x1xf32>
    %cst_52 = arith.constant dense<0.000000e+00> : vector<1xf32>
    %55 = vector.multi_reduction <add>, %54, %cst_52 [0] : vector<96x1xf32> to vector<1xf32>
    %56 = vector.shape_cast %55 : vector<1xf32> to vector<1x1xf32>
    %cst_53 = arith.constant 0.000000e+00 : f32
    %57 = vector.broadcast %cst_53 : f32 to vector<96x1xf32>
    %58 = arith.cmpf ogt, %54, %57 : vector<96x1xf32>
    %cst_54 = arith.constant 0.000000e+00 : f32
    %59 = vector.shape_cast %58 : vector<96x1xi1> to vector<96x1xi1>
    %60 = vector.broadcast %59 : vector<96x1xi1> to vector<96x128xi1>
    %61 = vector.broadcast %cst_54 : f32 to vector<96x128xf32>
    %62 = arith.select %60, %49, %61 : vector<96x128xi1>, vector<96x128xf32>
    %cst_55 = arith.constant dense<0.000000e+00> : vector<128xf32>
    %63 = vector.multi_reduction <add>, %62, %cst_55 [0] : vector<96x128xf32> to vector<128xf32>
    %64 = vector.shape_cast %63 : vector<128xf32> to vector<1x128xf32>
    %cst_56 = arith.constant 1.000000e+00 : f32
    %65 = vector.broadcast %cst_56 : f32 to vector<1x1xf32>
    %66 = arith.maximumf %56, %65 : vector<1x1xf32>
    %67 = vector.broadcast %66 : vector<1x1xf32> to vector<1x128xf32>
    %68 = arith.divf %64, %67 : vector<1x128xf32>
    %cst_57 = arith.constant 0.000000e+00 : f32
    %69 = vector.broadcast %cst_57 : f32 to vector<96x1xf32>
    %70 = arith.cmpf ogt, %54, %69 : vector<96x1xf32>
    %71 = vector.broadcast %68 : vector<1x128xf32> to vector<96x128xf32>
    %72 = arith.subf %49, %71 : vector<96x128xf32>
    %cst_58 = arith.constant 0.000000e+00 : f32
    %73 = vector.shape_cast %70 : vector<96x1xi1> to vector<96x1xi1>
    %74 = vector.broadcast %73 : vector<96x1xi1> to vector<96x128xi1>
    %75 = vector.broadcast %cst_58 : f32 to vector<96x128xf32>
    %76 = arith.select %74, %72, %75 : vector<96x128xi1>, vector<96x128xf32>
    %c0_59 = arith.constant 0 : index
    %c0_60 = arith.constant 0 : index
    %c0_61 = arith.constant 0 : index
    %c0_62 = arith.constant 0 : index
    %77 = vector.load %arg7[%c0_59, %c0_60, %c0_61, %c0_62] : memref<1x1x1x128xf32, #tpu.memory_space<vmem>>, vector<1x1x1x128xf32>
    %78 = vector.shape_cast %77 : vector<1x1x1x128xf32> to vector<1x128xf32>
    %79 = vector.shape_cast %64 : vector<1x128xf32> to vector<1x1x1x128xf32>
    tpu.vector_store %arg7[%c0_59, %c0_60, %c0_61, %c0_62], %79 {strides = array<i32>} : memref<1x1x1x128xf32, #tpu.memory_space<vmem>>, vector<1x1x1x128xf32>,
    %80 = arith.mulf %76, %76 : vector<96x128xf32>
    %cst_63 = arith.constant dense<0.000000e+00> : vector<128xf32>
    %81 = vector.multi_reduction <add>, %80, %cst_63 [0] : vector<96x128xf32> to vector<128xf32>
    %82 = vector.shape_cast %81 : vector<128xf32> to vector<1x128xf32>
    %c0_64 = arith.constant 0 : index
    %c0_65 = arith.constant 0 : index
    %c0_66 = arith.constant 0 : index
    %c0_67 = arith.constant 0 : index
    %83 = vector.load %arg8[%c0_64, %c0_65, %c0_66, %c0_67] : memref<1x1x1x128xf32, #tpu.memory_space<vmem>>, vector<1x1x1x128xf32>
    %84 = vector.shape_cast %83 : vector<1x1x1x128xf32> to vector<1x128xf32>
    %85 = vector.shape_cast %82 : vector<1x128xf32> to vector<1x1x1x128xf32>
    tpu.vector_store %arg8[%c0_64, %c0_65, %c0_66, %c0_67], %85 {strides = array<i32>} : memref<1x1x1x128xf32, #tpu.memory_space<vmem>>, vector<1x1x1x128xf32>,
    return
  }
  func.func @transform_0(%arg0: i32, %arg1: i32) -> (i32, i32, i32) {
    %c0_i32 = arith.constant 0 : i32
    %c0_i32_0 = arith.constant 0 : i32
    return %arg0, %arg1, %c0_i32 : i32, i32, i32
  }
  func.func @transform_1(%arg0: i32, %arg1: i32) -> (i32, i32, i32) {
    %c1_i32 = arith.constant 1 : i32
    %0 = arith.addi %arg1, %c1_i32 : i32
    %c2_i32 = arith.constant 2 : i32
    %1 = arith.muli %0, %c2_i32 : i32
    %c4_i32 = arith.constant 4 : i32
    %2 = arith.minsi %1, %c4_i32 : i32
    %c0_i32 = arith.constant 0 : i32
    %c0_i32_0 = arith.constant 0 : i32
    return %arg0, %2, %c0_i32 : i32, i32, i32
  }
  func.func @transform_2(%arg0: i32, %arg1: i32) -> (i32, i32) {
    %c0_i32 = arith.constant 0 : i32
    %c0_i32_0 = arith.constant 0 : i32
    return %arg1, %c0_i32 : i32, i32
  }
  func.func @transform_3(%arg0: i32, %arg1: i32) -> (i32, i32, i32) {
    %c0_i32 = arith.constant 0 : i32
    %c0_i32_0 = arith.constant 0 : i32
    %c0_i32_1 = arith.constant 0 : i32
    %c0_i32_2 = arith.constant 0 : i32
    return %c0_i32, %c0_i32_0, %c0_i32_1 : i32, i32, i32
  }
  func.func @transform_4(%arg0: i32, %arg1: i32) -> (i32, i32, i32) {
    %c0_i32 = arith.constant 0 : i32
    %c0_i32_0 = arith.constant 0 : i32
    return %arg0, %arg1, %c0_i32 : i32, i32, i32
  }
  func.func @transform_5(%arg0: i32, %arg1: i32) -> (i32, i32, i32, i32) {
    %c0_i32 = arith.constant 0 : i32
    %c0_i32_0 = arith.constant 0 : i32
    %c0_i32_1 = arith.constant 0 : i32
    return %arg0, %arg1, %c0_i32, %c0_i32_0 : i32, i32, i32, i32
  }
  func.func @transform_6(%arg0: i32, %arg1: i32) -> (i32, i32, i32, i32) {
    %c0_i32 = arith.constant 0 : i32
    %c0_i32_0 = arith.constant 0 : i32
    %c0_i32_1 = arith.constant 0 : i32
    return %arg0, %arg1, %c0_i32, %c0_i32_0 : i32, i32, i32, i32
  }
}

</mosaic_0001>

<bundles_post_ra>
// kernel: conv_up_forward.5
= control target key start
LH: loop header
LB: loop body
LE: loop exit
PB: predicated region body
PF: predicated region fallthrough
CT: control target
= control target key end

     0   :  { %s527_s12 = smov 0   ;;  %s529_s13 = smov 0   ;;  %s610_s0 = inlined_call_operand.vmem [shape: bf16[2,288,128], index: 0, kind: input, shape index: {}]   ;;  %s611_s1 = inlined_call_operand.vmem [shape: f32[1,128], index: 1, kind: input, shape index: {}]   ;;  %s612_s2 = inlined_call_operand.vmem [shape: f32[1,128], index: 2, kind: input, shape index: {}]   ;;  %s613_s3 = inlined_call_operand.vmem [shape: f32[2,288,128], index: 3, kind: output, shape index: {}]  }
   0x1   :  { %s531_s14 = smov 0   ;;  %s533_s15 = smov 0  }
   0x2   :  { %s535_s16 = smov 0  }
   0x3 LB: > { %s22_s17 = sadd.s32 1, %s497_s14  ;;  %s25_s18 = sadd.s32 1, %s501_s15  ;;  %s505_s16 = sphi %s535_s16, %s13_s16   ;;  %s501_s15 = sphi %s533_s15, %s617_s15   ;;  %s497_s14 = sphi %s531_s14, %s616_s14   ;;  %s493_s13 = sphi %s529_s13, %s615_s13   ;;  %s489_s12 = sphi %s527_s12, %s614_s12  }
   0x4   : > { %p23_p0 = scmp.ge.s32.totalorder %s22_s17, 3  ;;  %p390_p1 = scmp.ge.s32.totalorder %s505_s16, 1 }
   0x5   : > { %p158_p2 = scmp.lt.s32.totalorder %s505_s16, 7 }
   0x6   : > { %s619_s17 = smov (%p23_p0, %s22_s17), 0  ;;  %s621_s18 = smov (!%p23_p0, %s25_s18), %s501_s15 }
   0x7   : > { %p159_p3 = pnand %p390_p1, %p158_p2  ;;  %p27_p4 = scmp.ge.s32.totalorder %s621_s18, 2 }
   0x8   : > { %s190_s19 = smul.u32 (!%p159_p3), 12, %s489_s12  ;;  %p191_p5 = scmp.lt.s32.totalorder (!%p159_p3), %s493_s13, 1 }
   0x9   : > { %s623_s18 = smov (%p27_p4, %s621_s18), 0  ;;  %162 = sbr.rel (%p159_p3) target bundleno = 39 (0x27), region = 32 }
   0xa   : > { %p193_p6 = scmp.lt.s32.totalorder (!%p159_p3), %s190_s19, 35 }
   0xe   : > { %s625_s13 = smov (!%p191_p5, %s493_s13), 1  ;;  %s627_s19 = smov (!%p193_p6, %s190_s19), 35  ;;  %v393_v0 = vld [vmem:[%s611_s1] ss:$0 sm:$0xff] }
   0xf   : > { %s426_s20 = smul.u32 36, %s625_s13  ;;  %v394_v9 = vld [vmem:[%s612_s2] ss:$0 sm:$0xff] }
  0x11   : > { %s557_s21 = sadd.s32 %s426_s20, %s627_s19 }
  0x12   : > { %s391_s22 = sshll.u32 %s557_s21, 2  ;;  %s392_s30 = sshll.u32 %s557_s21, 3 }
  0x13   : > { %s563_s25 = scalar_lea.vmem %s610_s0, %s391_s22  ;;  %s579_s6 = scalar_lea.vmem %s613_s3, %s392_s30 }
  0x14   : > { %v398_v1 = vld [vmem:[%s563_s25] sm:$0xff]   ;;  %v421_v2 = vld [vmem:[%s563_s25 + $0x8] sm:$0xff]   ;;  %v422_v3 = vld [vmem:[%s563_s25 + $0x10] sm:$0xff]  }
  0x15   : > { %v399_v4 = vunpack.c.l.bf16 %v398_v1  ;;  %v400_v5 = vunpack.c.h.bf16 %v398_v1  ;;  %v403_v6 = vunpack.c.l.bf16 %v421_v2  ;;  %v404_v7 = vunpack.c.h.bf16 %v421_v2  ;;  %v423_v8 = vld [vmem:[%s563_s25 + $0x18] sm:$0xff]   ;;  %v424_v30 = vld [vmem:[%s563_s25 + $0x20] sm:$0xff]   ;;  %v425_v31 = vld [vmem:[%s563_s25 + $0x28] sm:$0xff]  }
  0x16   : > { %v407_v10 = vunpack.c.l.bf16 %v422_v3  ;;  %v408_v11 = vunpack.c.h.bf16 %v422_v3  ;;  %v411_v12 = vunpack.c.l.bf16 %v423_v8  ;;  %v412_v13 = vunpack.c.h.bf16 %v423_v8 }
  0x17   : > { %v241_v14 = vmul.f32 %v399_v4, %v393_v0  ;;  %v242_v15 = vmul.f32 %v400_v5, %v393_v0  ;;  %v243_v16 = vmul.f32 %v403_v6, %v393_v0  ;;  %v244_v17 = vmul.f32 %v404_v7, %v393_v0 }
  0x18   : > { %v245_v18 = vmul.f32 %v407_v10, %v393_v0  ;;  %v246_v19 = vmul.f32 %v408_v11, %v393_v0  ;;  %v247_v20 = vmul.f32 %v411_v12, %v393_v0  ;;  %v248_v21 = vmul.f32 %v412_v13, %v393_v0 }
  0x19   : > { %v260_v22 = vadd.f32 %v394_v9, %v241_v14  ;;  %v261_v23 = vadd.f32 %v394_v9, %v242_v15  ;;  %v262_v24 = vadd.f32 %v394_v9, %v243_v16  ;;  %v263_v25 = vadd.f32 %v394_v9, %v244_v17 }
  0x1a   : > { %v264_v26 = vadd.f32 %v394_v9, %v245_v18  ;;  %v265_v27 = vadd.f32 %v394_v9, %v246_v19  ;;  %v266_v28 = vadd.f32 %v394_v9, %v247_v20  ;;  %v267_v29 = vadd.f32 %v394_v9, %v248_v21 }
  0x1b   : > { %v272_v32 = vmax.f32 %v260_v22, 0.0  ;;  %v273_v33 = vmax.f32 %v261_v23, 0.0  ;;  %v274_v34 = vmax.f32 %v262_v24, 0.0  ;;  %v275_v35 = vmax.f32 %v263_v25, 0.0 }
  0x1c   : > { %v276_v36 = vmax.f32 %v264_v26, 0.0  ;;  %v277_v37 = vmax.f32 %v265_v27, 0.0  ;;  %v278_v38 = vmax.f32 %v266_v28, 0.0  ;;  %v279_v39 = vmax.f32 %v267_v29, 0.0 }
  0x1d   : > { %284 = vst [vmem:[%s579_s6] sm:$0xff] %v272_v32  ;;  %285 = vst [vmem:[%s579_s6 + $0x8] sm:$0xff] %v273_v33  ;;  %v415_v40 = vunpack.c.l.bf16 %v424_v30  ;;  %v416_v41 = vunpack.c.h.bf16 %v424_v30  ;;  %v419_v42 = vunpack.c.l.bf16 %v425_v31  ;;  %v420_v43 = vunpack.c.h.bf16 %v425_v31 }
  0x1e   : > { %286 = vst [vmem:[%s579_s6 + $0x10] sm:$0xff] %v274_v34  ;;  %287 = vst [vmem:[%s579_s6 + $0x18] sm:$0xff] %v275_v35 }
  0x1f   : > { %288 = vst [vmem:[%s579_s6 + $0x20] sm:$0xff] %v276_v36  ;;  %289 = vst [vmem:[%s579_s6 + $0x28] sm:$0xff] %v277_v37  ;;  %v249_v44 = vmul.f32 %v415_v40, %v393_v0  ;;  %v250_v45 = vmul.f32 %v416_v41, %v393_v0  ;;  %v251_v46 = vmul.f32 %v419_v42, %v393_v0 }
  0x20   : > { %290 = vst [vmem:[%s579_s6 + $0x30] sm:$0xff] %v278_v38  ;;  %291 = vst [vmem:[%s579_s6 + $0x38] sm:$0xff] %v279_v39  ;;  %v252_v47 = vmul.f32 %v420_v43, %v393_v0 }
  0x21   : > { %v268_v48 = vadd.f32 %v394_v9, %v249_v44  ;;  %v269_v49 = vadd.f32 %v394_v9, %v250_v45  ;;  %v270_v50 = vadd.f32 %v394_v9, %v251_v46 }
  0x22   : > { %v271_v51 = vadd.f32 %v394_v9, %v252_v47 }
  0x23   : > { %v280_v52 = vmax.f32 %v268_v48, 0.0  ;;  %v281_v53 = vmax.f32 %v269_v49, 0.0  ;;  %v282_v54 = vmax.f32 %v270_v50, 0.0 }
  0x24   : > { %v283_v55 = vmax.f32 %v271_v51, 0.0 }
  0x25   : > { %292 = vst [vmem:[%s579_s6 + $0x40] sm:$0xff] %v280_v52  ;;  %293 = vst [vmem:[%s579_s6 + $0x48] sm:$0xff] %v281_v53 }
  0x26   : > { %294 = vst [vmem:[%s579_s6 + $0x50] sm:$0xff] %v282_v54  ;;  %295 = vst [vmem:[%s579_s6 + $0x58] sm:$0xff] %v283_v55 }
  0x27 PF: > { %s13_s16 = sadd.s32 1, %s505_s16   ;;  %s614_s12 = smov %s497_s14 }
  0x28   : > { %p10_p7 = scmp.ge.s32.totalorder %s13_s16, 8   ;;  %s615_s13 = smov %s501_s15 }
  0x29   : > { %s616_s14 = smov %s619_s17  ;;  %s617_s15 = smov %s623_s18 }
  0x2a   :  { %12 = sbr.rel (!%p10_p7) target bundleno = 3 (0x3), region = 62 }

// kernel: conv_up_forward.4
= control target key start
LH: loop header
LB: loop body
LE: loop exit
PB: predicated region body
PF: predicated region fallthrough
CT: control target
= control target key end

     0   :  { %s4099_s27 = smov 0   ;;  %s4101_s28 = smov 0   ;;  %s4948_s0 = inlined_call_operand.vmem [shape: bf16[2,288,128], index: 0, kind: input, shape index: {}, may-alias: {0,1}]   ;;  %s4949_s1 = inlined_call_operand.vmem [shape: bf16[2,288,128], index: 1, kind: input, shape index: {}, may-alias: {0,1}]   ;;  %s4950_s2 = inlined_call_operand.vmem [shape: f32[288,1], index: 2, kind: input, shape index: {}]   ;;  %s4951_s3 = inlined_call_operand.vmem [shape: f32[1,128], index: 3, kind: input, shape index: {}]   ;;  %s4952_s4 = inlined_call_operand.vmem [shape: f32[1,128], index: 4, kind: input, shape index: {}]   ;;  %s4953_s5 = inlined_call_operand.vmem [shape: bf16[9,128,128], index: 5, kind: input, shape index: {}]   ;;  %s4954_s6 = inlined_call_operand.vmem [shape: bf16[2,288,128], index: 6, kind: output, shape index: {0}]   ;;  %s4955_s7 = inlined_call_operand.vmem [shape: f32[2,3,1,128], index: 7, kind: output, shape index: {1}]   ;;  %s4956_s8 = inlined_call_operand.vmem [shape: f32[2,3,1,128], index: 8, kind: output, shape index: {2}]  }
   0x1   :  { %s4103_s29 = smov 0   ;;  %s4105_s30 = smov 0  }
   0x2   :  { %s4107_s9 = smov 0  }
   0x3 LB: > { %s28_s10 = sadd.s32 1, %s4043_s29  ;;  %s31_s11 = sadd.s32 1, %s4047_s30  ;;  %s4051_s9 = sphi %s4107_s9, %s19_s9   ;;  %s4047_s30 = sphi %s4105_s30, %s4992_s30   ;;  %s4043_s29 = sphi %s4103_s29, %s4991_s29   ;;  %s4039_s28 = sphi %s4101_s28, %s4990_s28   ;;  %s4035_s27 = sphi %s4099_s27, %s4989_s27  }
   0x4   : > { %p29_p0 = scmp.ge.s32.totalorder %s28_s10, 3  ;;  %p3019_p1 = scmp.ge.s32.totalorder %s4051_s9, 1 }
   0x5   : > { %p336_p2 = scmp.lt.s32.totalorder %s4051_s9, 7 }
   0x6   : > { %s4994_s10 = smov (%p29_p0, %s28_s10), 0  ;;  %s4996_s11 = smov (!%p29_p0, %s31_s11), %s4047_s30 }
   0x7   : > { %p337_p3 = pnand %p3019_p1, %p336_p2  ;;  %p33_p4 = scmp.ge.s32.totalorder %s4996_s11, 2 }
   0x9   : > { %s4998_s11 = smov (%p33_p4, %s4996_s11), 0  ;;  %340 = sbr.rel (%p337_p3) target bundleno = 459 (0x1cb), region = 44 }
   0xe   : > { %v3901_v0 = vld [vmem:[%s4953_s5 + $0x38] sm:$0xff]   ;;  %s410_s14 = smul.u32 12, %s4035_s27  ;;  %p411_p5 = scmp.lt.s32.totalorder %s4039_s28, 1  ;;  %v3903_v2 = vld [vmem:[%s4953_s5 + $0x30] sm:$0xff]   ;;  %v3905_v4 = vld [vmem:[%s4953_s5 + $0x28] sm:$0xff]   ;;  %vm1086_vm1 = vcmask 1046528  }
   0xf   : > { %v3902_v1 = vld [vmem:[%s4953_s5 + $0x78] sm:$0xff]   ;;  %3616 = vmatprep.subr.bf16.mxu1 %v3901_v0  ;;  %v3904_v3 = vld [vmem:[%s4953_s5 + $0x70] sm:$0xff]   ;;  %v3906_v5 = vld [vmem:[%s4953_s5 + $0x68] sm:$0xff]   ;;  %s3299_s26 = sshll.u32 %s4035_s27, 1  ;;  %vm742_vm0 = vsmask.f32 7424 }
  0x10   : > { %p413_p6 = scmp.lt.s32.totalorder %s410_s14, 35  ;;  %3617 = vmatpush3.bf16.msra.mxu1 %v3901_v0  ;;  %3588 = vmatprep.subr.bf16.mxu0 %v3902_v1  ;;  %s5000_s28 = smov (!%p411_p5, %s4039_s28), 1  ;;  %v3907_v6 = vld [vmem:[%s4953_s5 + $0x20] sm:$0xff]   ;;  %v3909_v8 = vld [vmem:[%s4953_s5 + $0x18] sm:$0xff]   ;;  %v3911_v10 = vld [vmem:[%s4953_s5 + $0x10] sm:$0xff]   ;;  %vm2617_vm2 = vcmask 7168  }
  0x11   : > { %3589 = vmatpush3.bf16.msra.mxu0 %v3902_v1  ;;  %3618 = vmatprep.subr.bf16.mxu1 %v3903_v2  ;;  %s3856_s25 = smul.u32 36, %s5000_s28  ;;  %s3300_s13 = sadd.s32 2, %s3299_s26  ;;  %v3908_v7 = vld [vmem:[%s4953_s5 + $0x60] sm:$0xff]   ;;  %v3910_v9 = vld [vmem:[%s4953_s5 + $0x58] sm:$0xff]   ;;  %v3912_v13 = vld [vmem:[%s4953_s5 + $0x50] sm:$0xff]  }
  0x12   : > { %s5002_s14 = smov (!%p413_p6, %s410_s14), 35  ;;  %3590 = vmatprep.subr.bf16.mxu0 %v3904_v3  ;;  %p422_p7 = scmp.lt.s32.totalorder %s3300_s13, 4  ;;  %v4188_v12 = vld [vmem:[%s4951_s3] ss:$0 sm:$0xff]  ;;  %v3913_v23 = vld [vmem:[%s4953_s5 + $0x8] sm:$0xff]   ;;  %v3919_v55 = vld [vmem:[%s4953_s5 + $0xf8] sm:$0xff]  }
  0x13   : > { %s4159_s12 = sadd.s32 %s3856_s25, %s5002_s14  ;;  %v4196_v16 = vld [vmem:[%s4952_s4] ss:$0 sm:$0xff]  ;;  %v3914_v26 = vld [vmem:[%s4953_s5 + $0x48] sm:$0xff]   ;;  %v4247_v60 = vld [vmem:[%s4953_s5 + $0xb8] sm:$0xff]   ;;  %p456_p9 = scmp.lt.s32.totalorder %s4035_s27, 2 }
  0x14   : > { %3619 = vmatpush3.bf16.msra.mxu1 %v3903_v2  ;;  %s3020_s19 = sshll.u32 %s4159_s12, 2  ;;  %s5004_s13 = smov (!%p422_p7, %s3300_s13), 4  ;;  %v3915_v38 = vld [vmem:[%s4953_s5] sm:$0xff]  }
  0x15   : > { %3591 = vmatpush3.bf16.msra.mxu0 %v3904_v3  ;;  %3620 = vmatprep.subr.bf16.mxu1 %v3905_v4  ;;  %s4179_s15 = scalar_lea.vmem %s4948_s0, %s3020_s19  ;;  %s424_s16 = smul.u32 6, %s5004_s13  ;;  %v3916_v43 = vld [vmem:[%s4953_s5 + $0x40] sm:$0xff]  }
  0x16   : > { %3592 = vmatprep.subr.bf16.mxu0 %v3906_v5  ;;  %v3332_v11 = vld [vmem:[%s4179_s15] sm:$0xff]   ;;  %v3442_v17 = vld [vmem:[%s4179_s15 + $0x8] sm:$0xff]   ;;  %v3443_v22 = vld [vmem:[%s4179_s15 + $0x10] sm:$0xff]   ;;  %s4769_s23 = scalar_lea.vmem %s4954_s6, %s3020_s19  ;;  %s3857_s12 = smul.u32 3, %s5000_s28 }
  0x17   : > { %p427_p8 = scmp.lt.s32.totalorder %s424_s16, 35  ;;  %v3333_v14 = vunpack.c.l.bf16 %v3332_v11  ;;  %v3334_v15 = vunpack.c.h.bf16 %v3332_v11  ;;  %v3337_v20 = vunpack.c.l.bf16 %v3442_v17  ;;  %v3338_v21 = vunpack.c.h.bf16 %v3442_v17  ;;  %v3444_v37 = vld [vmem:[%s4179_s15 + $0x18] sm:$0xff]   ;;  %v3445_v47 = vld [vmem:[%s4179_s15 + $0x20] sm:$0xff]   ;;  %v3446_v59 = vld [vmem:[%s4179_s15 + $0x28] sm:$0xff]   ;;  %s5008_s27 = smov (!%p456_p9, %s4035_s27), 2 }
  0x18   : > { %3621 = vmatpush3.bf16.msra.mxu1 %v3905_v4  ;;  %v3341_v24 = vunpack.c.l.bf16 %v3443_v22  ;;  %v3342_v25 = vunpack.c.h.bf16 %v3443_v22  ;;  %v3345_v41 = vunpack.c.l.bf16 %v3444_v37  ;;  %v3346_v42 = vunpack.c.h.bf16 %v3444_v37  ;;  %v3923_v22 = vld [vmem:[%s4953_s5 + $0xf0] sm:$0xff]   ;;  %s4887_s19 = sadd.s32 %s3857_s12, %s5008_s27 }
  0x19   : > { %3593 = vmatpush3.bf16.msra.mxu0 %v3906_v5  ;;  %3622 = vmatprep.subr.bf16.mxu1 %v3907_v6  ;;  %s5006_s16 = smov (!%p427_p8, %s424_s16), 35  ;;  %v507_v18 = vmul.f32 %v3333_v14, %v4188_v12  ;;  %v508_v19 = vmul.f32 %v3334_v15, %v4188_v12  ;;  %v509_v29 = vmul.f32 %v3337_v20, %v4188_v12  ;;  %v3349_v53 = vunpack.c.l.bf16 %v3445_v47  ;;  %s460_s13 = scalar_lea.vmem %s4955_s7, %s4887_s19 }
  0x1a   : > { %3594 = vmatprep.subr.bf16.mxu0 %v3908_v7  ;;  %v510_v30 = vmul.f32 %v3338_v21, %v4188_v12  ;;  %s4214_s21 = sadd.s32 %s3856_s25, %s5006_s16  ;;  %v511_v31 = vmul.f32 %v3341_v24, %v4188_v12  ;;  %v512_v32 = vmul.f32 %v3342_v25, %v4188_v12  ;;  %v513_v50 = vmul.f32 %v3345_v41, %v4188_v12  ;;  %s467_s24 = scalar_lea.vmem %s4956_s8, %s4887_s19 }
  0x1b   : > { %v525_v27 = vadd.f32 %v4196_v16, %v507_v18  ;;  %v526_v28 = vadd.f32 %v4196_v16, %v508_v19  ;;  %v527_v35 = vadd.f32 %v4196_v16, %v509_v29  ;;  %s3022_s25 = sshll.u32 %s4214_s21, 2  ;;  %v514_v51 = vmul.f32 %v3346_v42, %v4188_v12 }
  0x1c   : > { %3623 = vmatpush3.bf16.msra.mxu1 %v3907_v6  ;;  %v528_v36 = vadd.f32 %v4196_v16, %v510_v30  ;;  %v529_v39 = vadd.f32 %v4196_v16, %v511_v31  ;;  %v530_v40 = vadd.f32 %v4196_v16, %v512_v32  ;;  %v3350_v54 = vunpack.c.h.bf16 %v3445_v47  ;;  %s4236_s17 = scalar_lea.vmem %s4949_s1, %s3022_s25  ;;  %v3924_v47 = vld [vmem:[%s4953_s5 + $0xb0] sm:$0xff]   ;;  %s3023_s25 = sshll.u32 %s5002_s14, 3 }
  0x1d   : > { %3595 = vmatpush3.bf16.msra.mxu0 %v3908_v7  ;;  %3624 = vmatprep.subr.bf16.mxu1 %v3909_v8  ;;  %v537_v33 = vmax.f32 %v525_v27, 0.0  ;;  %v538_v34 = vmax.f32 %v526_v28, 0.0  ;;  %v539_v45 = vmax.f32 %v527_v35, 0.0  ;;  %v531_v57 = vadd.f32 %v4196_v16, %v513_v50  ;;  %v3356_v3 = vld [vmem:[%s4236_s17] sm:$0xff]   ;;  %s4470_s20 = scalar_lea.vmem %s4950_s2, %s3023_s25 }
  0x1e   : > { %3596 = vmatprep.subr.bf16.mxu0 %v3910_v9  ;;  %v540_v46 = vmax.f32 %v528_v36, 0.0  ;;  %v541_v48 = vmax.f32 %v529_v39, 0.0  ;;  %v542_v49 = vmax.f32 %v530_v40, 0.0  ;;  %v532_v58 = vadd.f32 %v4196_v16, %v514_v51  ;;  %v3925_v40 = vld [vmem:[%s4953_s5 + $0xe8] sm:$0xff]  }
  0x1f   : > { %v3370_v44 = vpack.c.bf16 %v538_v34, %v537_v33  ;;  %v515_v61 = vmul.f32 %v3349_v53, %v4188_v12  ;;  %v516_v62 = vmul.f32 %v3350_v54, %v4188_v12  ;;  %v3353_v63 = vunpack.c.l.bf16 %v3446_v59 }
  0x20   : > { %3625 = vmatpush3.bf16.msra.mxu1 %v3909_v8  ;;  %v3375_v52 = vpack.c.bf16 %v540_v46, %v539_v45  ;;  %v3380_v56 = vpack.c.bf16 %v542_v49, %v541_v48  ;;  %v3354_v0 = vunpack.c.h.bf16 %v3446_v59  ;;  %v543_v1 = vmax.f32 %v531_v57, 0.0  ;;  %v3928_v48 = vld [vmem:[%s4953_s5 + $0xe0] sm:$0xff]  }
  0x21   : > { %3597 = vmatpush3.bf16.msra.mxu0 %v3910_v9  ;;  %3626 = vmatprep.subr.bf16.mxu1 %v3911_v10  ;;  %3371 = vst [vmem:[#allocation2] sm:$0xff] %v3370_v44   ;;  %v544_v2 = vmax.f32 %v532_v58, 0.0  ;;  %v533_v4 = vadd.f32 %v4196_v16, %v515_v61  ;;  %v534_v5 = vadd.f32 %v4196_v16, %v516_v62  ;;  %v3357_v9 = vunpack.c.l.bf16 %v3356_v3 }
  0x22   : > { %3598 = vmatprep.subr.bf16.mxu0 %v3912_v13  ;;  %3449 = vst [vmem:[#allocation2 + $0x8] sm:$0xff] %v3375_v52   ;;  %3450 = vst [vmem:[#allocation2 + $0x10] sm:$0xff] %v3380_v56   ;;  %v517_v6 = vmul.f32 %v3353_v63, %v4188_v12  ;;  %v518_v7 = vmul.f32 %v3354_v0, %v4188_v12 }
  0x23   : > { %v3385_v8 = vpack.c.bf16 %v544_v2, %v543_v1  ;;  %v545_v11 = vmax.f32 %v533_v4, 0.0  ;;  %v561_v19 = vmul.f32 %v3357_v9, %v4188_v12  ;;  %v3930_v1 = vld [vmem:[%s4953_s5 + $0xa0] sm:$0xff]   ;;  %v3934_v9 = vld [vmem:[%s4953_s5 + $0xd0] sm:$0xff]  }
  0x24   : > { %3627 = vmatpush3.bf16.msra.mxu1 %v3911_v10  ;;  %v3358_v10 = vunpack.c.h.bf16 %v3356_v3  ;;  %v535_v14 = vadd.f32 %v4196_v16, %v517_v6  ;;  %v536_v15 = vadd.f32 %v4196_v16, %v518_v7 }
  0x25   : > { %3599 = vmatpush3.bf16.msra.mxu0 %v3912_v13  ;;  %3628 = vmatprep.subr.bf16.mxu1 %v3913_v23  ;;  %v546_v13 = vmax.f32 %v534_v5, 0.0  ;;  %3451 = vst [vmem:[#allocation2 + $0x18] sm:$0xff] %v3385_v8   ;;  %v567_v27 = vadd.f32 %v4196_v16, %v561_v19 }
  0x26   : > { %3600 = vmatprep.subr.bf16.mxu0 %v3914_v26  ;;  %v562_v20 = vmul.f32 %v3358_v10, %v4188_v12  ;;  %v547_v24 = vmax.f32 %v535_v14, 0.0  ;;  %v3932_v14 = vld [vmem:[%s4953_s5 + $0x98] sm:$0xff]  }
  0x27   : > { %v573_v35 = vmax.f32 %v567_v27, 0.0  ;;  %v3942_v27 = vld [vmem:[%s4953_s5 + $0x178] sm:$0xff]  }
  0x28   : > { %3629 = vmatpush3.bf16.msra.mxu1 %v3913_v23  ;;  %v663_v17 = vld [vmem:[#allocation2] sm:$0xf]  ;;  %v4259_v18 = vld [vmem:[#allocation2 + $0x4] sm:$0xf]  ;;  %v3390_v23 = vpack.c.bf16 %v546_v13, %v545_v11  ;;  %v568_v28 = vadd.f32 %v4196_v16, %v562_v20  ;;  %v3937_v20 = vld [vmem:[%s4953_s5 + $0xc8] sm:$0xff]  }
  0x29   : > { %3601 = vmatpush3.bf16.msra.mxu0 %v3914_v26  ;;  %3630 = vmatprep.subr.bf16.mxu1 %v3915_v38  ;;  %v3061_v21 = vcombine.low %v663_v17, %v4259_v18  ;;  %v4267_v25 = vld [vmem:[#allocation2 + $0x8] sm:$0xff]   ;;  %v548_v26 = vmax.f32 %v536_v15, 0.0  ;;  %v4273_v32 = vld [vmem:[#allocation2 + $0x10] sm:$0xff]   ;;  %v1065_v57 = vld [vmem:[#allocation2] sm:$0xe] }
  0x2a   : > { %3602 = vmatprep.subr.bf16.mxu0 %v3916_v43  ;;  %3452 = vst [vmem:[#allocation2 + $0x20] sm:$0xff] %v3390_v23   ;;  %v751_v31 = vshll.u32 %v4267_v25, 16  ;;  %v755_v33 = vshrl.u32 %v4267_v25, 16  ;;  %v574_v37 = vmax.f32 %v568_v28, 0.0  ;;  %v759_v39 = vshll.u32 %v4273_v32, 16  ;;  %v3941_v11 = vld [vmem:[#allocation2 + $0x8] sm:$0xff]  }
  0x2b   : > { %3632 = vmatprep.mubr.bf16.mxu1 %v3061_v21  ;;  %v744_v29 = vshrl.u32 %v3061_v21, 16  ;;  %v746_v30 = vshll.u32 %v3061_v21, 16  ;;  %v3395_v34 = vpack.c.bf16 %v548_v26, %v547_v24  ;;  %v763_v41 = vshrl.u32 %v4273_v32, 16  ;;  %v3936_v23 = vld [vmem:[%s4953_s5 + $0x90] sm:$0xff]   ;;  %v3938_v26 = vld [vmem:[%s4953_s5 + $0x88] sm:$0xff]   ;;  %v3940_v28 = vld [vmem:[%s4953_s5 + $0x80] sm:$0xff]  }
  0x2c   : > { %3631 = vmatpush3.bf16.msra.mxu1 %v3915_v38  ;;  %v753_v38 = vrot.slane %v751_v31, 1  ;;  %v3400_v44 = vpack.c.bf16 %v574_v37, %v573_v35  ;;  %v761_v46 = vrot.slane %v759_v39, 1  ;;  %v3100_v7 = vcombine.low %v1065_v57, %v4259_v18  ;;  %v3949_v31 = vld [vmem:[#allocation2 + $0x18] sm:$0xff]   ;;  %v3947_v35 = vld [vmem:[%s4953_s5 + $0x168] sm:$0xff]  }
  0x2d   : > { %3603 = vmatpush3.bf16.msra.mxu0 %v3916_v43  ;;  %3672 = vmatprep.subr.bf16.mxu1 %v3919_v55  ;;  %v748_v36 = vrot.slane %v746_v30, 1  ;;  %3453 = vst [vmem:[#allocation2 + $0x28] sm:$0xff] %v3395_v34   ;;  %v4282_v43 = vld [vmem:[#allocation2 + $0x18] sm:$0xff]   ;;  %v1088_v19 = vrot.slane %v4267_v25, 1  ;;  %v3945_v30 = vld [vmem:[%s4953_s5 + $0x170] sm:$0xff]  }
  0x2e   : > { %3644 = vmatprep.subr.bf16.mxu0 %v4247_v60  ;;  %v757_v45 = vor.u32 %v755_v33, %v753_v38  ;;  %v767_v50 = vshll.u32 %v4282_v43, 16  ;;  %v771_v51 = vshrl.u32 %v4282_v43, 16  ;;  %3454 = vst [vmem:[#allocation2 + $0x30] sm:$0xff] %v3400_v44   ;;  %v765_v53 = vor.u32 %v763_v41, %v761_v46  ;;  %v3944_v34 = vld [vmem:[%s4953_s5 + $0x138] sm:$0xff]   ;;  %v1453_v37 = vld [vmem:[#allocation2 + $0x8] sm:$0xf] }
  0x2f   : > { %3633 = vmatmul.mubr.bf16.vlgmr.msra.gmra.mxu1 %v4267_v25  ;;  %v749_v42 = vor.u32 %v748_v36, %v744_v29  ;;  %v1087_v18 = vrot.slane %v3100_v7, 1  ;;  %v3939_v25 = vld [vmem:[%s4953_s5 + $0xc0] sm:$0xff]   ;;  %v3943_v29 = vld [vmem:[#allocation2 + $0x10] sm:$0xff]   ;;  %v1090_v33 = vrot.slane %v4273_v32, 1  ;;  %v1092_v36 = vrot.slane %v4282_v43, 1  ;;  %v3954_v7 = vld [vmem:[%s4953_s5 + $0x118] sm:$0xff]  }
  0x30   : > { %3673 = vmatpush3.bf16.msra.mxu1 %v3919_v55  ;;  %3636 = vmatprep.mubr.bf16.mxu1 %v4273_v32  ;;  %v762_v52 = vsel %vm742_vm0, %v757_v45, %v761_v46  ;;  %v3926_v55 = vld [vmem:[%s4953_s5 + $0xa8] sm:$0xff]   ;;  %v769_v56 = vrot.slane %v767_v50, 1  ;;  %v3946_v32 = vld [vmem:[%s4953_s5 + $0x130] sm:$0xff]   ;;  %v3951_v41 = vld [vmem:[%s4953_s5 + $0x160] sm:$0xff]  }
  0x31   : > { %3674 = vmatprep.subr.bf16.mxu1 %v3923_v22  ;;  %v754_v49 = vsel %vm742_vm0, %v749_v42, %v753_v38  ;;  %v4294_v54 = vld [vmem:[#allocation2 + $0x20] sm:$0xff]   ;;  %v1089_v24 = vsel %vm1086_vm1, %v1087_v18, %v1088_v19  ;;  %v1454_v38 = vld [vmem:[#allocation2 + $0xc] sm:$0xf]  ;;  %v1091_v39 = vsel %vm1086_vm1, %v1088_v19, %v1090_v33  ;;  %v1093_v42 = vsel %vm1086_vm1, %v1090_v33, %v1092_v36  ;;  %v1715_v44 = vld [vmem:[#allocation2 + $0x8] sm:$0xe] }
  0x32   : > { %3604 = vmatprep.mubr.bf16.mxu0 %v754_v49  ;;  %v775_v58 = vshll.u32 %v4294_v54, 16  ;;  %v779_v59 = vshrl.u32 %v4294_v54, 16  ;;  %v770_v61 = vsel %vm742_vm0, %v765_v53, %v769_v56  ;;  %v773_v62 = vor.u32 %v771_v51, %v769_v56  ;;  %v4370_v46 = vld [vmem:[#allocation2 + $0x10] sm:$0xff]   ;;  %v3948_v50 = vld [vmem:[%s4953_s5 + $0x128] sm:$0xff]   ;;  %v3952_v53 = vld [vmem:[%s4953_s5 + $0x120] sm:$0xff]  }
  0x33   : > { %3605 = vmatmul.mubr.bf16.vlgmr.msra.gmra.mxu0 %v762_v52  ;;  %v3186_v49 = vcombine.low %v1715_v44, %v1454_v38  ;;  %v3953_v52 = vld [vmem:[%s4953_s5 + $0x158] sm:$0xff]   ;;  %v3961_v19 = vld [vmem:[%s4953_s5 + $0x140] sm:$0xff]   ;;  %v2102_v33 = vld [vmem:[#allocation2 + $0x10] sm:$0xf] }
  0x34   : > { %3675 = vmatpush3.bf16.msra.mxu1 %v3923_v22  ;;  %3645 = vmatpush3.bf16.msra.mxu0 %v4247_v60  ;;  %v4304_v63 = vld [vmem:[#allocation2 + $0x28] sm:$0xff]   ;;  %v777_v0 = vrot.slane %v775_v58, 1  ;;  %v3931_v60 = vld [vmem:[%s4953_s5 + $0xd8] sm:$0xff]   ;;  %v4053_v22 = vmov 0  }
  0x35   : > { %3676 = vmatprep.subr.bf16.mxu1 %v3925_v40  ;;  %3646 = vmatprep.subr.bf16.mxu0 %v3924_v47  ;;  %v783_v2 = vshll.u32 %v4304_v63, 16  ;;  %v4315_v5 = vld [vmem:[#allocation2 + $0x30] ss:$0 sps:$4 sm:$0x11]   ;;  %v787_v6 = vshrl.u32 %v4304_v63, 16  ;;  %v3955_v45 = vld [vmem:[#allocation2 + $0x28] sm:$0xff]  }
  0x36   : > { %3608 = vmatprep.mubr.bf16.mxu0 %v770_v61  ;;  %v778_v3 = vsel %vm742_vm0, %v773_v62, %v777_v0  ;;  %v781_v4 = vor.u32 %v779_v59, %v777_v0  ;;  %v791_v10 = vshll.u32 %v4315_v5, 16  ;;  %3899 = vset.pattern.permute.xlu0 %v4053_v22  ;;  %v3956_v58 = vld [vmem:[#allocation2 + $0x30] sm:$0xff]   ;;  %v1736_v59 = vrot.slane %v3186_v49, 1  ;;  %v3447_v61 = vld [vmem:[%s4236_s17 + $0x8] sm:$0xff]  }
  0x37   : > { %3637 = vmatmul.mubr.bf16.gmra.mxu1 %v4282_v43  ;;  %v785_v8 = vrot.slane %v783_v2, 1  ;;  %3900 = vset.pattern.permute.xlu1 %v4053_v22  ;;  %v3155_v43 = vcombine.low %v1453_v37, %v1454_v38  ;;  %v3361_v0 = vunpack.c.l.bf16 %v3447_v61  ;;  %v3969_v37 = vld [vmem:[%s4953_s5 + $0x1f0] sm:$0xff]  }
  0x38   : > { %3677 = vmatpush3.bf16.msra.mxu1 %v3925_v40  ;;  %3640 = vmatprep.mubr.bf16.mxu1 %v4294_v54  ;;  %v793_v17 = vrot.slane %v791_v10, 1  ;;  %v3950_v40 = vld [vmem:[#allocation2 + $0x20] sm:$0xff]  }
  0x39   : > { %3678 = vmatprep.subr.bf16.mxu1 %v3928_v48  ;;  %3647 = vmatpush3.bf16.msra.mxu0 %v3924_v47  ;;  %v786_v13 = vsel %vm742_vm0, %v781_v4, %v785_v8  ;;  %v789_v15 = vor.u32 %v787_v6, %v785_v8  ;;  %v1094_v47 = vrot.slane %v4294_v54, 1  ;;  %v1519_v51 = vshll.u32 %v3155_v43, 16 }
  0x3a   : > { %3648 = vmatprep.subr.bf16.mxu0 %v3926_v55  ;;  %v1737_v54 = vrot.slane %v4370_v46, 1  ;;  %v563_v2 = vmul.f32 %v3361_v0, %v4188_v12  ;;  %v1098_v4 = vrot.slane %v4315_v5, 1  ;;  %v3959_v5 = vld [vmem:[%s4953_s5 + $0x148] sm:$0xff]  }
  0x3b   : > { %3609 = vmatmul.mubr.bf16.gmra.mxu0 %v778_v3  ;;  %v794_v21 = vsel %vm742_vm0, %v789_v15, %v793_v17  ;;  %v1095_v56 = vsel %vm1086_vm1, %v1092_v36, %v1094_v47  ;;  %v1521_v62 = vrot.slane %v1519_v51, 1  ;;  %v3958_v15 = vld [vmem:[%s4953_s5 + $0x110] sm:$0xff]   ;;  %v3967_v17 = vld [vmem:[#allocation2 + $0x18] sm:$0xff]  }
  0x3c   : > { %3679 = vmatpush3.bf16.msra.mxu1 %v3928_v48  ;;  %3612 = vmatprep.mubr.bf16.mxu0 %v786_v13  ;;  %v1096_v48 = vrot.slane %v4304_v63, 1  ;;  %v1738_v6 = vsel %vm1086_vm1, %v1736_v59, %v1737_v54  ;;  %v569_v10 = vadd.f32 %v4196_v16, %v563_v2 }
  0x3d   : > { %3680 = vmatprep.subr.bf16.mxu1 %v3931_v60  ;;  %3649 = vmatpush3.bf16.msra.mxu0 %v3926_v55  ;;  %v1517_v55 = vshrl.u32 %v3155_v43, 16 }
  0x3e   : > { %3650 = vmatprep.subr.bf16.mxu0 %v3930_v1  ;;  %v1097_v57 = vsel %vm1086_vm1, %v1094_v47, %v1096_v48 }
  0x3f   : > { %3641 = vmatmul.mubr.bf16.gmra.mxu1 %v4304_v63  ;;  %v1524_v63 = vshll.u32 %v4370_v46, 16  ;;  %v1522_v8 = vor.u32 %v1521_v62, %v1517_v55 }
  0x40   : > { %3681 = vmatpush3.bf16.msra.mxu1 %v3931_v60  ;;  %3688 = vmatprep.mubr.bf16.mxu1 %v3941_v11  ;;  %v3362_v60 = vunpack.c.h.bf16 %v3447_v61  ;;  %v575_v11 = vmax.f32 %v569_v10, 0.0  ;;  %v3448_v61 = vld [vmem:[%s4236_s17 + $0x10] sm:$0xff]  }
  0x41   : > { %3682 = vmatprep.subr.bf16.mxu1 %v3934_v9  ;;  %3651 = vmatpush3.bf16.msra.mxu0 %v3930_v1  ;;  %v3957_v1 = vld [vmem:[%s4953_s5 + $0x150] sm:$0xff]   ;;  %v3365_v0 = vunpack.c.l.bf16 %v3448_v61 }
  0x42   : > { %3652 = vmatprep.subr.bf16.mxu0 %v3932_v14  ;;  %v564_v3 = vmul.f32 %v3362_v60, %v4188_v12  ;;  %v3366_v60 = vunpack.c.h.bf16 %v3448_v61 }
  0x43   : > { %3613 = vmatmul.mubr.bf16.gmra.mxu0 %v794_v21  ;;  %v3972_v21 = vld [vmem:[#allocation2 + $0x20] sm:$0xff]  }
  0x44   : > { %3683 = vmatpush3.bf16.msra.mxu1 %v3934_v9  ;;  %3660 = vmatprep.mubr.bf16.mxu0 %v1089_v24  ;;  %v1526_v9 = vrot.slane %v1524_v63, 1  ;;  %v570_v12 = vadd.f32 %v4196_v16, %v564_v3  ;;  %v1528_v24 = vshrl.u32 %v4370_v46, 16  ;;  %v1544_v46 = vshrl.u32 %v3972_v21, 16 }
  0x45   : > { %3684 = vmatprep.subr.bf16.mxu1 %v3937_v20  ;;  %3653 = vmatpush3.bf16.msra.mxu0 %v3932_v14  ;;  %v1099_v14 = vsel %vm1086_vm1, %v1096_v48, %v1098_v4  ;;  %v3970_v48 = vld [vmem:[%s4953_s5 + $0x1b0] sm:$0xff]   ;;  %v3974_v4 = vld [vmem:[%s4953_s5 + $0x1a8] sm:$0xff]  }
  0x46   : > { %3654 = vmatprep.subr.bf16.mxu0 %v3936_v23  ;;  %v576_v13 = vmax.f32 %v570_v12, 0.0  ;;  %v1527_v16 = vsel %vm742_vm0, %v1522_v8, %v1526_v9  ;;  %v4011_v8 = vld [vmem:[%s4951_s3] ss:$0 sm:$0xff]  ;;  %v3977_v12 = vld [vmem:[%s4953_s5 + $0x1d8] sm:$0xff]  }
  0x47   : > { %v566_v10 = vmul.f32 %v4011_v8, %v3366_v60  ;;  %v3985_v60 = vld [vmem:[%s4953_s5 + $0x1c0] sm:$0xff]  }
  0x48   : > { %3685 = vmatpush3.bf16.msra.mxu1 %v3937_v20  ;;  %v3405_v18 = vpack.c.bf16 %v576_v13, %v575_v11  ;;  %v3960_v20 = vld [vmem:[%s4953_s5 + $0x108] sm:$0xff]  }
  0x49   : > { %3686 = vmatprep.subr.bf16.mxu1 %v3939_v25  ;;  %3655 = vmatpush3.bf16.msra.mxu0 %v3936_v23  ;;  %v3966_v23 = vld [vmem:[%s4953_s5 + $0x1f8] sm:$0xff]  }
  0x4a   : > { %3656 = vmatprep.subr.bf16.mxu0 %v3938_v26  ;;  %3455 = vst [vmem:[#allocation2 + $0x38] sm:$0xff] %v3405_v18   ;;  %v2606_v18 = vld [vmem:[%s4470_s20 + $0x8] sm:$0xff] }
  0x4b   : > { %vm2648_vm4 = vcmp.gt.f32.partialorder %v2606_v18, 0.0 }
  0x4c   : > { %3687 = vmatpush3.bf16.msra.mxu1 %v3939_v25  ;;  %v1739_v25 = vrot.slane %v3967_v17, 1 }
  0x4d   : > { %3728 = vmatprep.subr.bf16.mxu1 %v3942_v27  ;;  %3657 = vmatpush3.bf16.msra.mxu0 %v3938_v26  ;;  %v1532_v26 = vshll.u32 %v3967_v17, 16 }
  0x4e   : > { %3658 = vmatprep.subr.bf16.mxu0 %v3940_v28 }
  0x4f   : > { %3689 = vmatmul.mubr.bf16.vlgmr.msra.gmra.mxu1 %v3943_v29  ;;  %v3962_v29 = vld [vmem:[%s4953_s5 + $0x100] sm:$0xff]   ;;  %v1534_v36 = vrot.slane %v1532_v26, 1 }
  0x50   : > { %3729 = vmatpush3.bf16.msra.mxu1 %v3942_v27  ;;  %3692 = vmatprep.mubr.bf16.mxu1 %v3949_v31  ;;  %v1536_v27 = vshrl.u32 %v3967_v17, 16  ;;  %v1741_v31 = vrot.slane %v3972_v21, 1  ;;  %v2605_v17 = vld [vmem:[%s4470_s20] sm:$0xff] }
  0x51   : > { %3730 = vmatprep.subr.bf16.mxu1 %v3945_v30  ;;  %3659 = vmatpush3.bf16.msra.mxu0 %v3940_v28  ;;  %v4420_v28 = vld [vmem:[#allocation2 + $0x28] sm:$0xff]   ;;  %v4460_v59 = vld [vmem:[#allocation2 + $0x38] ss:$0 sps:$4 sm:$0x11]   ;;  %vm2647_vm3 = vcmp.gt.f32.partialorder %v2605_v17, 0.0 }
  0x52   : > { %3700 = vmatprep.subr.bf16.mxu0 %v3944_v34  ;;  %v1548_v38 = vshll.u32 %v4420_v28, 16  ;;  %v1538_v44 = vor.u32 %v1536_v27, %v1534_v36  ;;  %v1743_v47 = vrot.slane %v4420_v28, 1  ;;  %v1747_v13 = vrot.slane %v4460_v59, 1 }
  0x53   : > { %v2659_v27 = vsel %vm2647_vm3, 1, %v4053_v22 }
  0x54   : > { %3731 = vmatpush3.bf16.msra.mxu1 %v3945_v30  ;;  %3661 = vmatmul.mubr.bf16.vlgmr.msra.gmra.mxu0 %v1091_v39  ;;  %v1540_v30 = vshll.u32 %v3972_v21, 16  ;;  %v1530_v39 = vor.u32 %v1528_v24, %v1526_v9  ;;  %v1550_v49 = vrot.slane %v1548_v38, 1  ;;  %v565_v9 = vmul.f32 %v4011_v8, %v3365_v0  ;;  %v2612_v0 = vld [vmem:[%s4470_s20 + $0x38] sm:$0xff] }
  0x55   : > { %3732 = vmatprep.subr.bf16.mxu1 %v3947_v35  ;;  %3701 = vmatpush3.bf16.msra.mxu0 %v3944_v34  ;;  %v1740_v34 = vsel %vm1086_vm1, %v1737_v54, %v1739_v25  ;;  %vm2654_vm11 = vcmp.gt.f32.partialorder %v2612_v0, 0.0 }
  0x56   : > { %3664 = vmatprep.mubr.bf16.mxu0 %v1093_v42  ;;  %3702 = vmatprep.subr.bf16.mxu0 %v3946_v32  ;;  %v4438_v42 = vld [vmem:[#allocation2 + $0x30] sm:$0xff]   ;;  %v1535_v51 = vsel %vm742_vm0, %v1530_v39, %v1534_v36 }
  0x57   : > { %3693 = vmatmul.mubr.bf16.gmra.mxu1 %v3950_v40  ;;  %v3968_v40 = vld [vmem:[%s4953_s5 + $0x1b8] sm:$0xff]   ;;  %2672 = vperm.xlu0 %3899, %v2659_v27  }
  0x58   : > { %3733 = vmatpush3.bf16.msra.mxu1 %v3947_v35  ;;  %3696 = vmatprep.mubr.bf16.mxu1 %v3955_v45  ;;  %v4428_v35 = vld [vmem:[#allocation2 + $0x14] sm:$0xf]  ;;  %v3971_v45 = vld [vmem:[%s4953_s5 + $0x1e8] sm:$0xff]  }
  0x59   : > { %3734 = vmatprep.subr.bf16.mxu1 %v3951_v41  ;;  %3703 = vmatpush3.bf16.msra.mxu0 %v3946_v32  ;;  %v1742_v32 = vsel %vm1086_vm1, %v1739_v25, %v1741_v31  ;;  %v3241_v43 = vcombine.low %v2102_v33, %v4428_v35  ;;  %v2608_v33 = vld [vmem:[%s4470_s20 + $0x18] sm:$0xff] }
  0x5a   : > { %3704 = vmatprep.subr.bf16.mxu0 %v3948_v50  ;;  %vm2650_vm7 = vcmp.gt.f32.partialorder %v2608_v33, 0.0 }
  0x5b   : > { %v2168_v54 = vshll.u32 %v3241_v43, 16  ;;  %v2166_v63 = vshrl.u32 %v3241_v43, 16 }
  0x5c   : > { %3735 = vmatpush3.bf16.msra.mxu1 %v3951_v41  ;;  %3665 = vmatmul.mubr.bf16.gmra.mxu0 %v1095_v56  ;;  %v1542_v41 = vrot.slane %v1540_v30, 1  ;;  %v1552_v56 = vshrl.u32 %v4420_v28, 16  ;;  %v2607_v28 = vld [vmem:[%s4470_s20 + $0x10] sm:$0xff]  ;;  %v2618_v30 = vsel %vm2617_vm2, %v2605_v17, 0.0 }
  0x5d   : > { %3736 = vmatprep.subr.bf16.mxu1 %v3953_v52  ;;  %3705 = vmatpush3.bf16.msra.mxu0 %v3948_v50  ;;  %v1745_v50 = vrot.slane %v4438_v42, 1  ;;  %v2170_v2 = vrot.slane %v2168_v54, 1  ;;  %vm2649_vm5 = vcmp.gt.f32.partialorder %v2607_v28, 0.0  ;;  %v2621_v43 = vsel %vm2617_vm2, %v2607_v28, 0.0  ;;  %v2611_v54 = vld [vmem:[%s4470_s20 + $0x30] sm:$0xff]  ;;  %v2616_v28 = vld [vmem:[%s4470_s20 + $0x58] sm:$0xff] }
  0x5e   : > { %3668 = vmatprep.mubr.bf16.mxu0 %v1097_v57  ;;  %3706 = vmatprep.subr.bf16.mxu0 %v3952_v53  ;;  %v1543_v55 = vsel %vm742_vm0, %v1538_v44, %v1542_v41  ;;  %v1556_v57 = vshll.u32 %v4438_v42, 16  ;;  %v1546_v62 = vor.u32 %v1544_v46, %v1542_v41  ;;  %v2660_v41 = vsel %vm2648_vm4, 1, %v4053_v22  ;;  %v4515_v44 = vld [vmem:[#allocation2 + $0x20] sm:$0xff]  }
  0x5f   : > { %3697 = vmatmul.mubr.bf16.gmra.mxu1 %v3956_v58  ;;  %v1744_v58 = vsel %vm1086_vm1, %v1741_v31, %v1743_v47  ;;  %v2619_v31 = vsel %vm2617_vm2, %v2606_v18, 0.0  ;;  %v1748_v36 = vsel %vm1086_vm1, %v1745_v50, %v1747_v13  ;;  %2675 = vperm.xlu0 %3899, %v2660_v41   ;;  %vm2653_vm8 = vcmp.gt.f32.partialorder %v2611_v54, 0.0  ;;  %v2614_v13 = vld [vmem:[%s4470_s20 + $0x48] sm:$0xff] }
  0x60   : > { %3737 = vmatpush3.bf16.msra.mxu1 %v3953_v52  ;;  %3744 = vmatprep.mubr.bf16.mxu1 %v1738_v6  ;;  %v3975_v52 = vld [vmem:[%s4953_s5 + $0x1e0] sm:$0xff]   ;;  %v1554_v6 = vor.u32 %v1552_v56, %v1550_v49  ;;  %v1551_v11 = vsel %vm742_vm0, %v1546_v62, %v1550_v49  ;;  %v2620_v38 = vadd.f32 %v2619_v31, %v2618_v30  ;;  %v3983_v49 = vld [vmem:[%s4953_s5 + $0x1c8] sm:$0xff]   ;;  %v3990_v56 = vld [vmem:[#allocation2 + $0x10] sm:$0xff]   ;;  %v2181_v62 = vshll.u32 %v4515_v44, 16 }
  0x61   : > { %3738 = vmatprep.subr.bf16.mxu1 %v3957_v1  ;;  %3707 = vmatpush3.bf16.msra.mxu0 %v3952_v53  ;;  %v4454_v53 = vld [vmem:[#allocation2 + $0x18] sm:$0xff]   ;;  %v2665_v8 = vsel %vm2653_vm8, 1, %v4053_v22  ;;  %v3993_v30 = vld [vmem:[%s4953_s5 + $0x230] sm:$0xff]   ;;  %v2639_v41 = vsel %vm2617_vm2, %v2616_v28, 0.0  ;;  %vm2656_vm13 = vcmp.gt.f32.partialorder %v2614_v13, 0.0  ;;  %vm2658_vm14 = vcmp.gt.f32.partialorder %v2616_v28, 0.0 }
  0x62   : > { %3708 = vmatprep.subr.bf16.mxu0 %v3954_v7  ;;  %v2173_v3 = vshll.u32 %v4454_v53, 16  ;;  %v2622_v46 = vadd.f32 %v2621_v43, %v2620_v38  ;;  %v2177_v61 = vshrl.u32 %v4454_v53, 16 }
  0x64   : > { %3739 = vmatpush3.bf16.msra.mxu1 %v3957_v1  ;;  %3669 = vmatmul.mubr.bf16.gmra.mxu0 %v1099_v14  ;;  %v1746_v1 = vsel %vm1086_vm1, %v1743_v47, %v1745_v50  ;;  %v4012_v14 = vld [vmem:[%s4952_s4] ss:$0 sm:$0xff]  ;;  %v4490_v21 = vrot.slane %v2173_v3, 1  ;;  %v2623_v47 = vsel %vm2617_vm2, %v2608_v33, 0.0 }
  0x65   : > { %3740 = vmatprep.subr.bf16.mxu1 %v3959_v5  ;;  %3709 = vmatpush3.bf16.msra.mxu0 %v3954_v7  ;;  %v1558_v7 = vrot.slane %v1556_v57, 1 }
  0x66   : > { %3716 = vmatprep.mubr.bf16.mxu0 %v1527_v16  ;;  %3710 = vmatprep.subr.bf16.mxu0 %v3958_v15  ;;  %v572_v16 = vadd.f32 %v4012_v14, %v566_v10  ;;  %v3984_v10 = vld [vmem:[%s4953_s5 + $0x188] sm:$0xff]  }
  0x67   : > { %v1559_v24 = vsel %vm742_vm0, %v1554_v6, %v1558_v7 }
  0x68   : > { %3741 = vmatpush3.bf16.msra.mxu1 %v3959_v5  ;;  %v1560_v5 = vshrl.u32 %v4438_v42, 16  ;;  %v578_v26 = vmax.f32 %v572_v16, 0.0  ;;  %v3980_v42 = vld [vmem:[%s4953_s5 + $0x198] sm:$0xff]  }
  0x69   : > { %3742 = vmatprep.subr.bf16.mxu1 %v3961_v19  ;;  %3711 = vmatpush3.bf16.msra.mxu0 %v3958_v15  ;;  %v571_v15 = vadd.f32 %v4012_v14, %v565_v9  ;;  %v2631_v9 = vsel %vm2617_vm2, %v2612_v0, 0.0  ;;  %v4557_v14 = vld [vmem:[%s4953_s5 + $0x238] sm:$0xff]   ;;  %v2670_v0 = vsel %vm2658_vm14, 1, %v4053_v22 }
  0x6a   : > { %3712 = vmatprep.subr.bf16.mxu0 %v3960_v20 }
  0x6b   : > { %v577_v25 = vmax.f32 %v571_v15, 0.0  ;;  %v4559_v15 = vld [vmem:[#allocation2 + $0x30] sm:$0xff]  }
  0x6c   : > { %3743 = vmatpush3.bf16.msra.mxu1 %v3961_v19  ;;  %v1564_v19 = vshll.u32 %v4460_v59, 16  ;;  %v3982_v59 = vld [vmem:[%s4953_s5 + $0x190] sm:$0xff]   ;;  %v2197_v31 = vshll.u32 %v4559_v15, 16 }
  0x6d   : > { %3784 = vmatprep.subr.bf16.mxu1 %v3966_v23  ;;  %3713 = vmatpush3.bf16.msra.mxu0 %v3960_v20  ;;  %v2171_v20 = vor.u32 %v2170_v2, %v2166_v63  ;;  %v2185_v2 = vshrl.u32 %v4515_v44, 16 }
  0x6e   : > { %3714 = vmatprep.subr.bf16.mxu0 %v3962_v29  ;;  %v1566_v39 = vrot.slane %v1564_v19, 1 }
  0x6f   : > { %3745 = vmatmul.mubr.bf16.vlgmr.msra.gmra.mxu1 %v1740_v34  ;;  %v1562_v34 = vor.u32 %v1560_v5, %v1558_v7  ;;  %v2613_v7 = vld [vmem:[%s4470_s20 + $0x40] sm:$0xff]  ;;  %v2183_v5 = vrot.slane %v2181_v62, 1 }
  0x70   : > { %3785 = vmatpush3.bf16.msra.mxu1 %v3966_v23  ;;  %3748 = vmatprep.mubr.bf16.mxu1 %v1742_v32  ;;  %v3976_v23 = vld [vmem:[%s4953_s5 + $0x1a0] sm:$0xff]   ;;  %vm2655_vm10 = vcmp.gt.f32.partialorder %v2613_v7, 0.0  ;;  %v2633_v16 = vsel %vm2617_vm2, %v2613_v7, 0.0 }
  0x71   : > { %3786 = vmatprep.subr.bf16.mxu1 %v3969_v37  ;;  %3715 = vmatpush3.bf16.msra.mxu0 %v3962_v29  ;;  %v3981_v29 = vld [vmem:[%s4953_s5 + $0x1d0] sm:$0xff]   ;;  %v2609_v32 = vld [vmem:[%s4470_s20 + $0x20] sm:$0xff]  ;;  %v2187_v17 = vor.u32 %v2185_v2, %v2183_v5 }
  0x72   : > { %3756 = vmatprep.subr.bf16.mxu0 %v3968_v40  ;;  %vm2651_vm6 = vcmp.gt.f32.partialorder %v2609_v32, 0.0  ;;  %v2625_v50 = vsel %vm2617_vm2, %v2609_v32, 0.0  ;;  %v2364_v2 = vld [vmem:[#allocation2 + $0x10] sm:$0xe] }
  0x73   : > { %v2663_v57 = vsel %vm2651_vm6, 1, %v4053_v22 }
  0x74   : > { %3787 = vmatpush3.bf16.msra.mxu1 %v3969_v37  ;;  %3717 = vmatmul.mubr.bf16.vlgmr.msra.gmra.mxu0 %v1535_v51  ;;  %v3410_v37 = vpack.c.bf16 %v578_v26, %v577_v25  ;;  %v4525_v51 = vld [vmem:[#allocation2 + $0x28] sm:$0xff]   ;;  %v2635_v25 = vsel %vm2617_vm2, %v2614_v13, 0.0  ;;  %v3986_v26 = vld [vmem:[%s4953_s5 + $0x180] sm:$0xff]  }
  0x75   : > { %3788 = vmatprep.subr.bf16.mxu1 %v3971_v45  ;;  %3757 = vmatpush3.bf16.msra.mxu0 %v3968_v40  ;;  %v2176_v40 = vsel %vm742_vm0, %v2171_v20, %v4490_v21  ;;  %v2189_v3 = vshll.u32 %v4525_v51, 16 }
  0x76   : > { %3720 = vmatprep.mubr.bf16.mxu0 %v1543_v55  ;;  %3758 = vmatprep.subr.bf16.mxu0 %v3970_v48  ;;  %3456 = vst [vmem:[#allocation2 + $0x40] sm:$0xff] %v3410_v37   ;;  %v1567_v55 = vsel %vm742_vm0, %v1562_v34, %v1566_v39  ;;  %v2201_v37 = vshrl.u32 %v4559_v15, 16  ;;  %v2666_v39 = vsel %vm2654_vm11, 1, %v4053_v22 }
  0x77   : > { %3749 = vmatmul.mubr.bf16.gmra.mxu1 %v1744_v58  ;;  %2684 = vperm.xlu0 %3899, %v2663_v57   ;;  %v2191_v18 = vrot.slane %v2189_v3, 1  ;;  %v3999_v57 = vld [vmem:[%s4953_s5 + $0x220] sm:$0xff]   ;;  %v3996_v3 = vld [vmem:[#allocation2 + $0x28] sm:$0xff]  }
  0x78   : > { %3789 = vmatpush3.bf16.msra.mxu1 %v3971_v45  ;;  %3752 = vmatprep.mubr.bf16.mxu1 %v1746_v1  ;;  %v2661_v45 = vsel %vm2649_vm5, 1, %v4053_v22  ;;  %v2629_v1 = vsel %vm2617_vm2, %v2611_v54, 0.0 }
  0x79   : > { %3790 = vmatprep.subr.bf16.mxu1 %v3975_v52  ;;  %3759 = vmatpush3.bf16.msra.mxu0 %v3970_v48  ;;  %v2610_v48 = vld [vmem:[%s4470_s20 + $0x28] sm:$0xff]  ;;  %v2192_v34 = vsel %vm742_vm0, %v2187_v17, %v2191_v18  ;;  %v4002_v17 = vld [vmem:[#allocation2 + $0x38] sm:$0xff]  }
  0x7a   : > { %3760 = vmatprep.subr.bf16.mxu0 %v3974_v4  ;;  %2678 = vperm.xlu1 %3900, %v2661_v45   ;;  %v2627_v58 = vsel %vm2617_vm2, %v2610_v48, 0.0  ;;  %vm2652_vm9 = vcmp.gt.f32.partialorder %v2610_v48, 0.0  ;;  %v2199_v45 = vrot.slane %v2197_v31, 1 }
  0x7b   : > { %2690 = vperm.xlu0 %3899, %v2665_v8   ;;  %v2664_v19 = vsel %vm2652_vm9, 1, %v4053_v22  ;;  %v4001_v8 = vld [vmem:[#allocation2 + $0x30] sm:$0xff]  }
  0x7c   : > { %3791 = vmatpush3.bf16.msra.mxu1 %v3975_v52  ;;  %3721 = vmatmul.mubr.bf16.gmra.mxu0 %v1551_v11  ;;  %v2624_v52 = vadd.f32 %v2623_v47, %v2622_v46  ;;  %v3992_v46 = vld [vmem:[#allocation2 + $0x18] sm:$0xff]  }
  0x7d   : > { %3792 = vmatprep.subr.bf16.mxu1 %v3977_v12  ;;  %3761 = vmatpush3.bf16.msra.mxu0 %v3974_v4  ;;  %v2662_v4 = vsel %vm2650_vm7, 1, %v4053_v22  ;;  %v4594_v48 = vld [vmem:[#allocation2 + $0x40] ss:$0 sps:$4 sm:$0x11]  }
  0x7e   : > { %3724 = vmatprep.mubr.bf16.mxu0 %v1559_v24  ;;  %3762 = vmatprep.subr.bf16.mxu0 %v3976_v23  ;;  %v2626_v63 = vadd.f32 %v2625_v50, %v2624_v52  ;;  %v2667_v24 = vsel %vm2655_vm10, 1, %v4053_v22  ;;  %v3995_v50 = vld [vmem:[#allocation2 + $0x20] sm:$0xff]   ;;  %v2203_v52 = vor.u32 %v2201_v37, %v2199_v45 }
  0x7f   : > { %3753 = vmatmul.mubr.bf16.gmra.mxu1 %v1748_v36  ;;  %2681 = vperm.xlu1 %3900, %v2662_v4   ;;  %v2193_v36 = vshrl.u32 %v4525_v51, 16 }
  0x80   : > { %3793 = vmatpush3.bf16.msra.mxu1 %v3977_v12  ;;  %3800 = vmatprep.mubr.bf16.mxu1 %v2176_v40  ;;  %v2628_v6 = vadd.f32 %v2627_v58, %v2626_v63  ;;  %v2179_v12 = vor.u32 %v2177_v61, %v4490_v21  ;;  %v2615_v21 = vld [vmem:[%s4470_s20 + $0x50] sm:$0xff]  ;;  %v2213_v61 = vshll.u32 %v4594_v48, 16 }
  0x81   : > { %3794 = vmatprep.subr.bf16.mxu1 %v3981_v29  ;;  %3763 = vmatpush3.bf16.msra.mxu0 %v3976_v23  ;;  %v4565_v23 = vld [vmem:[#allocation2 + $0x38] sm:$0xff]   ;;  %vm2657_vm12 = vcmp.gt.f32.partialorder %v2615_v21, 0.0  ;;  %v2637_v33 = vsel %vm2617_vm2, %v2615_v21, 0.0  ;;  %v2195_v47 = vor.u32 %v2193_v36, %v2191_v18 }
  0x82   : > { %3764 = vmatprep.subr.bf16.mxu0 %v3980_v42  ;;  %v2630_v11 = vadd.f32 %v2629_v1, %v2628_v6  ;;  %v2184_v27 = vsel %vm742_vm0, %v2179_v12, %v2183_v5  ;;  %2696 = vperm.xlu0 %3899, %v2667_v24   ;;  %v2205_v32 = vshll.u32 %v4565_v23, 16  ;;  %v2669_v40 = vsel %vm2657_vm12, 1, %v4053_v22  ;;  %v4000_v1 = vld [vmem:[%s4953_s5 + $0x218] sm:$0xff]   ;;  %v4005_v5 = vld [vmem:[%s4953_s5 + $0x210] sm:$0xff]  }
  0x83   : > { %2687 = vperm.xlu1 %3900, %v2664_v19   ;;  %v2200_v58 = vsel %vm742_vm0, %v2195_v47, %v2199_v45  ;;  %v2215_v6 = vrot.slane %v2213_v61, 1  ;;  %v2392_v19 = vrot.slane %v4559_v15, 1 }
  0x84   : > { %3795 = vmatpush3.bf16.msra.mxu1 %v3981_v29  ;;  %3725 = vmatmul.mubr.bf16.gmra.mxu0 %v1567_v55  ;;  %v2632_v20 = vadd.f32 %v2631_v9, %v2630_v11  ;;  %v2207_v54 = vrot.slane %v2205_v32, 1  ;;  %v2668_v55 = vsel %vm2656_vm13, 1, %v4053_v22  ;;  %v2388_v22 = vrot.slane %v4515_v44, 1 }
  0x85   : > { %3796 = vmatprep.subr.bf16.mxu1 %v3983_v49  ;;  %3765 = vmatpush3.bf16.msra.mxu0 %v3980_v42  ;;  %v3994_v42 = vld [vmem:[%s4953_s5 + $0x228] sm:$0xff]   ;;  %v2390_v9 = vrot.slane %v4525_v51, 1 }
  0x86   : > { %3772 = vmatprep.mubr.bf16.mxu0 %v3990_v56  ;;  %3766 = vmatprep.subr.bf16.mxu0 %v3982_v59  ;;  %v2634_v29 = vadd.f32 %v2633_v16, %v2632_v20  ;;  %v2208_v63 = vsel %vm742_vm0, %v2203_v52, %v2207_v54  ;;  %v4006_v16 = vld [vmem:[%s4953_s5 + $0x208] sm:$0xff]   ;;  %v2394_v20 = vrot.slane %v4565_v23, 1 }
  0x87   : > { %2693 = vperm.xlu1 %3900, %v2666_v39   ;;  %2702 = vperm.xlu0 %3899, %v2669_v40   ;;  %v2391_v44 = vsel %vm1086_vm1, %v2388_v22, %v2390_v9  ;;  %v2393_v21 = vsel %vm1086_vm1, %v2390_v9, %v2392_v19 }
  0x88   : > { %3797 = vmatpush3.bf16.msra.mxu1 %v3983_v49  ;;  %v2636_v38 = vadd.f32 %v2635_v25, %v2634_v29  ;;  %v2395_v24 = vsel %vm1086_vm1, %v2392_v19, %v2394_v20  ;;  %v2396_v25 = vrot.slane %v4594_v48, 1 }
  0x89   : > { %3798 = vmatprep.subr.bf16.mxu1 %v3985_v60  ;;  %3767 = vmatpush3.bf16.msra.mxu0 %v3982_v59  ;;  %v2209_v59 = vshrl.u32 %v4565_v23, 16 }
  0x8a   : > { %3768 = vmatprep.subr.bf16.mxu0 %v3984_v10  ;;  %v2638_v43 = vadd.f32 %v2637_v33, %v2636_v38  ;;  %v2397_v15 = vsel %vm1086_vm1, %v2394_v20, %v2396_v25 }
  0x8b   : > { %2699 = vperm.xlu1 %3900, %v2668_v55   ;;  %v2211_v4 = vor.u32 %v2209_v59, %v2207_v54 }
  0x8c   : > { %3799 = vmatpush3.bf16.msra.mxu1 %v3985_v60  ;;  %v2640_v49 = vadd.f32 %v2639_v41, %v2638_v43 }
  0x8d   : > { %3840 = vmatprep.subr.bf16.mxu1 %v4557_v14  ;;  %3769 = vmatpush3.bf16.msra.mxu0 %v3984_v10  ;;  %v3272_v10 = vcombine.low %v2364_v2, %v4428_v35  ;;  %v2216_v11 = vsel %vm742_vm0, %v2211_v4, %v2215_v6 }
  0x8e   : > { %3770 = vmatprep.subr.bf16.mxu0 %v3986_v26  ;;  %v2641_v56 = vrot.slane %v2640_v49, 4 }
  0x8f   : > { %3801 = vmatmul.mubr.bf16.vlgmr.msra.gmra.mxu1 %v2184_v27  ;;  %2705 = vperm.xlu1 %3900, %v2670_v0   ;;  %v2385_v51 = vrot.slane %v3272_v10, 1 }
  0x90   : > { %3848 = vmatpush3.bf16.msra.mxu1 %v4557_v14  ;;  %3804 = vmatprep.mubr.bf16.mxu1 %v2192_v34  ;;  %v2642_v62 = vadd.f32 %v2641_v56, %v2640_v49 }
  0x91   : > { %3841 = vmatprep.subr.bf16.mxu1 %v3993_v30  ;;  %3771 = vmatpush3.bf16.msra.mxu0 %v3986_v26 }
  0x92   : > { %3812 = vmatprep.subr.bf16.mxu0 %v4557_v14  ;;  %v2643_v60 = vrot.slane %v2642_v62, 2 }
  0x94   : > { %3849 = vmatpush3.bf16.msra.mxu1 %v3993_v30  ;;  %3773 = vmatmul.mubr.bf16.vlgmr.msra.gmra.mxu0 %v3992_v46  ;;  %v2644_v7 = vadd.f32 %v2643_v60, %v2642_v62 }
  0x95   : > { %3842 = vmatprep.subr.bf16.mxu1 %v3994_v42  ;;  %3813 = vmatpush3.bf16.msra.mxu0 %v4557_v14  ;;  %v2386_v14 = vrot.slane %v4454_v53, 1  ;;  %v4007_v53 = vld [vmem:[%s4953_s5 + $0x200] sm:$0xff]  }
  0x96   : > { %3776 = vmatprep.mubr.bf16.mxu0 %v3995_v50  ;;  %3814 = vmatprep.subr.bf16.mxu0 %v3993_v30  ;;  %v2645_v12 = vrot.slane %v2644_v7, 1 }
  0x97   : > { %3805 = vmatmul.mubr.bf16.gmra.mxu1 %v2200_v58  ;;  %v2387_v18 = vsel %vm1086_vm1, %v2385_v51, %v2386_v14  ;;  %v2389_v26 = vsel %vm1086_vm1, %v2386_v14, %v2388_v22 }
  0x98   : > { %3850 = vmatpush3.bf16.msra.mxu1 %v3994_v42  ;;  %3808 = vmatprep.mubr.bf16.mxu1 %v2208_v63  ;;  %v2646_v13 = vadd.f32 %v2645_v12, %v2644_v7 }
  0x99   : > { %3843 = vmatprep.subr.bf16.mxu1 %v3999_v57  ;;  %3815 = vmatpush3.bf16.msra.mxu0 %v3993_v30 }
  0x9a   : > { %3816 = vmatprep.subr.bf16.mxu0 %v3994_v42  ;;  %v2748_v35 = vmax.f32 %v2646_v13, 1.0 }
  0x9c   : > { %3851 = vmatpush3.bf16.msra.mxu1 %v3999_v57  ;;  %3777 = vmatmul.mubr.bf16.gmra.mxu0 %v3996_v3 }
  0x9d   : > { %3844 = vmatprep.subr.bf16.mxu1 %v4000_v1  ;;  %3817 = vmatpush3.bf16.msra.mxu0 %v3994_v42 }
  0x9e   : > { %3780 = vmatprep.mubr.bf16.mxu0 %v4001_v8  ;;  %3818 = vmatprep.subr.bf16.mxu0 %v3999_v57 }
  0x9f   : > { %3809 = vmatmul.mubr.bf16.gmra.mxu1 %v2216_v11  ;;  %2751 = vperm.xlu0 %3899, %v2748_v35  }
  0xa0   : > { %3852 = vmatpush3.bf16.msra.mxu1 %v4000_v1  ;;  %3832 = vmatprep.mubr.bf16.mxu1 %v2391_v44 }
  0xa1   : > { %3845 = vmatprep.subr.bf16.mxu1 %v4005_v5  ;;  %3819 = vmatpush3.bf16.msra.mxu0 %v3999_v57 }
  0xa2   : > { %3820 = vmatprep.subr.bf16.mxu0 %v4000_v1 }
  0xa4   : > { %3853 = vmatpush3.bf16.msra.mxu1 %v4005_v5  ;;  %3781 = vmatmul.mubr.bf16.gmra.mxu0 %v4002_v17 }
  0xa5   : > { %3846 = vmatprep.subr.bf16.mxu1 %v4006_v16  ;;  %3821 = vmatpush3.bf16.msra.mxu0 %v4000_v1 }
  0xa6   : > { %3828 = vmatprep.mubr.bf16.mxu0 %v2387_v18  ;;  %3822 = vmatprep.subr.bf16.mxu0 %v4005_v5 }
  0xa8   : > { %3854 = vmatpush3.bf16.msra.mxu1 %v4006_v16 }
  0xa9   : > { %3847 = vmatprep.subr.bf16.mxu1 %v4007_v53  ;;  %3823 = vmatpush3.bf16.msra.mxu0 %v4005_v5 }
  0xaa   : > { %3824 = vmatprep.subr.bf16.mxu0 %v4006_v16 }
  0xac   : > { %3855 = vmatpush3.bf16.msra.mxu1 %v4007_v53 }
  0xad   : > { %3825 = vmatpush3.bf16.msra.mxu0 %v4006_v16 }
  0xae   : > { %3826 = vmatprep.subr.bf16.mxu0 %v4007_v53 }
  0xaf   : > { %3833 = vmatmul.mubr.bf16.vlgmr.msra.gmra.mxu1 %v2393_v21 }
  0xb0   : > { %3836 = vmatprep.mubr.bf16.mxu1 %v2395_v24 }
  0xb1   : > { %3827 = vmatpush3.bf16.msra.mxu0 %v4007_v53 }
  0xb4   : > { %3829 = vmatmul.mubr.bf16.vlgmr.msra.gmra.mxu0 %v2389_v26 }
  0xb7   : > { %3837 = vmatmul.mubr.bf16.gmra.mxu1 %v2397_v15 }
  0xef   : > { %v3634_v23 = vpop.f32.mrf.mxu1 }
  0xf1   : > { %v1018_v27 = vpop.f32.mrf.mxu1 }
  0xf3   : > { %v3635_v28 = vpop.f32.mrf.mxu1  ;;  %v3606_v30 = vpop.f32.mrf.mxu0 }
  0xf4   : > { %v1027_v31 = vadd.f32 %v3634_v23, %v3606_v30 }
  0xf5   : > { %v1021_v29 = vpop.f32.mrf.mxu1  ;;  %v883_v34 = vpop.f32.mrf.mxu0 }
  0xf6   : > { %v1019_v36 = vadd.f32 %v1018_v27, %v883_v34 }
  0xf7   : > { %v3638_v33 = vpop.f32.mrf.mxu1  ;;  %v3607_v38 = vpop.f32.mrf.mxu0 }
  0xf8   : > { %v1030_v32 = vadd.f32 %v3635_v28, %v3607_v38 }
  0xf9   : > { %v1034_v37 = vpop.f32.mrf.mxu1  ;;  %v886_v40 = vpop.f32.mrf.mxu0 }
  0xfa   : > { %v1022_v41 = vadd.f32 %v1021_v29, %v886_v40 }
  0xfb   : > { %v3639_v39 = vpop.f32.mrf.mxu1  ;;  %v3610_v42 = vpop.f32.mrf.mxu0 }
  0xfc   : > { %v4634_v45 = vadd.f32 %v3638_v33, %v3610_v42 }
  0xfd   : > { %v1037_v43 = vpop.f32.mrf.mxu1  ;;  %v899_v46 = vpop.f32.mrf.mxu0 }
  0xfe   : > { %v4636_v47 = vadd.f32 %v1034_v37, %v899_v46 }
  0xff   : > { %v3642_v48 = vpop.f32.mrf.mxu1  ;;  %v3611_v49 = vpop.f32.mrf.mxu0 }
 0x100   : > { %v4638_v50 = vadd.f32 %v3639_v39, %v3611_v49 }
 0x101   : > { %v1050_v52 = vpop.f32.mrf.mxu1  ;;  %v902_v54 = vpop.f32.mrf.mxu0 }
 0x102   : > { %v4640_v55 = vadd.f32 %v1037_v43, %v902_v54 }
 0x103   : > { %v3614_v56 = vpop.f32.mrf.mxu0  ;;  %v3643_v57 = vpop.f32.mrf.mxu1 }
 0x104   : > { %v4642_v58 = vadd.f32 %v3642_v48, %v3614_v56 }
 0x105   : > { %v915_v59 = vpop.f32.mrf.mxu0  ;;  %v1053_v63 = vpop.f32.mrf.mxu1 }
 0x106   : > { %v4644_v61 = vadd.f32 %v1050_v52, %v915_v59 }
 0x107   : > { %v3615_v62 = vpop.f32.mrf.mxu0 }
 0x108   : > { %v4646_v0 = vadd.f32 %v3643_v57, %v3615_v62 }
 0x109   : > { %v918_v60 = vpop.f32.mrf.mxu0 }
 0x10a   : > { %v4648_v1 = vadd.f32 %v1053_v63, %v918_v60 }
 0x10f   : > { %v3690_v2 = vpop.f32.mrf.mxu1 }
 0x111   : > { %v1394_v3 = vpop.f32.mrf.mxu1 }
 0x113   : > { %v3691_v4 = vpop.f32.mrf.mxu1 }
 0x114   : > { %v3662_v7 = vpop.f32.mrf.mxu0 }
 0x115   : > { %v1397_v6 = vpop.f32.mrf.mxu1  ;;  %v1237_v8 = vadd.f32 %v3662_v7, %v1027_v31 }
 0x116   : > { %v1188_v22 = vpop.f32.mrf.mxu0 }
 0x117   : > { %v1235_v9 = vadd.f32 %v1188_v22, %v1019_v36  ;;  %v4650_v10 = vadd.f32 %v3690_v2, %v1237_v8  ;;  %v4652_v12 = vpop.f32.mrf.mxu1 }
 0x118   : > { %v3663_v5 = vpop.f32.mrf.mxu0 }
 0x119   : > { %v1238_v11 = vadd.f32 %v3663_v5, %v1030_v32  ;;  %v4654_v13 = vadd.f32 %v1394_v3, %v1235_v9  ;;  %v4656_v44 = vpop.f32.mrf.mxu1 }
 0x11a   : > { %v1191_v51 = vpop.f32.mrf.mxu0 }
 0x11b   : > { %v1236_v14 = vadd.f32 %v1191_v51, %v1022_v41  ;;  %v4658_v35 = vadd.f32 %v3691_v4, %v1238_v11  ;;  %v3695_v16 = vpop.f32.mrf.mxu1 }
 0x11c   : > { %v3666_v17 = vpop.f32.mrf.mxu0 }
 0x11d   : > { %v4660_v18 = vadd.f32 %v1397_v6, %v1236_v14  ;;  %v1413_v53 = vpop.f32.mrf.mxu1 }
 0x11e   : > { %v1204_v19 = vpop.f32.mrf.mxu0 }
 0x11f   : > { %v4662_v20 = vpop.f32.mrf.mxu1 }
 0x120   : > { %v3667_v21 = vpop.f32.mrf.mxu0 }
 0x121   : > { %v4664_v25 = vpop.f32.mrf.mxu1 }
 0x122   : > { %v1207_v24 = vpop.f32.mrf.mxu0 }
 0x123   : > { %v4666_v15 = vpop.f32.mrf.mxu1 }
 0x124   : > { %v3670_v26 = vpop.f32.mrf.mxu0 }
 0x125   : > { %v4668_v27 = vpop.f32.mrf.mxu1 }
 0x126   : > { %v1220_v23 = vpop.f32.mrf.mxu0 }
 0x128   : > { %v3671_v29 = vpop.f32.mrf.mxu0 }
 0x12a   : > { %v1223_v33 = vpop.f32.mrf.mxu0 }
 0x12f   : > { %v4670_v28 = vpop.f32.mrf.mxu1 }
 0x131   : > { %v4672_v30 = vpop.f32.mrf.mxu1 }
 0x133   : > { %v4674_v31 = vpop.f32.mrf.mxu1 }
 0x134   : > { %v4678_v36 = vpop.f32.mrf.mxu0 }
 0x135   : > { %v4676_v34 = vpop.f32.mrf.mxu1 }
 0x136   : > { %v4680_v37 = vpop.f32.mrf.mxu0 }
 0x137   : > { %v3750_v38 = vpop.f32.mrf.mxu1 }
 0x138   : > { %v3719_v32 = vpop.f32.mrf.mxu0 }
 0x139   : > { %v4682_v39 = vpop.f32.mrf.mxu1 }
 0x13a   : > { %v1659_v40 = vpop.f32.mrf.mxu0 }
 0x13b   : > { %v3751_v41 = vpop.f32.mrf.mxu1 }
 0x13c   : > { %v3722_v43 = vpop.f32.mrf.mxu0 }
 0x13d   : > { %v1856_v42 = vpop.f32.mrf.mxu1 }
 0x13e   : > { %v1672_v46 = vpop.f32.mrf.mxu0 }
 0x13f   : > { %v4684_v48 = vpop.f32.mrf.mxu1 }
 0x140   : > { %4957 = vst [vmem:[#allocation3_spill] sm:$0xff] %v4684_v48  ;;  %v3723_v49 = vpop.f32.mrf.mxu0  ;;  %v1245_v48 = vadd.f32 %v3670_v26, %v4642_v58  ;;  %v1703_v26 = vadd.f32 %v4680_v37, %v4654_v13 }
 0x141   : > { %v4686_v54 = vpop.f32.mrf.mxu1 }
 0x142   : > { %v1675_v52 = vpop.f32.mrf.mxu0  ;;  %4958 = vst [vmem:[#allocation4_spill] sm:$0xff] %v4686_v54 }
 0x143   : > { %v4688_v57 = vpop.f32.mrf.mxu1 }
 0x144   : > { %v3726_v56 = vpop.f32.mrf.mxu0  ;;  %4959 = vst [vmem:[#allocation5_spill] sm:$0xff] %v4688_v57 }
 0x145   : > { %v4690_v62 = vpop.f32.mrf.mxu1 }
 0x146   : > { %v1688_v59 = vpop.f32.mrf.mxu0  ;;  %4960 = vst [vmem:[#allocation6_spill] sm:$0xff] %v4690_v62 }
 0x148   : > { %v3727_v60 = vpop.f32.mrf.mxu0 }
 0x14a   : > { %v1691_v4 = vpop.f32.mrf.mxu0 }
 0x14f   : > { %v4692_v63 = vpop.f32.mrf.mxu1 }
 0x150   : > { %4961 = vst [vmem:[#allocation7_spill] sm:$0xff] %v4692_v63 }
 0x151   : > { %v4694_v2 = vpop.f32.mrf.mxu1 }
 0x152   : > { %4962 = vst [vmem:[#allocation8_spill] sm:$0xff] %v4694_v2 }
 0x153   : > { %v4696_v3 = vpop.f32.mrf.mxu1 }
 0x154   : > { %4963 = vst [vmem:[#allocation9_spill] sm:$0xff] %v4696_v3  ;;  %v4700_v7 = vpop.f32.mrf.mxu0 }
 0x155   : > { %v4698_v6 = vpop.f32.mrf.mxu1  ;;  %4965 = vst [vmem:[#allocation11_spill] sm:$0xff] %v4700_v7  ;;  %v1242_v7 = vadd.f32 %v3667_v21, %v4638_v50  ;;  %v1246_v50 = vadd.f32 %v3671_v29, %v4646_v0  ;;  %v1704_v29 = vadd.f32 %v1659_v40, %v4660_v18  ;;  %v1884_v18 = vadd.f32 %v4672_v30, %v1703_v26 }
 0x156   : > { %4964 = vst [vmem:[#allocation10_spill] sm:$0xff] %v4698_v6  ;;  %v4702_v8 = vpop.f32.mrf.mxu0  ;;  %v1241_v6 = vadd.f32 %v3666_v17, %v4634_v45  ;;  %v1243_v45 = vadd.f32 %v1220_v23, %v4644_v61  ;;  %v1244_v17 = vadd.f32 %v1223_v33, %v4648_v1  ;;  %v1705_v1 = vadd.f32 %v4678_v36, %v4650_v10 }
 0x157   : > { %4966 = vst [vmem:[#allocation12_spill] sm:$0xff] %v4702_v8  ;;  %v3806_v22 = vpop.f32.mrf.mxu1  ;;  %v1239_v8 = vadd.f32 %v1204_v19, %v4636_v47  ;;  %v1448_v54 = vadd.f32 %v3695_v16, %v1242_v7  ;;  %v1452_v58 = vadd.f32 %v4666_v15, %v1246_v50  ;;  %v1706_v23 = vadd.f32 %v3719_v32, %v4658_v35  ;;  %v4745_v32 = vpop.permute.xlu1 %2678 }
 0x158   : > { %v4704_v9 = vpop.f32.mrf.mxu0  ;;  %v1450_v16 = vadd.f32 %v4668_v27, %v1244_v17  ;;  %v1886_v35 = vadd.f32 %v4670_v28, %v1705_v1  ;;  %vm2709_vm1 = vcmp.eq.s32.totalorder %v4745_v32, 1 }
 0x159   : > { %4967 = vst [vmem:[#allocation13_spill] sm:$0xff] %v4704_v9  ;;  %v4706_v5 = vpop.f32.mrf.mxu1  ;;  %v1240_v9 = vadd.f32 %v1207_v24, %v4640_v55  ;;  %v1710_v19 = vadd.f32 %v3723_v49, %v1448_v54  ;;  %v4973_v54 = vld [vmem:[#allocation3_spill] sm:$0xff] }
 0x15a   : > { %4968 = vst [vmem:[#allocation14_spill] sm:$0xff] %v4706_v5  ;;  %v4708_v11 = vpop.f32.mrf.mxu0  ;;  %v1712_v10 = vadd.f32 %v1691_v4, %v1450_v16 }
 0x15b   : > { %4969 = vst [vmem:[#allocation15_spill] sm:$0xff] %v4708_v11  ;;  %v3807_v51 = vpop.f32.mrf.mxu1  ;;  %v1447_v11 = vadd.f32 %v4652_v12, %v1241_v6  ;;  %v1451_v12 = vadd.f32 %v4662_v20, %v1245_v48  ;;  %v4738_v20 = vpop.permute.xlu0 %2672 }
 0x15c   : > { %v3778_v14 = vpop.f32.mrf.mxu0  ;;  %vm2707_vm15 = vcmp.eq.s32.totalorder %v4738_v20, 1 }
 0x15d   : > { %v4710_v63 = vpop.f32.mrf.mxu1  ;;  %v1709_v47 = vadd.f32 %v3722_v43, %v1447_v11 }
 0x15e   : > { %4970 = vst [vmem:[#allocation16_spill] sm:$0xff] %v4710_v63  ;;  %v2059_v2 = vpop.f32.mrf.mxu0  ;;  %v1445_v63 = vadd.f32 %v4656_v44, %v1239_v8  ;;  %v1449_v44 = vadd.f32 %v4664_v25, %v1243_v45 }
 0x15f   : > { %v4712_v3 = vpop.f32.mrf.mxu1  ;;  %v1890_v61 = vadd.f32 %v3750_v38, %v1709_v47 }
 0x160   : > { %4971 = vst [vmem:[#allocation17_spill] sm:$0xff] %v4712_v3  ;;  %v3779_v62 = vpop.f32.mrf.mxu0  ;;  %v1446_v3 = vadd.f32 %v1413_v53, %v1240_v9  ;;  %v1707_v24 = vadd.f32 %v1672_v46, %v1445_v63  ;;  %v1891_v53 = vadd.f32 %v3751_v41, %v1710_v19  ;;  %v1713_v41 = vadd.f32 %v3726_v56, %v1451_v12 }
 0x161   : > { %v4718_v5 = vpop.f32.mrf.mxu1  ;;  %v2096_v33 = vadd.f32 %v3778_v14, %v1890_v61  ;;  %v1711_v43 = vadd.f32 %v1688_v59, %v1449_v44  ;;  %v1714_v46 = vadd.f32 %v3727_v60, %v1452_v58  ;;  %v4974_v59 = vld [vmem:[#allocation4_spill] sm:$0xff]  ;;  %v4976_v60 = vld [vmem:[#allocation6_spill] sm:$0xff] }
 0x162   : > { %v2062_v57 = vpop.f32.mrf.mxu0  ;;  %4972 = vst [vmem:[#allocation18_spill] sm:$0xff] %v4718_v5  ;;  %v1708_v5 = vadd.f32 %v1675_v52, %v1446_v3  ;;  %v1888_v15 = vadd.f32 %v4682_v39, %v1707_v24  ;;  %v2097_v38 = vadd.f32 %v3779_v62, %v1891_v53  ;;  %v1887_v39 = vadd.f32 %v4674_v31, %v1706_v23  ;;  %v4977_v3 = vld [vmem:[#allocation14_spill] sm:$0xff]  ;;  %v4982_v44 = vld [vmem:[#allocation15_spill] sm:$0xff] }
 0x163   : > { %v4726_v21 = vpop.f32.mrf.mxu1  ;;  %v2358_v49 = vadd.f32 %v3806_v22, %v2096_v33  ;;  %v1894_v56 = vadd.f32 %v4973_v54, %v1713_v41  ;;  %v1892_v62 = vadd.f32 %v4974_v59, %v1711_v43  ;;  %v1893_v28 = vadd.f32 %v4976_v60, %v1712_v10  ;;  %v4979_v22 = vld [vmem:[#allocation11_spill] sm:$0xff]  ;;  %v4985_v33 = vld [vmem:[#allocation9_spill] sm:$0xff] }
 0x164   : > { %v3782_v55 = vpop.f32.mrf.mxu0  ;;  %v1889_v27 = vadd.f32 %v1856_v42, %v1708_v5  ;;  %v2094_v48 = vadd.f32 %v2059_v2, %v1888_v15  ;;  %v1885_v42 = vadd.f32 %v4676_v34, %v1704_v29  ;;  %v2359_v52 = vadd.f32 %v3807_v51, %v2097_v38  ;;  %v4753_v2 = vpop.permute.xlu0 %2675  ;;  %v4980_v5 = vld [vmem:[#allocation12_spill] sm:$0xff]  ;;  %v4981_v51 = vld [vmem:[#allocation13_spill] sm:$0xff]  ;;  %v4983_v23 = vld [vmem:[#allocation7_spill] sm:$0xff] }
 0x165   : > { %v4740_v25 = vpop.f32.mrf.mxu1  ;;  %v4978_v6 = vld [vmem:[#allocation16_spill] sm:$0xff]  ;;  %v2092_v9 = vadd.f32 %v4979_v22, %v1886_v35  ;;  %v2090_v11 = vadd.f32 %v4980_v5, %v1884_v18  ;;  %v2093_v14 = vadd.f32 %v4981_v51, %v1887_v39  ;;  %v2100_v45 = vadd.f32 %v3782_v55, %v1894_v56  ;;  %v4778_v55 = vpop.permute.xlu1 %2681 }
 0x166   : > { %v2075_v0 = vpop.f32.mrf.mxu0  ;;  %v2095_v13 = vadd.f32 %v2062_v57, %v1889_v27  ;;  %v4975_v57 = vld [vmem:[#allocation5_spill] sm:$0xff]  ;;  %v2356_v4 = vadd.f32 %v4977_v3, %v2094_v48  ;;  %v2091_v58 = vadd.f32 %v4982_v44, %v1885_v42  ;;  %v4984_v15 = vld [vmem:[#allocation8_spill] sm:$0xff]  ;;  %v4987_v48 = vld [vmem:[#allocation10_spill] sm:$0xff]  ;;  %vm2708_vm0 = vcmp.eq.s32.totalorder %v4753_v2, 1 }
 0x167   : > { %v1895_v63 = vadd.f32 %v4975_v57, %v1714_v46  ;;  %v2098_v61 = vadd.f32 %v2075_v0, %v1892_v62  ;;  %v2354_v29 = vadd.f32 %v4983_v23, %v2092_v9  ;;  %v2352_v27 = vadd.f32 %v4984_v15, %v2090_v11  ;;  %v4986_v46 = vld [vmem:[#allocation17_spill] sm:$0xff] }
 0x168   : > { %v3783_v37 = vpop.f32.mrf.mxu0  ;;  %v2357_v31 = vadd.f32 %v4978_v6, %v2095_v13  ;;  %v2355_v38 = vadd.f32 %v4985_v33, %v2093_v14  ;;  %v4786_v41 = vpop.permute.xlu0 %2684  ;;  %v2362_v10 = vadd.f32 %v4986_v46, %v2100_v45  ;;  %v2353_v13 = vadd.f32 %v4987_v48, %v2091_v58 }
 0x169   : > { %v2101_v17 = vadd.f32 %v3783_v37, %v1895_v63  ;;  %v4988_v39 = vld [vmem:[#allocation18_spill] sm:$0xff]  ;;  %v4806_v56 = vpop.permute.xlu1 %2687  ;;  %vm2710_vm2 = vcmp.eq.s32.totalorder %v4778_v55, 1  ;;  %vm2711_vm3 = vcmp.eq.s32.totalorder %v4786_v41, 1 }
 0x16a   : > { %v2078_v7 = vpop.f32.mrf.mxu0  ;;  %v2360_v42 = vadd.f32 %v4988_v39, %v2098_v61  ;;  %vm2712_vm4 = vcmp.eq.s32.totalorder %v4806_v56, 1 }
 0x16b   : > { %v2099_v53 = vadd.f32 %v2078_v7, %v1893_v28  ;;  %v2363_v0 = vadd.f32 %v4726_v21, %v2101_v17 }
 0x16c   : > { %v4819_v28 = vpop.permute.xlu0 %2690 }
 0x16d   : > { %v4840_v9 = vpop.permute.xlu1 %2693  ;;  %vm2713_vm5 = vcmp.eq.s32.totalorder %v4819_v28, 1 }
 0x16e   : > { %vm2714_vm6 = vcmp.eq.s32.totalorder %v4840_v9, 1 }
 0x16f   : > { %v3834_v36 = vpop.f32.mrf.mxu1 }
 0x170   : > { %v4757_v34 = vadd.f32 %v3834_v36, %v2358_v49  ;;  %v2361_v49 = vadd.f32 %v4740_v25, %v2099_v53  ;;  %v4846_v51 = vpop.permute.xlu0 %2696 }
 0x171   : > { %v2502_v40 = vpop.f32.mrf.mxu1  ;;  %vm2715_vm7 = vcmp.eq.s32.totalorder %v4846_v51, 1 }
 0x172   : > { %v4771_v19 = vadd.f32 %v2502_v40, %v2356_v4 }
 0x173   : > { %v3835_v30 = vpop.f32.mrf.mxu1 }
 0x174   : > { %v4759_v8 = vadd.f32 %v3835_v30, %v2359_v52  ;;  %v3830_v47 = vpop.f32.mrf.mxu0  ;;  %v2723_v14 = vsel %vm2711_vm3, %v4771_v19, 0.0  ;;  %v4861_v58 = vpop.permute.xlu0 %2702 }
 0x175   : > { %v2505_v50 = vpop.f32.mrf.mxu1  ;;  %v4793_v37 = vadd.f32 %v3830_v47, %v2354_v29  ;;  %v2725_v47 = vsel %vm2713_vm5, %v4757_v34, 0.0  ;;  %vm2717_vm9 = vcmp.eq.s32.totalorder %v4861_v58, 1 }
 0x176   : > { %v3430_v24 = vpack.c.bf16 %v4759_v8, %v4757_v34  ;;  %v4775_v12 = vadd.f32 %v2505_v50, %v2357_v31  ;;  %v2486_v1 = vpop.f32.mrf.mxu0 }
 0x177   : > { %v3838_v16 = vpop.f32.mrf.mxu1  ;;  %v4795_v35 = vadd.f32 %v2486_v1, %v2352_v27  ;;  %v2721_v7 = vsel %vm2709_vm1, %v4793_v37, 0.0 }
 0x178   : > { %3459 = vst [vmem:[%s4769_s23 + $0x18] sm:$0xff] %v3430_v24   ;;  %v3425_v26 = vpack.c.bf16 %v4775_v12, %v4771_v19  ;;  %v3831_v36 = vpop.f32.mrf.mxu0  ;;  %v4801_v54 = vadd.f32 %v3838_v16, %v2362_v10  ;;  %v2724_v50 = vsel %vm2712_vm4, %v4775_v12, 0.0  ;;  %v4859_v24 = vpop.permute.xlu1 %2699  ;;  %v2726_v16 = vsel %vm2714_vm6, %v4759_v8, 0.0 }
 0x179   : > { %v2518_v43 = vpop.f32.mrf.mxu1  ;;  %v4797_v18 = vadd.f32 %v3831_v36, %v2355_v38  ;;  %v2719_v30 = vsel %vm2707_vm15, %v4795_v35, 0.0  ;;  %vm2716_vm8 = vcmp.eq.s32.totalorder %v4859_v24, 1  ;;  %v2752_v15 = vpop.permute.xlu0 %2751 }
 0x17a   : > { %3458 = vst [vmem:[%s4769_s23 + $0x10] sm:$0xff] %v3425_v26   ;;  %v2489_v52 = vpop.f32.mrf.mxu0  ;;  %v4813_v25 = vadd.f32 %v2518_v43, %v2360_v42  ;;  %v2729_v27 = vsel %vm2717_vm9, %v4801_v54, 0.0  ;;  %4009 = vrcp.f32 %v2752_v15 }
 0x17b   : > { %v3839_v40 = vpop.f32.mrf.mxu1  ;;  %v3420_v59 = vpack.c.bf16 %v4797_v18, %v4793_v37  ;;  %v4810_v62 = vadd.f32 %v2489_v52, %v2353_v13  ;;  %v2722_v5 = vsel %vm2710_vm2, %v4797_v18, 0.0 }
 0x17c   : > { %v4803_v21 = vadd.f32 %v3839_v40, %v2363_v0  ;;  %v2727_v53 = vsel %vm2715_vm7, %v4813_v25, 0.0  ;;  %v4871_v26 = vpop.permute.xlu1 %2705 }
 0x17d   : > { %v2521_v57 = vpop.f32.mrf.mxu1  ;;  %3457 = vst [vmem:[%s4769_s23 + $0x8] sm:$0xff] %v3420_v59   ;;  %v3415_v3 = vpack.c.bf16 %v4810_v62, %v4795_v35  ;;  %v2720_v4 = vsel %vm2708_vm0, %v4810_v62, 0.0  ;;  %vm2718_vm10 = vcmp.eq.s32.totalorder %v4871_v26, 1 }
 0x17e   : > { %v3440_v63 = vpack.c.bf16 %v4803_v21, %v4801_v54  ;;  %v4817_v60 = vadd.f32 %v2521_v57, %v2361_v49  ;;  %v2731_v6 = vadd.f32 %v2720_v4, %v2719_v30  ;;  %v2730_v38 = vsel %vm2718_vm10, %v4803_v21, 0.0 }
 0x17f   : > { %3416 = vst [vmem:[%s4769_s23] sm:$0xff] %v3415_v3  }
 0x180   : > { %3461 = vst [vmem:[%s4769_s23 + $0x28] sm:$0xff] %v3440_v63   ;;  %v3435_v31 = vpack.c.bf16 %v4817_v60, %v4813_v25  ;;  %v2732_v22 = vadd.f32 %v2731_v6, %v2721_v7  ;;  %v2728_v23 = vsel %vm2716_vm8, %v4817_v60, 0.0 }
 0x182   : > { %3460 = vst [vmem:[%s4769_s23 + $0x20] sm:$0xff] %v3435_v31   ;;  %v2733_v11 = vadd.f32 %v2732_v22, %v2722_v5 }
 0x184   : > { %v2734_v45 = vadd.f32 %v2733_v11, %v2723_v14 }
 0x186   : > { %v2735_v17 = vadd.f32 %v2734_v45, %v2724_v50 }
 0x187   : > { %v4010_v40 = vpop.eup %4009 }
 0x188   : > { %v2736_v44 = vadd.f32 %v2735_v17, %v2725_v47 }
 0x18a   : > { %v2737_v61 = vadd.f32 %v2736_v44, %v2726_v16 }
 0x18c   : > { %v2738_v1 = vadd.f32 %v2737_v61, %v2727_v53 }
 0x18e   : > { %v2739_v29 = vadd.f32 %v2738_v1, %v2728_v23 }
 0x190   : > { %v2740_v33 = vadd.f32 %v2739_v29, %v2729_v27 }
 0x192   : > { %v2741_v43 = vadd.f32 %v2740_v33, %v2730_v38 }
 0x194   : > { %v2742_v46 = vrot.slane %v2741_v43, 4 }
 0x196   : > { %v2743_v10 = vadd.f32 %v2742_v46, %v2741_v43 }
 0x198   : > { %v2744_v0 = vrot.slane %v2743_v10, 2 }
 0x19a   : > { %v2745_v36 = vadd.f32 %v2744_v0, %v2743_v10 }
 0x19c   : > { %v2746_v48 = vrot.slane %v2745_v36, 1 }
 0x19e   : > { %v2747_v13 = vadd.f32 %v2746_v48, %v2745_v36 }
 0x1a0   : > { %v2755_v39 = vmul.f32 %v4010_v40, %v2747_v13  ;;  %2780 = vst [vmem:[%s460_s13] sm:$0x1] %v2747_v13 }
 0x1a2   : > { %v2756_v42 = vsub.f32 %v4795_v35, %v2755_v39  ;;  %v2757_v49 = vsub.f32 %v4810_v62, %v2755_v39  ;;  %v2758_v52 = vsub.f32 %v4793_v37, %v2755_v39  ;;  %v2759_v59 = vsub.f32 %v4797_v18, %v2755_v39 }
 0x1a3   : > { %v2760_v57 = vsub.f32 %v4771_v19, %v2755_v39  ;;  %v2761_v63 = vsub.f32 %v4775_v12, %v2755_v39  ;;  %v2762_v30 = vsub.f32 %v4757_v34, %v2755_v39  ;;  %v2763_v3 = vsub.f32 %v4759_v8, %v2755_v39 }
 0x1a4   : > { %v2764_v4 = vsub.f32 %v4813_v25, %v2755_v39  ;;  %v2765_v6 = vsub.f32 %v4817_v60, %v2755_v39  ;;  %v2766_v35 = vsub.f32 %v4801_v54, %v2755_v39  ;;  %v2767_v62 = vsub.f32 %v4803_v21, %v2755_v39 }
 0x1a5   : > { %v2768_v37 = vsel %vm2707_vm15, %v2756_v42, 0.0  ;;  %v2769_v19 = vsel %vm2708_vm0, %v2757_v49, 0.0  ;;  %v2770_v12 = vsel %vm2709_vm1, %v2758_v52, 0.0  ;;  %v2771_v8 = vsel %vm2710_vm2, %v2759_v59, 0.0 }
 0x1a6   : > { %v2781_v34 = vmul.f32 %v2768_v37, %v2768_v37  ;;  %v2782_v18 = vmul.f32 %v2769_v19, %v2769_v19  ;;  %v2783_v25 = vmul.f32 %v2770_v12, %v2770_v12  ;;  %v2772_v54 = vsel %vm2711_vm3, %v2760_v57, 0.0 }
 0x1a7   : > { %v2784_v21 = vmul.f32 %v2771_v8, %v2771_v8  ;;  %v2773_v20 = vsel %vm2712_vm4, %v2761_v63, 0.0  ;;  %v2785_v2 = vmul.f32 %v2772_v54, %v2772_v54  ;;  %v2774_v32 = vsel %vm2713_vm5, %v2762_v30, 0.0 }
 0x1a8   : > { %v2793_v60 = vadd.f32 %v2782_v18, %v2781_v34  ;;  %v2786_v22 = vmul.f32 %v2773_v20, %v2773_v20  ;;  %v2775_v55 = vsel %vm2714_vm6, %v2763_v3, 0.0  ;;  %v2787_v11 = vmul.f32 %v2774_v32, %v2774_v32 }
 0x1a9   : > { %v2776_v41 = vsel %vm2715_vm7, %v2764_v4, 0.0  ;;  %v2788_v45 = vmul.f32 %v2775_v55, %v2775_v55  ;;  %v2777_v56 = vsel %vm2716_vm8, %v2765_v6, 0.0  ;;  %v2778_v28 = vsel %vm2717_vm9, %v2766_v35, 0.0 }
 0x1aa   : > { %v2794_v31 = vadd.f32 %v2793_v60, %v2783_v25  ;;  %v2789_v17 = vmul.f32 %v2776_v41, %v2776_v41  ;;  %v2790_v44 = vmul.f32 %v2777_v56, %v2777_v56  ;;  %v2779_v9 = vsel %vm2718_vm10, %v2767_v62, 0.0 }
 0x1ab   : > { %v2791_v61 = vmul.f32 %v2778_v28, %v2778_v28  ;;  %v2792_v51 = vmul.f32 %v2779_v9, %v2779_v9 }
 0x1ac   : > { %v2795_v7 = vadd.f32 %v2794_v31, %v2784_v21 }
 0x1ae   : > { %v2796_v5 = vadd.f32 %v2795_v7, %v2785_v2 }
 0x1b0   : > { %v2797_v14 = vadd.f32 %v2796_v5, %v2786_v22 }
 0x1b2   : > { %v2798_v50 = vadd.f32 %v2797_v14, %v2787_v11 }
 0x1b4   : > { %v2799_v47 = vadd.f32 %v2798_v50, %v2788_v45 }
 0x1b6   : > { %v2800_v16 = vadd.f32 %v2799_v47, %v2789_v17 }
 0x1b8   : > { %v2801_v53 = vadd.f32 %v2800_v16, %v2790_v44 }
 0x1ba   : > { %v2802_v1 = vadd.f32 %v2801_v53, %v2791_v61 }
 0x1bc   : > { %v2803_v23 = vadd.f32 %v2802_v1, %v2792_v51 }
 0x1be   : > { %v2804_v29 = vrot.slane %v2803_v23, 4 }
 0x1c0   : > { %v2805_v15 = vadd.f32 %v2804_v29, %v2803_v23 }
 0x1c2   : > { %v2806_v24 = vrot.slane %v2805_v15, 2 }
 0x1c4   : > { %v2807_v27 = vadd.f32 %v2806_v24, %v2805_v15 }
 0x1c6   : > { %v2808_v33 = vrot.slane %v2807_v27, 1 }
 0x1c8   : > { %v2809_v58 = vadd.f32 %v2808_v33, %v2807_v27 }
 0x1ca   : > { %2810 = vst [vmem:[%s467_s24] sm:$0x1] %v2809_v58 }
 0x1cb PF: > { %s19_s9 = sadd.s32 1, %s4051_s9   ;;  %s4989_s27 = smov %s4043_s29 }
 0x1cc   : > { %p16_p10 = scmp.ge.s32.totalorder %s19_s9, 8   ;;  %s4990_s28 = smov %s4047_s30 }
 0x1cd   : > { %s4991_s29 = smov %s4994_s10  ;;  %s4992_s30 = smov %s4998_s11 }
 0x1ce   :  { %18 = sbr.rel (!%p16_p10) target bundleno = 3 (0x3), region = 112 }

// kernel: conv_up_forward.3
= control target key start
LH: loop header
LB: loop body
LE: loop exit
PB: predicated region body
PF: predicated region fallthrough
CT: control target
= control target key end

     0   :  { %s3741_s21 = smov 0   ;;  %s3743_s22 = smov 0   ;;  %s4591_s0 = inlined_call_operand.vmem [shape: bf16[2,288,128], index: 0, kind: input, shape index: {}, may-alias: {0,1}]   ;;  %s4592_s1 = inlined_call_operand.vmem [shape: bf16[2,288,128], index: 1, kind: input, shape index: {}, may-alias: {0,1}]   ;;  %s4593_s2 = inlined_call_operand.vmem [shape: f32[288,1], index: 2, kind: input, shape index: {}]   ;;  %s4594_s3 = inlined_call_operand.vmem [shape: bf16[9,128,128], index: 3, kind: input, shape index: {}]   ;;  %s4595_s4 = inlined_call_operand.vmem [shape: bf16[2,288,128], index: 4, kind: output, shape index: {0}]   ;;  %s4596_s5 = inlined_call_operand.vmem [shape: f32[2,3,1,128], index: 5, kind: output, shape index: {1}]   ;;  %s4597_s6 = inlined_call_operand.vmem [shape: f32[2,3,1,128], index: 6, kind: output, shape index: {2}]  }
   0x1   :  { %s3745_s23 = smov 0   ;;  %s3747_s24 = smov 0  }
   0x2   :  { %s3749_s25 = smov 0  }
   0x3 LB: > { %s26_s26 = sadd.s32 1, %s3695_s23  ;;  %s29_s27 = sadd.s32 1, %s3699_s24  ;;  %s3703_s25 = sphi %s3749_s25, %s17_s25   ;;  %s3699_s24 = sphi %s3747_s24, %s4637_s24   ;;  %s3695_s23 = sphi %s3745_s23, %s4636_s23   ;;  %s3691_s22 = sphi %s3743_s22, %s4635_s22   ;;  %s3687_s21 = sphi %s3741_s21, %s4634_s21  }
   0x4   : > { %p27_p0 = scmp.ge.s32.totalorder %s26_s26, 3  ;;  %p2807_p1 = scmp.ge.s32.totalorder %s3703_s25, 1 }
   0x5   : > { %p286_p2 = scmp.lt.s32.totalorder %s3703_s25, 7 }
   0x6   : > { %s4639_s26 = smov (%p27_p0, %s26_s26), 0  ;;  %s4641_s27 = smov (!%p27_p0, %s29_s27), %s3699_s24 }
   0x7   : > { %p287_p3 = pnand %p2807_p1, %p286_p2  ;;  %p31_p4 = scmp.ge.s32.totalorder %s4641_s27, 2 }
   0x9   : > { %s4643_s27 = smov (%p31_p4, %s4641_s27), 0  ;;  %290 = sbr.rel (%p287_p3) target bundleno = 454 (0x1c6), region = 36 }
   0xe   : > { %v3555_v0 = vld [vmem:[%s4594_s3 + $0x78] sm:$0xff]   ;;  %s356_s30 = smul.u32 12, %s3687_s21  ;;  %p357_p5 = scmp.lt.s32.totalorder %s3691_s22, 1  ;;  %v3557_v2 = vld [vmem:[%s4594_s3 + $0x70] sm:$0xff]   ;;  %v3559_v4 = vld [vmem:[%s4594_s3 + $0x68] sm:$0xff]   ;;  %vm874_vm1 = vcmask 1046528  }
   0xf   : > { %v3556_v1 = vld [vmem:[%s4594_s3 + $0x38] sm:$0xff]   ;;  %3242 = vmatprep.subr.bf16.mxu0 %v3555_v0  ;;  %v3558_v3 = vld [vmem:[%s4594_s3 + $0x30] sm:$0xff]   ;;  %v3560_v5 = vld [vmem:[%s4594_s3 + $0x28] sm:$0xff]   ;;  %s3067_s18 = sshll.u32 %s3687_s21, 1  ;;  %vm530_vm0 = vsmask.f32 7424 }
  0x10   : > { %p359_p6 = scmp.lt.s32.totalorder %s356_s30, 35  ;;  %3270 = vmatprep.subr.bf16.mxu1 %v3556_v1  ;;  %3243 = vmatpush3.bf16.msra.mxu0 %v3555_v0  ;;  %s4645_s22 = smov (!%p357_p5, %s3691_s22), 1  ;;  %v3561_v6 = vld [vmem:[%s4594_s3 + $0x60] sm:$0xff]   ;;  %v3563_v8 = vld [vmem:[%s4594_s3 + $0x58] sm:$0xff]   ;;  %v3565_v10 = vld [vmem:[%s4594_s3 + $0x50] sm:$0xff]   ;;  %vm2405_vm2 = vcmask 7168  }
  0x11   : > { %3271 = vmatpush3.bf16.msra.mxu1 %v3556_v1  ;;  %3244 = vmatprep.subr.bf16.mxu0 %v3557_v2  ;;  %s3510_s17 = smul.u32 36, %s4645_s22  ;;  %s3068_s20 = sadd.s32 2, %s3067_s18  ;;  %v3562_v7 = vld [vmem:[%s4594_s3 + $0x20] sm:$0xff]   ;;  %v3564_v9 = vld [vmem:[%s4594_s3 + $0x18] sm:$0xff]   ;;  %v3566_v14 = vld [vmem:[%s4594_s3 + $0x10] sm:$0xff]  }
  0x12   : > { %s4647_s30 = smov (!%p359_p6, %s356_s30), 35  ;;  %3272 = vmatprep.subr.bf16.mxu1 %v3558_v3  ;;  %p368_p7 = scmp.lt.s32.totalorder %s3068_s20, 4  ;;  %v3567_v15 = vld [vmem:[%s4594_s3 + $0x48] sm:$0xff]   ;;  %v3569_v17 = vld [vmem:[%s4594_s3 + $0x40] sm:$0xff]   ;;  %v3574_v26 = vld [vmem:[%s4594_s3 + $0xb8] sm:$0xff]  }
  0x13   : > { %s3801_s19 = sadd.s32 %s3510_s17, %s4647_s30  ;;  %v3568_v16 = vld [vmem:[%s4594_s3 + $0x8] sm:$0xff]   ;;  %v3570_v18 = vld [vmem:[%s4594_s3] sm:$0xff]   ;;  %v3575_v31 = vld [vmem:[%s4594_s3 + $0xf8] sm:$0xff]   ;;  %s2811_s10 = sshll.u32 %s4647_s30, 3 }
  0x14   : > { %3245 = vmatpush3.bf16.msra.mxu0 %v3557_v2  ;;  %s2808_s9 = sshll.u32 %s3801_s19, 2  ;;  %s4649_s20 = smov (!%p368_p7, %s3068_s20), 4  ;;  %v3576_v39 = vld [vmem:[%s4594_s3 + $0xb0] sm:$0xff]   ;;  %v3578_v52 = vld [vmem:[%s4594_s3 + $0xa8] sm:$0xff]   ;;  %v3582_v57 = vld [vmem:[%s4594_s3 + $0xa0] sm:$0xff]  }
  0x15   : > { %3273 = vmatpush3.bf16.msra.mxu1 %v3558_v3  ;;  %3246 = vmatprep.subr.bf16.mxu0 %v3559_v4  ;;  %s3821_s16 = scalar_lea.vmem %s4591_s0, %s2808_s9  ;;  %s370_s18 = smul.u32 6, %s4649_s20  ;;  %v3577_v45 = vld [vmem:[%s4594_s3 + $0xf0] sm:$0xff]   ;;  %v3579_v54 = vld [vmem:[%s4594_s3 + $0xe8] sm:$0xff]   ;;  %v3583_v60 = vld [vmem:[%s4594_s3 + $0xe0] sm:$0xff]  }
  0x16   : > { %3274 = vmatprep.subr.bf16.mxu1 %v3560_v5  ;;  %v415_v11 = vld [vmem:[%s3821_s16] sm:$0xff]   ;;  %v417_v12 = vld [vmem:[%s3821_s16 + $0x8] sm:$0xff]   ;;  %v419_v13 = vld [vmem:[%s3821_s16 + $0x10] sm:$0xff]   ;;  %s4426_s7 = scalar_lea.vmem %s4595_s4, %s2808_s9  ;;  %p402_p9 = scmp.lt.s32.totalorder %s3687_s21, 2 }
  0x17   : > { %p373_p8 = scmp.lt.s32.totalorder %s370_s18, 35  ;;  %433 = vst [vmem:[#allocation2] sm:$0xff] %v415_v11   ;;  %435 = vst [vmem:[#allocation2 + $0x8] sm:$0xff] %v417_v12   ;;  %v421_v19 = vld [vmem:[%s3821_s16 + $0x18] sm:$0xff]   ;;  %v423_v20 = vld [vmem:[%s3821_s16 + $0x20] sm:$0xff]   ;;  %s3511_s19 = smul.u32 3, %s4645_s22 }
  0x18   : > { %3247 = vmatpush3.bf16.msra.mxu0 %v3559_v4  ;;  %437 = vst [vmem:[#allocation2 + $0x10] sm:$0xff] %v419_v13   ;;  %439 = vst [vmem:[#allocation2 + $0x18] sm:$0xff] %v421_v19   ;;  %v425_v48 = vld [vmem:[%s3821_s16 + $0x28] sm:$0xff]   ;;  %v3584_v1 = vld [vmem:[%s4594_s3 + $0x98] sm:$0xff]   ;;  %s4653_s21 = smov (!%p402_p9, %s3687_s21), 2 }
  0x19   : > { %3275 = vmatpush3.bf16.msra.mxu1 %v3560_v5  ;;  %3248 = vmatprep.subr.bf16.mxu0 %v3561_v6  ;;  %s4651_s18 = smov (!%p373_p8, %s370_s18), 35  ;;  %441 = vst [vmem:[#allocation2 + $0x20] sm:$0xff] %v423_v20   ;;  %443 = vst [vmem:[#allocation2 + $0x28] sm:$0xff] %v425_v48   ;;  %v3588_v13 = vld [vmem:[%s4594_s3 + $0x90] sm:$0xff]   ;;  %v3591_v19 = vld [vmem:[%s4594_s3 + $0xc8] sm:$0xff]   ;;  %v3705_v20 = vmov 0   ;;  %s4530_s9 = sadd.s32 %s3511_s19, %s4653_s21 }
  0x1a   : > { %3276 = vmatprep.subr.bf16.mxu1 %v3562_v7  ;;  %s376_s29 = sadd.s32 %s3510_s17, %s4651_s18  ;;  %3553 = vset.pattern.permute.xlu0 %v3705_v20  ;;  %s406_s8 = scalar_lea.vmem %s4596_s5, %s4530_s9 }
  0x1b   : > { %s2810_s20 = sshll.u32 %s376_s29, 2  ;;  %3554 = vset.pattern.permute.xlu1 %v3705_v20  ;;  %s4075_s29 = scalar_lea.vmem %s4593_s2, %s2811_s10 }
  0x1c   : > { %3249 = vmatpush3.bf16.msra.mxu0 %v3561_v6  ;;  %s3868_s12 = scalar_lea.vmem %s4592_s1, %s2810_s20  ;;  %s413_s17 = scalar_lea.vmem %s4597_s6, %s4530_s9 }
  0x1d   : > { %3277 = vmatpush3.bf16.msra.mxu1 %v3562_v7  ;;  %3250 = vmatprep.subr.bf16.mxu0 %v3563_v8  ;;  %v427_v49 = vld [vmem:[%s3868_s12] sm:$0xff]   ;;  %v3585_v7 = vld [vmem:[%s4594_s3 + $0xd8] sm:$0xff]  }
  0x1e   : > { %3278 = vmatprep.subr.bf16.mxu1 %v3564_v9  ;;  %v451_v21 = vld [vmem:[#allocation2] sm:$0xf]  ;;  %v3846_v22 = vld [vmem:[#allocation2 + $0x4] sm:$0xf]  ;;  %v3851_v24 = vld [vmem:[#allocation2 + $0x8] sm:$0xff]   ;;  %445 = vst [vmem:[#allocation2 + $0x30] sm:$0xff] %v427_v49  }
  0x1f   : > { %v2829_v23 = vcombine.low %v451_v21, %v3846_v22  ;;  %v3853_v25 = vld [vmem:[#allocation2 + $0x10] sm:$0xff]   ;;  %v539_v29 = vshll.u32 %v3851_v24, 16  ;;  %v543_v30 = vshrl.u32 %v3851_v24, 16  ;;  %v3873_v40 = vld [vmem:[#allocation2 + $0x18] sm:$0xff]   ;;  %v853_v61 = vld [vmem:[#allocation2] sm:$0xe] }
  0x20   : > { %3251 = vmatpush3.bf16.msra.mxu0 %v3563_v8  ;;  %v547_v32 = vshll.u32 %v3853_v25, 16  ;;  %v551_v33 = vshrl.u32 %v3853_v25, 16  ;;  %v3875_v42 = vld [vmem:[#allocation2 + $0x20] sm:$0xff]   ;;  %v555_v46 = vshll.u32 %v3873_v40, 16  ;;  %v559_v47 = vshrl.u32 %v3873_v40, 16  ;;  %v3904_v62 = vld [vmem:[#allocation2 + $0x28] sm:$0xff]  }
  0x21   : > { %3279 = vmatpush3.bf16.msra.mxu1 %v3564_v9  ;;  %3252 = vmatprep.subr.bf16.mxu0 %v3565_v10  ;;  %v532_v27 = vshrl.u32 %v2829_v23, 16  ;;  %v534_v28 = vshll.u32 %v2829_v23, 16  ;;  %v541_v35 = vrot.slane %v539_v29, 1  ;;  %v563_v50 = vshll.u32 %v3875_v42, 16  ;;  %v3592_v21 = vld [vmem:[%s4594_s3 + $0x80] sm:$0xff]  }
  0x22   : > { %3280 = vmatprep.subr.bf16.mxu1 %v3566_v14  ;;  %3286 = vmatprep.mubr.bf16.mxu1 %v2829_v23  ;;  %v549_v36 = vrot.slane %v547_v32, 1  ;;  %v557_v51 = vrot.slane %v555_v46, 1  ;;  %v567_v58 = vshrl.u32 %v3875_v42, 16  ;;  %v2868_v0 = vcombine.low %v853_v61, %v3846_v22  ;;  %v3593_v22 = vld [vmem:[%s4594_s3 + $0xc0] sm:$0xff]   ;;  %v1242_v32 = vld [vmem:[#allocation2 + $0xc] sm:$0xf] }
  0x23   : > { %v536_v34 = vrot.slane %v534_v28, 1  ;;  %v545_v38 = vor.u32 %v543_v30, %v541_v35  ;;  %v565_v53 = vrot.slane %v563_v50, 1  ;;  %v571_v3 = vshll.u32 %v3904_v62, 16  ;;  %v3599_v28 = vld [vmem:[%s4594_s3 + $0x130] sm:$0xff]   ;;  %v3606_v46 = vld [vmem:[%s4594_s3 + $0x160] sm:$0xff]  }
  0x24   : > { %3253 = vmatpush3.bf16.msra.mxu0 %v3565_v10  ;;  %v553_v41 = vor.u32 %v551_v33, %v549_v36  ;;  %v561_v56 = vor.u32 %v559_v47, %v557_v51  ;;  %v575_v4 = vshrl.u32 %v3904_v62, 16  ;;  %v876_v6 = vrot.slane %v3851_v24, 1  ;;  %v3600_v30 = vld [vmem:[%s4594_s3 + $0x170] sm:$0xff]   ;;  %v3603_v33 = vld [vmem:[#allocation2 + $0x18] sm:$0xff]   ;;  %v3609_v47 = vld [vmem:[#allocation2 + $0x28] sm:$0xff]  }
  0x25   : > { %3281 = vmatpush3.bf16.msra.mxu1 %v3566_v14  ;;  %3254 = vmatprep.subr.bf16.mxu0 %v3567_v15  ;;  %v537_v37 = vor.u32 %v536_v34, %v532_v27  ;;  %v550_v44 = vsel %vm530_vm0, %v545_v38, %v549_v36  ;;  %v3906_v63 = vld [vmem:[#allocation2 + $0x30] ss:$0 sps:$4 sm:$0x11]   ;;  %v569_v2 = vor.u32 %v567_v58, %v565_v53  ;;  %v573_v8 = vrot.slane %v571_v3, 1  ;;  %v3602_v38 = vld [vmem:[%s4594_s3 + $0x168] sm:$0xff]  }
  0x26   : > { %3282 = vmatprep.subr.bf16.mxu1 %v3568_v16  ;;  %v558_v55 = vsel %vm530_vm0, %v553_v41, %v557_v51  ;;  %v566_v59 = vsel %vm530_vm0, %v561_v56, %v565_v53  ;;  %v579_v5 = vshll.u32 %v3906_v63, 16  ;;  %v875_v10 = vrot.slane %v2868_v0, 1  ;;  %v3598_v27 = vld [vmem:[#allocation2 + $0x10] sm:$0xff]   ;;  %v3605_v41 = vld [vmem:[%s4594_s3 + $0x120] sm:$0xff]  }
  0x27   : > { %v542_v43 = vsel %vm530_vm0, %v537_v37, %v541_v35  ;;  %v574_v11 = vsel %vm530_vm0, %v569_v2, %v573_v8  ;;  %v577_v12 = vor.u32 %v575_v4, %v573_v8  ;;  %v878_v23 = vrot.slane %v3853_v25, 1  ;;  %v3601_v37 = vld [vmem:[%s4594_s3 + $0x128] sm:$0xff]   ;;  %v3610_v56 = vld [vmem:[#allocation2 + $0x30] sm:$0xff]   ;;  %v3619_v4 = vld [vmem:[#allocation2 + $0x18] sm:$0xff]  }
  0x28   : > { %3255 = vmatpush3.bf16.msra.mxu0 %v3567_v15  ;;  %3258 = vmatprep.mubr.bf16.mxu0 %v542_v43  ;;  %v581_v9 = vrot.slane %v579_v5, 1  ;;  %v3589_v15 = vld [vmem:[%s4594_s3 + $0xd0] sm:$0xff]   ;;  %v880_v29 = vrot.slane %v3873_v40, 1  ;;  %v882_v36 = vrot.slane %v3875_v42, 1  ;;  %v886_v53 = vrot.slane %v3906_v63, 1  ;;  %v429_v63 = vld [vmem:[%s3868_s12 + $0x8] sm:$0xff]  }
  0x29   : > { %3283 = vmatpush3.bf16.msra.mxu1 %v3568_v16  ;;  %3256 = vmatprep.subr.bf16.mxu0 %v3569_v17  ;;  %v3595_v16 = vld [vmem:[#allocation2 + $0x8] sm:$0xff]   ;;  %v3611_v58 = vld [vmem:[%s4594_s3 + $0x110] sm:$0xff]   ;;  %447 = vst [vmem:[#allocation2 + $0x38] sm:$0xff] %v429_v63  }
  0x2a   : > { %3284 = vmatprep.subr.bf16.mxu1 %v3570_v18  ;;  %v582_v14 = vsel %vm530_vm0, %v577_v12, %v581_v9  ;;  %v881_v34 = vsel %vm874_vm1, %v878_v23, %v880_v29  ;;  %v3612_v0 = vld [vmem:[%s4594_s3 + $0x150] sm:$0xff]   ;;  %v3614_v5 = vld [vmem:[%s4594_s3 + $0x148] sm:$0xff]   ;;  %v1320_v9 = vshll.u32 %v3619_v4, 16  ;;  %v1324_v12 = vshrl.u32 %v3619_v4, 16 }
  0x2c   : > { %3257 = vmatpush3.bf16.msra.mxu0 %v3569_v17  ;;  %v877_v17 = vsel %vm874_vm1, %v875_v10, %v876_v6  ;;  %v3616_v10 = vld [vmem:[%s4594_s3 + $0x140] sm:$0xff]  }
  0x2d   : > { %3285 = vmatpush3.bf16.msra.mxu1 %v3570_v18  ;;  %3298 = vmatprep.subr.bf16.mxu0 %v3574_v26  ;;  %v3590_v18 = vld [vmem:[%s4594_s3 + $0x88] sm:$0xff]  }
  0x2e   : > { %3326 = vmatprep.subr.bf16.mxu1 %v3575_v31 }
  0x2f   : > { %3259 = vmatmul.mubr.bf16.vlgmr.msra.gmra.mxu0 %v550_v44  ;;  %v1503_v44 = vld [vmem:[#allocation2 + $0x8] sm:$0xe] }
  0x30   : > { %3287 = vmatmul.mubr.bf16.vlgmr.msra.gmra.mxu1 %v3851_v24  ;;  %3299 = vmatpush3.bf16.msra.mxu0 %v3574_v26  ;;  %v3596_v24 = vld [vmem:[%s4594_s3 + $0x138] sm:$0xff]  }
  0x31   : > { %3327 = vmatpush3.bf16.msra.mxu1 %v3575_v31  ;;  %3300 = vmatprep.subr.bf16.mxu0 %v3576_v39  ;;  %v3597_v26 = vld [vmem:[%s4594_s3 + $0x178] sm:$0xff]   ;;  %v1241_v31 = vld [vmem:[#allocation2 + $0x8] sm:$0xf] }
  0x32   : > { %3328 = vmatprep.subr.bf16.mxu1 %v3577_v45  ;;  %3262 = vmatprep.mubr.bf16.mxu0 %v558_v55  ;;  %v2923_v35 = vcombine.low %v1241_v31, %v1242_v32  ;;  %v3608_v55 = vld [vmem:[%s4594_s3 + $0x158] sm:$0xff]   ;;  %v3624_v31 = vld [vmem:[%s4594_s3 + $0x1f0] sm:$0xff]  }
  0x33   : > { %3290 = vmatprep.mubr.bf16.mxu1 %v3853_v25  ;;  %v879_v25 = vsel %vm874_vm1, %v876_v6, %v878_v23  ;;  %v4004_v6 = vld [vmem:[#allocation2 + $0x20] sm:$0xff]  }
  0x34   : > { %3301 = vmatpush3.bf16.msra.mxu0 %v3576_v39  ;;  %v3604_v39 = vld [vmem:[#allocation2 + $0x20] sm:$0xff]   ;;  %v1307_v43 = vshll.u32 %v2923_v35, 16  ;;  %v1305_v48 = vshrl.u32 %v2923_v35, 16 }
  0x35   : > { %3329 = vmatpush3.bf16.msra.mxu1 %v3577_v45  ;;  %3302 = vmatprep.subr.bf16.mxu0 %v3578_v52  ;;  %v883_v45 = vsel %vm874_vm1, %v880_v29, %v882_v36 }
  0x36   : > { %3330 = vmatprep.subr.bf16.mxu1 %v3579_v54  ;;  %v1309_v50 = vrot.slane %v1307_v43, 1  ;;  %v3629_v43 = vld [vmem:[%s4594_s3 + $0x1a0] sm:$0xff]  }
  0x37   : > { %3263 = vmatmul.mubr.bf16.gmra.mxu0 %v566_v59 }
  0x38   : > { %3291 = vmatmul.mubr.bf16.gmra.mxu1 %v3873_v40  ;;  %3303 = vmatpush3.bf16.msra.mxu0 %v3578_v52  ;;  %v884_v40 = vrot.slane %v3904_v62, 1  ;;  %v2954_v52 = vcombine.low %v1503_v44, %v1242_v32  ;;  %v1310_v59 = vor.u32 %v1309_v50, %v1305_v48 }
  0x39   : > { %3331 = vmatpush3.bf16.msra.mxu1 %v3579_v54  ;;  %3304 = vmatprep.subr.bf16.mxu0 %v3582_v57  ;;  %v3607_v54 = vld [vmem:[%s4594_s3 + $0x118] sm:$0xff]  }
  0x3a   : > { %3332 = vmatprep.subr.bf16.mxu1 %v3583_v60  ;;  %3294 = vmatprep.mubr.bf16.mxu1 %v3875_v42  ;;  %v3972_v42 = vld [vmem:[#allocation2 + $0x10] sm:$0xff]   ;;  %v885_v49 = vsel %vm874_vm1, %v882_v36, %v884_v40  ;;  %v1524_v61 = vrot.slane %v2954_v52, 1  ;;  %v3627_v36 = vld [vmem:[%s4594_s3 + $0x1a8] sm:$0xff]  }
  0x3b   : > { %3266 = vmatprep.mubr.bf16.mxu0 %v574_v11  ;;  %v1312_v51 = vshll.u32 %v3972_v42, 16  ;;  %v1316_v8 = vshrl.u32 %v3972_v42, 16  ;;  %v4013_v11 = vld [vmem:[#allocation2 + $0x28] sm:$0xff]  }
  0x3c   : > { %3305 = vmatpush3.bf16.msra.mxu0 %v3582_v57  ;;  %v1525_v57 = vrot.slane %v3972_v42, 1  ;;  %v1340_v32 = vshrl.u32 %v4013_v11, 16  ;;  %v3628_v42 = vld [vmem:[%s4594_s3 + $0x1e8] sm:$0xff]  }
  0x3d   : > { %3333 = vmatpush3.bf16.msra.mxu1 %v3583_v60  ;;  %3306 = vmatprep.subr.bf16.mxu0 %v3584_v1  ;;  %v1314_v60 = vrot.slane %v1312_v51, 1 }
  0x3e   : > { %3334 = vmatprep.subr.bf16.mxu1 %v3585_v7  ;;  %v1526_v3 = vsel %vm874_vm1, %v1524_v61, %v1525_v57 }
  0x3f   : > { %3267 = vmatmul.mubr.bf16.gmra.mxu0 %v582_v14  ;;  %v1315_v2 = vsel %vm530_vm0, %v1310_v59, %v1314_v60  ;;  %v1318_v14 = vor.u32 %v1316_v8, %v1314_v60  ;;  %v3635_v8 = vld [vmem:[%s4594_s3 + $0x190] sm:$0xff]  }
  0x40   : > { %3295 = vmatmul.mubr.bf16.gmra.mxu1 %v3904_v62  ;;  %3307 = vmatpush3.bf16.msra.mxu0 %v3584_v1  ;;  %v887_v62 = vsel %vm874_vm1, %v884_v40, %v886_v53  ;;  %v3613_v1 = vld [vmem:[%s4594_s3 + $0x108] sm:$0xff]   ;;  %v3630_v53 = vld [vmem:[%s4594_s3 + $0x1e0] sm:$0xff]  }
  0x41   : > { %3335 = vmatpush3.bf16.msra.mxu1 %v3585_v7  ;;  %3308 = vmatprep.subr.bf16.mxu0 %v3588_v13  ;;  %v3615_v7 = vld [vmem:[%s4594_s3 + $0x100] sm:$0xff]  }
  0x42   : > { %3336 = vmatprep.subr.bf16.mxu1 %v3589_v15  ;;  %3314 = vmatprep.mubr.bf16.mxu0 %v877_v17  ;;  %v1527_v17 = vrot.slane %v3619_v4, 1 }
  0x43   : > { %3342 = vmatprep.mubr.bf16.mxu1 %v3595_v16  ;;  %v3621_v16 = vld [vmem:[%s4594_s3 + $0x1b8] sm:$0xff]  }
  0x44   : > { %3309 = vmatpush3.bf16.msra.mxu0 %v3588_v13  ;;  %v1328_v13 = vshll.u32 %v4004_v6, 16  ;;  %v1528_v29 = vsel %vm874_vm1, %v1525_v57, %v1527_v17  ;;  %v3634_v57 = vld [vmem:[%s4594_s3 + $0x1d8] sm:$0xff]  }
  0x45   : > { %3337 = vmatpush3.bf16.msra.mxu1 %v3589_v15  ;;  %3310 = vmatprep.subr.bf16.mxu0 %v3590_v18  ;;  %v1322_v15 = vrot.slane %v1320_v9, 1  ;;  %v3636_v9 = vld [vmem:[%s4594_s3 + $0x1d0] sm:$0xff]  }
  0x46   : > { %3338 = vmatprep.subr.bf16.mxu1 %v3591_v19 }
  0x47   : > { %v1326_v23 = vor.u32 %v1324_v12, %v1322_v15 }
  0x48   : > { %3311 = vmatpush3.bf16.msra.mxu0 %v3590_v18  ;;  %v3622_v18 = vld [vmem:[%s4594_s3 + $0x1f8] sm:$0xff]  }
  0x49   : > { %3339 = vmatpush3.bf16.msra.mxu1 %v3591_v19  ;;  %3312 = vmatprep.subr.bf16.mxu0 %v3592_v21  ;;  %v1332_v19 = vshrl.u32 %v4004_v6, 16 }
  0x4a   : > { %3340 = vmatprep.subr.bf16.mxu1 %v3593_v22 }
  0x4c   : > { %3313 = vmatpush3.bf16.msra.mxu0 %v3592_v21  ;;  %v1336_v21 = vshll.u32 %v4013_v11, 16 }
  0x4d   : > { %3341 = vmatpush3.bf16.msra.mxu1 %v3593_v22  ;;  %3354 = vmatprep.subr.bf16.mxu0 %v3596_v24  ;;  %v4024_v22 = vld [vmem:[#allocation2 + $0x30] sm:$0xff]  }
  0x4e   : > { %3382 = vmatprep.subr.bf16.mxu1 %v3597_v26  ;;  %v1338_v40 = vrot.slane %v1336_v21, 1  ;;  %v1348_v51 = vshrl.u32 %v4024_v22, 16  ;;  %v3637_v21 = vld [vmem:[%s4594_s3 + $0x188] sm:$0xff]  }
  0x4f   : > { %3315 = vmatmul.mubr.bf16.vlgmr.msra.gmra.mxu0 %v879_v25  ;;  %v4029_v25 = vld [vmem:[#allocation2 + $0x14] sm:$0xf] }
  0x50   : > { %3343 = vmatmul.mubr.bf16.vlgmr.msra.gmra.mxu1 %v3598_v27  ;;  %3355 = vmatpush3.bf16.msra.mxu0 %v3596_v24  ;;  %v1330_v24 = vrot.slane %v1328_v13, 1  ;;  %v1890_v27 = vld [vmem:[#allocation2 + $0x10] sm:$0xf]  ;;  %v1342_v44 = vor.u32 %v1340_v32, %v1338_v40 }
  0x51   : > { %3383 = vmatpush3.bf16.msra.mxu1 %v3597_v26  ;;  %3356 = vmatprep.subr.bf16.mxu0 %v3599_v28  ;;  %v1529_v26 = vrot.slane %v4004_v6, 1  ;;  %v2394_v6 = vld [vmem:[%s4075_s29 + $0x8] sm:$0xff]  ;;  %v4114_v32 = vld [vmem:[%s4075_s29 + $0x30] sm:$0xff] }
  0x52   : > { %3384 = vmatprep.subr.bf16.mxu1 %v3600_v30  ;;  %3318 = vmatprep.mubr.bf16.mxu0 %v881_v34  ;;  %v3632_v34 = vld [vmem:[#allocation2 + $0x38] ss:$0 sps:$4 sm:$0x11]   ;;  %v1331_v35 = vsel %vm530_vm0, %v1326_v23, %v1330_v24  ;;  %v2407_v12 = vsel %vm2405_vm2, %v2394_v6, 0.0  ;;  %vm2436_vm5 = vcmp.gt.f32.partialorder %v2394_v6, 0.0  ;;  %vm2441_vm9 = vcmp.gt.f32.partialorder %v4114_v32, 0.0 }
  0x53   : > { %3346 = vmatprep.mubr.bf16.mxu1 %v3603_v33  ;;  %v1344_v33 = vshll.u32 %v4024_v22, 16  ;;  %v1352_v52 = vshll.u32 %v3632_v34, 16  ;;  %v1535_v63 = vrot.slane %v3632_v34, 1  ;;  %v2448_v34 = vsel %vm2436_vm5, 1, %v3705_v20  ;;  %v3648_v6 = vld [vmem:[#allocation2 + $0x20] sm:$0xff]  }
  0x54   : > { %3357 = vmatpush3.bf16.msra.mxu0 %v3599_v28  ;;  %v1323_v28 = vsel %vm530_vm0, %v1318_v14, %v1322_v15 }
  0x55   : > { %3385 = vmatpush3.bf16.msra.mxu1 %v3600_v30  ;;  %3358 = vmatprep.subr.bf16.mxu0 %v3601_v37  ;;  %v3623_v30 = vld [vmem:[%s4594_s3 + $0x1b0] sm:$0xff]  }
  0x56   : > { %3386 = vmatprep.subr.bf16.mxu1 %v3602_v38 }
  0x57   : > { %3319 = vmatmul.mubr.bf16.gmra.mxu0 %v883_v45  ;;  %v1346_v45 = vrot.slane %v1344_v33, 1 }
  0x58   : > { %3347 = vmatmul.mubr.bf16.gmra.mxu1 %v3604_v39  ;;  %3359 = vmatpush3.bf16.msra.mxu0 %v3601_v37  ;;  %v1530_v37 = vsel %vm874_vm1, %v1527_v17, %v1529_v26  ;;  %v1334_v39 = vor.u32 %v1332_v19, %v1330_v24  ;;  %v2396_v17 = vld [vmem:[%s4075_s29 + $0x18] sm:$0xff] }
  0x59   : > { %3387 = vmatpush3.bf16.msra.mxu1 %v3602_v38  ;;  %3360 = vmatprep.subr.bf16.mxu0 %v3605_v41  ;;  %v3009_v38 = vcombine.low %v1890_v27, %v4029_v25  ;;  %v1350_v61 = vor.u32 %v1348_v51, %v1346_v45  ;;  %v2411_v27 = vsel %vm2405_vm2, %v2396_v17, 0.0  ;;  %vm2438_vm6 = vcmp.gt.f32.partialorder %v2396_v17, 0.0 }
  0x5a   : > { %3388 = vmatprep.subr.bf16.mxu1 %v3606_v46  ;;  %3322 = vmatprep.mubr.bf16.mxu0 %v885_v49  ;;  %v1339_v49 = vsel %vm530_vm0, %v1334_v39, %v1338_v40  ;;  %v2400_v40 = vld [vmem:[%s4075_s29 + $0x38] sm:$0xff] }
  0x5b   : > { %3350 = vmatprep.mubr.bf16.mxu1 %v3609_v47  ;;  %v4053_v47 = vld [vmem:[#allocation2 + $0x18] sm:$0xff]   ;;  %v1956_v48 = vshll.u32 %v3009_v38, 16  ;;  %vm2442_vm10 = vcmp.gt.f32.partialorder %v2400_v40, 0.0 }
  0x5c   : > { %3361 = vmatpush3.bf16.msra.mxu0 %v3605_v41  ;;  %v1531_v41 = vrot.slane %v4013_v11, 1  ;;  %v1961_v60 = vshll.u32 %v4053_v47, 16 }
  0x5d   : > { %3389 = vmatpush3.bf16.msra.mxu1 %v3606_v46  ;;  %3362 = vmatprep.subr.bf16.mxu0 %v3607_v54  ;;  %v1533_v46 = vrot.slane %v4024_v22, 1  ;;  %v1958_v59 = vrot.slane %v1956_v48, 1  ;;  %v3638_v22 = vld [vmem:[%s4594_s3 + $0x1c8] sm:$0xff]   ;;  %v4136_v48 = vld [vmem:[%s4075_s29 + $0x40] sm:$0xff] }
  0x5e   : > { %3390 = vmatprep.subr.bf16.mxu1 %v3608_v55  ;;  %v1532_v50 = vsel %vm874_vm1, %v1529_v26, %v1531_v41  ;;  %vm2443_vm11 = vcmp.gt.f32.partialorder %v4136_v48, 0.0 }
  0x5f   : > { %3323 = vmatmul.mubr.bf16.gmra.mxu0 %v887_v62  ;;  %v1354_v62 = vrot.slane %v1352_v52, 1  ;;  %v1536_v4 = vsel %vm874_vm1, %v1533_v46, %v1535_v63  ;;  %v2419_v52 = vsel %vm2405_vm2, %v2400_v40, 0.0  ;;  %v4155_v63 = vld [vmem:[%s4075_s29 + $0x50] sm:$0xff]  ;;  %v2455_v40 = vsel %vm2443_vm11, 1, %v3705_v20 }
  0x60   : > { %3351 = vmatmul.mubr.bf16.gmra.mxu1 %v3610_v56  ;;  %3363 = vmatpush3.bf16.msra.mxu0 %v3607_v54  ;;  %v1954_v54 = vshrl.u32 %v3009_v38, 16  ;;  %v3633_v56 = vld [vmem:[%s4594_s3 + $0x198] sm:$0xff]   ;;  %vm2445_vm13 = vcmp.gt.f32.partialorder %v4155_v63, 0.0 }
  0x61   : > { %3391 = vmatpush3.bf16.msra.mxu1 %v3608_v55  ;;  %3364 = vmatprep.subr.bf16.mxu0 %v3611_v58  ;;  %v1347_v55 = vsel %vm530_vm0, %v1342_v44, %v1346_v45 }
  0x62   : > { %3392 = vmatprep.subr.bf16.mxu1 %v3612_v0  ;;  %3370 = vmatprep.mubr.bf16.mxu0 %v1315_v2  ;;  %v4077_v2 = vrot.slane %v1961_v60, 1 }
  0x63   : > { %3398 = vmatprep.mubr.bf16.mxu1 %v1526_v3  ;;  %v1355_v3 = vsel %vm530_vm0, %v1350_v61, %v1354_v62  ;;  %v4152_v61 = vld [vmem:[#allocation2 + $0x38] sm:$0xff]  }
  0x64   : > { %3365 = vmatpush3.bf16.msra.mxu0 %v3611_v58  ;;  %v1534_v58 = vsel %vm874_vm1, %v1531_v41, %v1533_v46  ;;  %v4128_v41 = vld [vmem:[#allocation2 + $0x30] sm:$0xff]  }
  0x65   : > { %3393 = vmatpush3.bf16.msra.mxu1 %v3612_v0  ;;  %3366 = vmatprep.subr.bf16.mxu0 %v3613_v1  ;;  %v431_v0 = vld [vmem:[%s3868_s12 + $0x10] sm:$0xf] }
  0x66   : > { %3394 = vmatprep.subr.bf16.mxu1 %v3614_v5  ;;  %449 = vst [vmem:[#allocation2 + $0x40] sm:$0xf] %v431_v0 }
  0x68   : > { %3367 = vmatpush3.bf16.msra.mxu0 %v3613_v1  ;;  %v1959_v1 = vor.u32 %v1958_v59, %v1954_v54 }
  0x69   : > { %3395 = vmatpush3.bf16.msra.mxu1 %v3614_v5  ;;  %3368 = vmatprep.subr.bf16.mxu0 %v3615_v7  ;;  %v2393_v5 = vld [vmem:[%s4075_s29] sm:$0xff] }
  0x6a   : > { %3396 = vmatprep.subr.bf16.mxu1 %v3616_v10  ;;  %vm2435_vm3 = vcmp.gt.f32.partialorder %v2393_v5, 0.0  ;;  %v2406_v11 = vsel %vm2405_vm2, %v2393_v5, 0.0  ;;  %v1964_v13 = vsel %vm530_vm0, %v1959_v1, %v4077_v2 }
  0x6b   : > { %v2408_v14 = vadd.f32 %v2407_v12, %v2406_v11  ;;  %v2447_v19 = vsel %vm2435_vm3, 1, %v3705_v20  ;;  %v1993_v11 = vshll.u32 %v4152_v61, 16 }
  0x6c   : > { %3369 = vmatpush3.bf16.msra.mxu0 %v3615_v7  ;;  %v2395_v7 = vld [vmem:[%s4075_s29 + $0x10] sm:$0xff]  ;;  %2460 = vperm.xlu0 %3553, %v2447_v19   ;;  %v3650_v19 = vld [vmem:[%s4594_s3 + $0x228] sm:$0xff]  }
  0x6d   : > { %3397 = vmatpush3.bf16.msra.mxu1 %v3616_v10  ;;  %3410 = vmatprep.subr.bf16.mxu0 %v3621_v16  ;;  %v3641_v10 = vld [vmem:[#allocation2 + $0x10] sm:$0xff]   ;;  %vm2437_vm4 = vcmp.gt.f32.partialorder %v2395_v7, 0.0  ;;  %v2409_v15 = vsel %vm2405_vm2, %v2395_v7, 0.0 }
  0x6e   : > { %3438 = vmatprep.subr.bf16.mxu1 %v3622_v18  ;;  %v2449_v23 = vsel %vm2437_vm4, 1, %v3705_v20  ;;  %v2410_v24 = vadd.f32 %v2409_v15, %v2408_v14  ;;  %v4173_v14 = vld [vmem:[#allocation2 + $0x40] ss:$0 sps:$4 sm:$0x11]   ;;  %v2453_v15 = vsel %vm2441_vm9, 1, %v3705_v20 }
  0x6f   : > { %3371 = vmatmul.mubr.bf16.vlgmr.msra.gmra.mxu0 %v1323_v28  ;;  %v2398_v28 = vld [vmem:[%s4075_s29 + $0x28] sm:$0xff]  ;;  %2466 = vperm.xlu1 %3554, %v2449_v23  }
  0x70   : > { %3399 = vmatmul.mubr.bf16.vlgmr.msra.gmra.mxu1 %v1528_v29  ;;  %3411 = vmatpush3.bf16.msra.mxu0 %v3621_v16  ;;  %v2397_v16 = vld [vmem:[%s4075_s29 + $0x20] sm:$0xff]  ;;  %v1965_v29 = vshrl.u32 %v4053_v47, 16  ;;  %v2415_v38 = vsel %vm2405_vm2, %v2398_v28, 0.0  ;;  %vm2440_vm8 = vcmp.gt.f32.partialorder %v2398_v28, 0.0  ;;  %v1997_v28 = vshrl.u32 %v4152_v61, 16 }
  0x71   : > { %3439 = vmatpush3.bf16.msra.mxu1 %v3622_v18  ;;  %3412 = vmatprep.subr.bf16.mxu0 %v3623_v30  ;;  %v4097_v18 = vld [vmem:[#allocation2 + $0x20] sm:$0xff]   ;;  %v2413_v26 = vsel %vm2405_vm2, %v2397_v16, 0.0  ;;  %vm2439_vm7 = vcmp.gt.f32.partialorder %v2397_v16, 0.0  ;;  %v2452_v51 = vsel %vm2440_vm8, 1, %v3705_v20  ;;  %v2454_v16 = vsel %vm2442_vm10, 1, %v3705_v20 }
  0x72   : > { %3440 = vmatprep.subr.bf16.mxu1 %v3624_v31  ;;  %3374 = vmatprep.mubr.bf16.mxu0 %v1331_v35  ;;  %v1969_v33 = vshll.u32 %v4097_v18, 16  ;;  %v2450_v35 = vsel %vm2438_vm6, 1, %v3705_v20  ;;  %v1973_v44 = vshrl.u32 %v4097_v18, 16 }
  0x73   : > { %3402 = vmatprep.mubr.bf16.mxu1 %v1530_v37  ;;  %v3640_v37 = vld [vmem:[%s4594_s3 + $0x1c0] sm:$0xff]   ;;  %2463 = vperm.xlu0 %3553, %v2448_v34   ;;  %v3654_v34 = vld [vmem:[#allocation2 + $0x30] sm:$0xff]  }
  0x74   : > { %3413 = vmatpush3.bf16.msra.mxu0 %v3623_v30  ;;  %v4111_v30 = vld [vmem:[#allocation2 + $0x28] sm:$0xff]   ;;  %2469 = vperm.xlu1 %3554, %v2450_v35  }
  0x75   : > { %3441 = vmatpush3.bf16.msra.mxu1 %v3624_v31  ;;  %3414 = vmatprep.subr.bf16.mxu0 %v3627_v36  ;;  %v2412_v31 = vadd.f32 %v2411_v27, %v2410_v24  ;;  %v1977_v45 = vshll.u32 %v4111_v30, 16  ;;  %v1981_v1 = vshrl.u32 %v4111_v30, 16  ;;  %v1995_v24 = vrot.slane %v1993_v11, 1 }
  0x76   : > { %3442 = vmatprep.subr.bf16.mxu1 %v3628_v42 }
  0x77   : > { %3375 = vmatmul.mubr.bf16.gmra.mxu0 %v1339_v49  ;;  %v2414_v39 = vadd.f32 %v2413_v26, %v2412_v31  ;;  %v1971_v49 = vrot.slane %v1969_v33, 1  ;;  %v1979_v60 = vrot.slane %v1977_v45, 1  ;;  %v2152_v31 = vld [vmem:[#allocation2 + $0x10] sm:$0xe]  ;;  %v3655_v45 = vld [vmem:[#allocation2 + $0x38] sm:$0xff]  }
  0x78   : > { %3403 = vmatmul.mubr.bf16.gmra.mxu1 %v1532_v50  ;;  %3415 = vmatpush3.bf16.msra.mxu0 %v3627_v36  ;;  %v3639_v36 = vld [vmem:[%s4594_s3 + $0x180] sm:$0xff]   ;;  %v2451_v50 = vsel %vm2439_vm7, 1, %v3705_v20 }
  0x79   : > { %3443 = vmatpush3.bf16.msra.mxu1 %v3628_v42  ;;  %3416 = vmatprep.subr.bf16.mxu0 %v3629_v43  ;;  %v2417_v42 = vsel %vm2405_vm2, %v4114_v32, 0.0  ;;  %v2416_v46 = vadd.f32 %v2415_v38, %v2414_v39  ;;  %v1975_v59 = vor.u32 %v1973_v44, %v1971_v49  ;;  %v3653_v32 = vld [vmem:[%s4594_s3 + $0x220] sm:$0xff]   ;;  %v1999_v38 = vor.u32 %v1997_v28, %v1995_v24 }
  0x7a   : > { %3444 = vmatprep.subr.bf16.mxu1 %v3630_v53  ;;  %3378 = vmatprep.mubr.bf16.mxu0 %v1347_v55  ;;  %v4147_v55 = vld [vmem:[%s4075_s29 + $0x48] sm:$0xff] }
  0x7b   : > { %3406 = vmatprep.mubr.bf16.mxu1 %v1534_v58  ;;  %v2418_v54 = vadd.f32 %v2417_v42, %v2416_v46  ;;  %v3642_v58 = vld [vmem:[#allocation2 + $0x18] sm:$0xff]   ;;  %2472 = vperm.xlu0 %3553, %v2451_v50   ;;  %vm2444_vm12 = vcmp.gt.f32.partialorder %v4147_v55, 0.0 }
  0x7c   : > { %3417 = vmatpush3.bf16.msra.mxu0 %v3629_v43  ;;  %v1967_v43 = vor.u32 %v1965_v29, %v4077_v2  ;;  %2475 = vperm.xlu1 %3554, %v2452_v51   ;;  %v2423_v2 = vsel %vm2405_vm2, %v4147_v55, 0.0  ;;  %v2001_v29 = vshll.u32 %v4173_v14, 16  ;;  %v2456_v42 = vsel %vm2444_vm12, 1, %v3705_v20 }
  0x7d   : > { %3445 = vmatpush3.bf16.msra.mxu1 %v3630_v53  ;;  %3418 = vmatprep.subr.bf16.mxu0 %v3633_v56  ;;  %v3645_v53 = vld [vmem:[%s4594_s3 + $0x238] sm:$0xff]   ;;  %v2420_v62 = vadd.f32 %v2419_v52, %v2418_v54  ;;  %v3659_v52 = vld [vmem:[%s4594_s3 + $0x210] sm:$0xff]   ;;  %v2457_v54 = vsel %vm2445_vm13, 1, %v3705_v20 }
  0x7e   : > { %3446 = vmatprep.subr.bf16.mxu1 %v3634_v57  ;;  %v1972_v0 = vsel %vm530_vm0, %v1967_v43, %v1971_v49  ;;  %v2003_v39 = vrot.slane %v2001_v29, 1  ;;  %v3656_v43 = vld [vmem:[%s4594_s3 + $0x218] sm:$0xff]   ;;  %v2178_v49 = vrot.slane %v4111_v30, 1 }
  0x7f   : > { %3379 = vmatmul.mubr.bf16.gmra.mxu0 %v1355_v3  ;;  %v3647_v3 = vld [vmem:[%s4594_s3 + $0x230] sm:$0xff]   ;;  %2478 = vperm.xlu0 %3553, %v2453_v15  }
  0x80   : > { %3407 = vmatmul.mubr.bf16.gmra.mxu1 %v1536_v4  ;;  %3419 = vmatpush3.bf16.msra.mxu0 %v3633_v56  ;;  %v1985_v56 = vshll.u32 %v4128_v41, 16  ;;  %v4166_v4 = vld [vmem:[%s4075_s29 + $0x58] sm:$0xff]  ;;  %v2004_v51 = vsel %vm530_vm0, %v1999_v38, %v2003_v39 }
  0x81   : > { %3447 = vmatpush3.bf16.msra.mxu1 %v3634_v57  ;;  %3420 = vmatprep.subr.bf16.mxu0 %v3635_v8  ;;  %v2421_v57 = vsel %vm2405_vm2, %v4136_v48, 0.0  ;;  %v2427_v17 = vsel %vm2405_vm2, %v4166_v4, 0.0  ;;  %v2176_v48 = vrot.slane %v4097_v18, 1  ;;  %vm2446_vm14 = vcmp.gt.f32.partialorder %v4166_v4, 0.0 }
  0x82   : > { %3448 = vmatprep.subr.bf16.mxu1 %v3636_v9  ;;  %3426 = vmatprep.mubr.bf16.mxu0 %v3641_v10  ;;  %v2422_v5 = vadd.f32 %v2421_v57, %v2420_v62  ;;  %v1987_v7 = vrot.slane %v1985_v56, 1  ;;  %v1989_v10 = vshrl.u32 %v4128_v41, 16  ;;  %v2458_v55 = vsel %vm2446_vm14, 1, %v3705_v20  ;;  %v3660_v56 = vld [vmem:[%s4594_s3 + $0x208] sm:$0xff]  }
  0x83   : > { %3454 = vmatprep.mubr.bf16.mxu1 %v1964_v13  ;;  %v1983_v13 = vor.u32 %v1981_v1, %v1979_v60  ;;  %2481 = vperm.xlu1 %3554, %v2454_v16   ;;  %v2179_v30 = vsel %vm874_vm1, %v2176_v48, %v2178_v49  ;;  %v2180_v20 = vrot.slane %v4128_v41, 1 }
  0x84   : > { %3421 = vmatpush3.bf16.msra.mxu0 %v3635_v8  ;;  %v2425_v8 = vsel %vm2405_vm2, %v4155_v63, 0.0  ;;  %v2424_v12 = vadd.f32 %v2423_v2, %v2422_v5  ;;  %v1991_v23 = vor.u32 %v1989_v10, %v1987_v7  ;;  %2484 = vperm.xlu0 %3553, %v2455_v40  }
  0x85   : > { %3449 = vmatpush3.bf16.msra.mxu1 %v3636_v9  ;;  %3422 = vmatprep.subr.bf16.mxu0 %v3637_v21  ;;  %v1980_v9 = vsel %vm530_vm0, %v1975_v59, %v1979_v60  ;;  %v1988_v27 = vsel %vm530_vm0, %v1983_v13, %v1987_v7  ;;  %v2182_v59 = vrot.slane %v4152_v61, 1  ;;  %v2181_v62 = vsel %vm874_vm1, %v2178_v49, %v2180_v20 }
  0x86   : > { %3450 = vmatprep.subr.bf16.mxu1 %v3638_v22  ;;  %v1996_v35 = vsel %vm530_vm0, %v1991_v23, %v1995_v24 }
  0x87   : > { %2487 = vperm.xlu1 %3554, %v2456_v42   ;;  %v2183_v63 = vsel %vm874_vm1, %v2180_v20, %v2182_v59 }
  0x88   : > { %3423 = vmatpush3.bf16.msra.mxu0 %v3637_v21  ;;  %v2426_v21 = vadd.f32 %v2425_v8, %v2424_v12  ;;  %2490 = vperm.xlu0 %3553, %v2457_v54  }
  0x89   : > { %3451 = vmatpush3.bf16.msra.mxu1 %v3638_v22  ;;  %3424 = vmatprep.subr.bf16.mxu0 %v3639_v36  ;;  %v3649_v22 = vld [vmem:[#allocation2 + $0x28] sm:$0xff]  }
  0x8a   : > { %3452 = vmatprep.subr.bf16.mxu1 %v3640_v37  ;;  %v2428_v26 = vadd.f32 %v2427_v17, %v2426_v21 }
  0x8b   : > { %2493 = vperm.xlu1 %3554, %v2458_v55  }
  0x8c   : > { %3425 = vmatpush3.bf16.msra.mxu0 %v3639_v36  ;;  %v2429_v33 = vrot.slane %v2428_v26, 4  ;;  %v3040_v36 = vcombine.low %v2152_v31, %v4029_v25  ;;  %v2174_v25 = vrot.slane %v4053_v47, 1 }
  0x8d   : > { %3453 = vmatpush3.bf16.msra.mxu1 %v3640_v37  ;;  %3466 = vmatprep.subr.bf16.mxu0 %v3645_v53 }
  0x8e   : > { %3494 = vmatprep.subr.bf16.mxu1 %v3645_v53  ;;  %v2430_v37 = vadd.f32 %v2429_v33, %v2428_v26  ;;  %v2173_v46 = vrot.slane %v3040_v36, 1  ;;  %v2177_v60 = vsel %vm874_vm1, %v2174_v25, %v2176_v48 }
  0x8f   : > { %3427 = vmatmul.mubr.bf16.vlgmr.msra.gmra.mxu0 %v3642_v58  ;;  %v3661_v58 = vld [vmem:[%s4594_s3 + $0x200] sm:$0xff]  }
  0x90   : > { %3455 = vmatmul.mubr.bf16.vlgmr.msra.gmra.mxu1 %v1972_v0  ;;  %3467 = vmatpush3.bf16.msra.mxu0 %v3645_v53  ;;  %v2431_v44 = vrot.slane %v2430_v37, 2  ;;  %v2175_v18 = vsel %vm874_vm1, %v2173_v46, %v2174_v25  ;;  %v2184_v0 = vrot.slane %v4173_v14, 1 }
  0x91   : > { %3502 = vmatpush3.bf16.msra.mxu1 %v3645_v53  ;;  %3468 = vmatprep.subr.bf16.mxu0 %v3647_v3 }
  0x92   : > { %3495 = vmatprep.subr.bf16.mxu1 %v3647_v3  ;;  %3430 = vmatprep.mubr.bf16.mxu0 %v3648_v6  ;;  %v2432_v50 = vadd.f32 %v2431_v44, %v2430_v37  ;;  %v2185_v1 = vsel %vm874_vm1, %v2182_v59, %v2184_v0 }
  0x93   : > { %3458 = vmatprep.mubr.bf16.mxu1 %v1980_v9 }
  0x94   : > { %3469 = vmatpush3.bf16.msra.mxu0 %v3647_v3  ;;  %v2433_v47 = vrot.slane %v2432_v50, 1 }
  0x95   : > { %3503 = vmatpush3.bf16.msra.mxu1 %v3647_v3  ;;  %3470 = vmatprep.subr.bf16.mxu0 %v3650_v19 }
  0x96   : > { %3496 = vmatprep.subr.bf16.mxu1 %v3650_v19  ;;  %v2434_v53 = vadd.f32 %v2433_v47, %v2432_v50 }
  0x97   : > { %3431 = vmatmul.mubr.bf16.gmra.mxu0 %v3649_v22 }
  0x98   : > { %3459 = vmatmul.mubr.bf16.gmra.mxu1 %v1988_v27  ;;  %3471 = vmatpush3.bf16.msra.mxu0 %v3650_v19  ;;  %v2536_v57 = vmax.f32 %v2434_v53, 1.0 }
  0x99   : > { %3504 = vmatpush3.bf16.msra.mxu1 %v3650_v19  ;;  %3472 = vmatprep.subr.bf16.mxu0 %v3653_v32 }
  0x9a   : > { %3497 = vmatprep.subr.bf16.mxu1 %v3653_v32  ;;  %3434 = vmatprep.mubr.bf16.mxu0 %v3654_v34 }
  0x9b   : > { %3462 = vmatprep.mubr.bf16.mxu1 %v1996_v35  ;;  %2539 = vperm.xlu0 %3553, %v2536_v57  }
  0x9c   : > { %3473 = vmatpush3.bf16.msra.mxu0 %v3653_v32 }
  0x9d   : > { %3505 = vmatpush3.bf16.msra.mxu1 %v3653_v32  ;;  %3474 = vmatprep.subr.bf16.mxu0 %v3656_v43 }
  0x9e   : > { %3498 = vmatprep.subr.bf16.mxu1 %v3656_v43 }
  0x9f   : > { %3435 = vmatmul.mubr.bf16.gmra.mxu0 %v3655_v45 }
  0xa0   : > { %3463 = vmatmul.mubr.bf16.gmra.mxu1 %v2004_v51  ;;  %3475 = vmatpush3.bf16.msra.mxu0 %v3656_v43 }
  0xa1   : > { %3506 = vmatpush3.bf16.msra.mxu1 %v3656_v43  ;;  %3476 = vmatprep.subr.bf16.mxu0 %v3659_v52 }
  0xa2   : > { %3499 = vmatprep.subr.bf16.mxu1 %v3659_v52  ;;  %3482 = vmatprep.mubr.bf16.mxu0 %v2175_v18 }
  0xa3   : > { %3486 = vmatprep.mubr.bf16.mxu1 %v2179_v30 }
  0xa4   : > { %3477 = vmatpush3.bf16.msra.mxu0 %v3659_v52 }
  0xa5   : > { %3507 = vmatpush3.bf16.msra.mxu1 %v3659_v52  ;;  %3478 = vmatprep.subr.bf16.mxu0 %v3660_v56 }
  0xa6   : > { %3500 = vmatprep.subr.bf16.mxu1 %v3660_v56 }
  0xa8   : > { %3479 = vmatpush3.bf16.msra.mxu0 %v3660_v56 }
  0xa9   : > { %3508 = vmatpush3.bf16.msra.mxu1 %v3660_v56  ;;  %3480 = vmatprep.subr.bf16.mxu0 %v3661_v58 }
  0xaa   : > { %3501 = vmatprep.subr.bf16.mxu1 %v3661_v58 }
  0xac   : > { %3481 = vmatpush3.bf16.msra.mxu0 %v3661_v58 }
  0xad   : > { %3509 = vmatpush3.bf16.msra.mxu1 %v3661_v58 }
  0xaf   : > { %3483 = vmatmul.mubr.bf16.vlgmr.msra.gmra.mxu0 %v2177_v60 }
  0xb0   : > { %3487 = vmatmul.mubr.bf16.vlgmr.msra.gmra.mxu1 %v2181_v62 }
  0xb1   : > { %3490 = vmatprep.mubr.bf16.mxu1 %v2183_v63 }
  0xb8   : > { %3491 = vmatmul.mubr.bf16.gmra.mxu1 %v2185_v1 }
  0xef   : > { %v3260_v41 = vpop.f32.mrf.mxu0 }
  0xf0   : > { %v3288_v2 = vpop.f32.mrf.mxu1 }
  0xf1   : > { %v815_v3 = vadd.f32 %v3288_v2, %v3260_v41  ;;  %v671_v61 = vpop.f32.mrf.mxu0 }
  0xf2   : > { %v806_v4 = vpop.f32.mrf.mxu1 }
  0xf3   : > { %v807_v5 = vadd.f32 %v806_v4, %v671_v61  ;;  %v3261_v6 = vpop.f32.mrf.mxu0 }
  0xf4   : > { %v3289_v7 = vpop.f32.mrf.mxu1 }
  0xf5   : > { %v4226_v8 = vadd.f32 %v3289_v7, %v3261_v6  ;;  %v674_v9 = vpop.f32.mrf.mxu0 }
  0xf6   : > { %v809_v10 = vpop.f32.mrf.mxu1 }
  0xf7   : > { %v4228_v11 = vadd.f32 %v809_v10, %v674_v9  ;;  %v3264_v12 = vpop.f32.mrf.mxu0 }
  0xf8   : > { %v3292_v13 = vpop.f32.mrf.mxu1 }
  0xf9   : > { %v4230_v14 = vadd.f32 %v3292_v13, %v3264_v12  ;;  %v687_v15 = vpop.f32.mrf.mxu0 }
  0xfa   : > { %v822_v16 = vpop.f32.mrf.mxu1 }
  0xfb   : > { %v4232_v17 = vadd.f32 %v822_v16, %v687_v15  ;;  %v3265_v19 = vpop.f32.mrf.mxu0 }
  0xfc   : > { %v3293_v21 = vpop.f32.mrf.mxu1 }
  0xfd   : > { %v4234_v22 = vadd.f32 %v3293_v21, %v3265_v19  ;;  %v690_v23 = vpop.f32.mrf.mxu0 }
  0xfe   : > { %v825_v24 = vpop.f32.mrf.mxu1 }
  0xff   : > { %v4236_v26 = vadd.f32 %v825_v24, %v690_v23  ;;  %v3268_v27 = vpop.f32.mrf.mxu0 }
 0x100   : > { %v3296_v28 = vpop.f32.mrf.mxu1 }
 0x101   : > { %v4238_v29 = vadd.f32 %v3296_v28, %v3268_v27  ;;  %v703_v31 = vpop.f32.mrf.mxu0 }
 0x102   : > { %v838_v32 = vpop.f32.mrf.mxu1 }
 0x103   : > { %v4240_v33 = vadd.f32 %v838_v32, %v703_v31  ;;  %v3269_v34 = vpop.f32.mrf.mxu0 }
 0x104   : > { %v3297_v35 = vpop.f32.mrf.mxu1 }
 0x105   : > { %v4242_v36 = vadd.f32 %v3297_v35, %v3269_v34  ;;  %v706_v37 = vpop.f32.mrf.mxu0 }
 0x106   : > { %v841_v38 = vpop.f32.mrf.mxu1 }
 0x107   : > { %v4244_v39 = vadd.f32 %v841_v38, %v706_v37 }
 0x10f   : > { %v3316_v40 = vpop.f32.mrf.mxu0 }
 0x110   : > { %v3344_v42 = vpop.f32.mrf.mxu1  ;;  %v1025_v43 = vadd.f32 %v3316_v40, %v815_v3 }
 0x111   : > { %v976_v44 = vpop.f32.mrf.mxu0 }
 0x112   : > { %v1182_v25 = vpop.f32.mrf.mxu1  ;;  %v1023_v45 = vadd.f32 %v976_v44, %v807_v5  ;;  %v4246_v46 = vadd.f32 %v3344_v42, %v1025_v43 }
 0x113   : > { %v3317_v48 = vpop.f32.mrf.mxu0 }
 0x114   : > { %v4248_v49 = vpop.f32.mrf.mxu1  ;;  %v4250_v50 = vadd.f32 %v1182_v25, %v1023_v45 }
 0x115   : > { %v979_v51 = vpop.f32.mrf.mxu0 }
 0x116   : > { %v4252_v52 = vpop.f32.mrf.mxu1 }
 0x117   : > { %v3320_v47 = vpop.f32.mrf.mxu0 }
 0x118   : > { %v4254_v18 = vpop.f32.mrf.mxu1 }
 0x119   : > { %v992_v30 = vpop.f32.mrf.mxu0 }
 0x11a   : > { %v4256_v53 = vpop.f32.mrf.mxu1 }
 0x11b   : > { %v3321_v54 = vpop.f32.mrf.mxu0 }
 0x11c   : > { %v4258_v55 = vpop.f32.mrf.mxu1 }
 0x11d   : > { %v995_v56 = vpop.f32.mrf.mxu0 }
 0x11e   : > { %v4260_v57 = vpop.f32.mrf.mxu1 }
 0x11f   : > { %v4262_v58 = vpop.f32.mrf.mxu0 }
 0x120   : > { %v4264_v20 = vpop.f32.mrf.mxu1 }
 0x121   : > { %v4266_v59 = vpop.f32.mrf.mxu0 }
 0x122   : > { %v4268_v60 = vpop.f32.mrf.mxu1 }
 0x123   : > { %v4270_v62 = vpop.f32.mrf.mxu0 }
 0x124   : > { %v4272_v63 = vpop.f32.mrf.mxu1 }
 0x125   : > { %v1011_v0 = vpop.f32.mrf.mxu0 }
 0x126   : > { %v4274_v1 = vpop.f32.mrf.mxu1 }
 0x12f   : > { %v3372_v41 = vpop.f32.mrf.mxu0 }
 0x130   : > { %v4276_v2 = vpop.f32.mrf.mxu1 }
 0x131   : > { %v1444_v3 = vpop.f32.mrf.mxu0 }
 0x132   : > { %v4278_v61 = vpop.f32.mrf.mxu1 }
 0x133   : > { %v3373_v4 = vpop.f32.mrf.mxu0 }
 0x134   : > { %v4280_v5 = vpop.f32.mrf.mxu1 }
 0x135   : > { %v1447_v6 = vpop.f32.mrf.mxu0 }
 0x136   : > { %v4282_v7 = vpop.f32.mrf.mxu1 }
 0x137   : > { %v3376_v9 = vpop.f32.mrf.mxu0 }
 0x138   : > { %v4284_v10 = vpop.f32.mrf.mxu1 }
 0x139   : > { %v1460_v12 = vpop.f32.mrf.mxu0 }
 0x13a   : > { %v4286_v13 = vpop.f32.mrf.mxu1 }
 0x13b   : > { %v3377_v15 = vpop.f32.mrf.mxu0 }
 0x13c   : > { %v4288_v16 = vpop.f32.mrf.mxu1 }
 0x13d   : > { %v1463_v19 = vpop.f32.mrf.mxu0 }
 0x13e   : > { %v4290_v21 = vpop.f32.mrf.mxu1 }
 0x13f   : > { %v4292_v23 = vpop.f32.mrf.mxu0 }
 0x140   : > { %v4294_v24 = vpop.f32.mrf.mxu1 }
 0x141   : > { %4598 = vst [vmem:[#allocation3_spill] sm:$0xff] %v4294_v24  ;;  %v4296_v27 = vpop.f32.mrf.mxu0 }
 0x142   : > { %v4298_v28 = vpop.f32.mrf.mxu1 }
 0x143   : > { %4599 = vst [vmem:[#allocation4_spill] sm:$0xff] %v4298_v28  ;;  %v4300_v31 = vpop.f32.mrf.mxu0 }
 0x144   : > { %4600 = vst [vmem:[#allocation5_spill] sm:$0xff] %v4300_v31  ;;  %v4302_v32 = vpop.f32.mrf.mxu1 }
 0x145   : > { %4601 = vst [vmem:[#allocation6_spill] sm:$0xff] %v4302_v32  ;;  %v4304_v34 = vpop.f32.mrf.mxu0 }
 0x146   : > { %4602 = vst [vmem:[#allocation7_spill] sm:$0xff] %v4304_v34  ;;  %v4306_v35 = vpop.f32.mrf.mxu1 }
 0x147   : > { %4603 = vst [vmem:[#allocation8_spill] sm:$0xff] %v4306_v35 }
 0x14f   : > { %v4308_v37 = vpop.f32.mrf.mxu0 }
 0x150   : > { %v4310_v38 = vpop.f32.mrf.mxu1 }
 0x151   : > { %4604 = vst [vmem:[#allocation9_spill] sm:$0xff] %v4310_v38  ;;  %v4312_v40 = vpop.f32.mrf.mxu0 }
 0x152   : > { %4605 = vst [vmem:[#allocation10_spill] sm:$0xff] %v4312_v40  ;;  %v4314_v42 = vpop.f32.mrf.mxu1 }
 0x153   : > { %4606 = vst [vmem:[#allocation11_spill] sm:$0xff] %v4314_v42  ;;  %v3429_v43 = vpop.f32.mrf.mxu0 }
 0x154   : > { %v4316_v44 = vpop.f32.mrf.mxu1 }
 0x155   : > { %4607 = vst [vmem:[#allocation12_spill] sm:$0xff] %v4316_v44  ;;  %v4318_v25 = vpop.f32.mrf.mxu0  ;;  %v1026_v44 = vadd.f32 %v3317_v48, %v4226_v8 }
 0x156   : > { %4608 = vst [vmem:[#allocation13_spill] sm:$0xff] %v4318_v25  ;;  %v4320_v45 = vpop.f32.mrf.mxu1  ;;  %v1024_v25 = vadd.f32 %v979_v51, %v4228_v11 }
 0x157   : > { %4609 = vst [vmem:[#allocation14_spill] sm:$0xff] %v4320_v45  ;;  %v3432_v32 = vpop.f32.mrf.mxu0  ;;  %v1029_v45 = vadd.f32 %v3320_v47, %v4230_v14  ;;  %v1032_v47 = vadd.f32 %v1011_v0, %v4244_v39 }
 0x158   : > { %v4322_v28 = vpop.f32.mrf.mxu1 }
 0x159   : > { %4610 = vst [vmem:[#allocation15_spill] sm:$0xff] %v4322_v28  ;;  %v4324_v24 = vpop.f32.mrf.mxu0  ;;  %v1235_v8 = vadd.f32 %v4254_v18, %v1029_v45  ;;  %v1493_v18 = vadd.f32 %v3372_v41, %v4246_v46  ;;  %v1238_v46 = vadd.f32 %v4274_v1, %v1032_v47 }
 0x15a   : > { %4611 = vst [vmem:[#allocation16_spill] sm:$0xff] %v4324_v24  ;;  %v4326_v35 = vpop.f32.mrf.mxu1  ;;  %v1027_v24 = vadd.f32 %v992_v30, %v4232_v17  ;;  %v1033_v17 = vadd.f32 %v4262_v58, %v4238_v29  ;;  %v1491_v30 = vadd.f32 %v1444_v3, %v4250_v50 }
 0x15b   : > { %4612 = vst [vmem:[#allocation17_spill] sm:$0xff] %v4326_v35  ;;  %v3433_v34 = vpop.f32.mrf.mxu0  ;;  %v1030_v35 = vadd.f32 %v3321_v54, %v4234_v22  ;;  %v1497_v54 = vadd.f32 %v3376_v9, %v1235_v8  ;;  %v1674_v50 = vadd.f32 %v4276_v2, %v1493_v18  ;;  %v4623_v8 = vld [vmem:[#allocation9_spill] sm:$0xff] }
 0x15c   : > { %v4328_v38 = vpop.f32.mrf.mxu1  ;;  %v1233_v14 = vadd.f32 %v4256_v53, %v1027_v24 }
 0x15d   : > { %4613 = vst [vmem:[#allocation18_spill] sm:$0xff] %v4328_v38  ;;  %v4330_v40 = vpop.f32.mrf.mxu0  ;;  %v1028_v38 = vadd.f32 %v995_v56, %v4236_v26  ;;  %v1236_v51 = vadd.f32 %v4258_v55, %v1030_v35  ;;  %v4356_v26 = vpop.permute.xlu0 %2460  ;;  %v1678_v41 = vadd.f32 %v4284_v10, %v1497_v54  ;;  %v4618_v35 = vld [vmem:[#allocation10_spill] sm:$0xff] }
 0x15e   : > { %4614 = vst [vmem:[#allocation19_spill] sm:$0xff] %v4330_v40  ;;  %v4332_v42 = vpop.f32.mrf.mxu1  ;;  %v1232_v40 = vadd.f32 %v4248_v49, %v1026_v44  ;;  %v1031_v49 = vadd.f32 %v4266_v59, %v4240_v33  ;;  %v1495_v56 = vadd.f32 %v1460_v12, %v1233_v14  ;;  %v1239_v33 = vadd.f32 %v4264_v20, %v1033_v17  ;;  %v4368_v59 = vpop.permute.xlu1 %2466  ;;  %v4628_v54 = vld [vmem:[#allocation6_spill] sm:$0xff] }
 0x15f   : > { %4615 = vst [vmem:[#allocation20_spill] sm:$0xff] %v4332_v42  ;;  %v4337_v31 = vpop.f32.mrf.mxu0  ;;  %v1230_v42 = vadd.f32 %v4252_v52, %v1024_v25  ;;  %v1234_v22 = vadd.f32 %v4260_v57, %v1028_v38  ;;  %v1034_v52 = vadd.f32 %v4270_v62, %v4242_v36  ;;  %v1498_v55 = vadd.f32 %v3377_v15, %v1236_v51  ;;  %v4616_v15 = vld [vmem:[#allocation5_spill] sm:$0xff]  ;;  %v4624_v51 = vld [vmem:[#allocation12_spill] sm:$0xff] }
 0x160   : > { %v4339_v28 = vpop.f32.mrf.mxu1  ;;  %v1494_v53 = vadd.f32 %v3373_v4, %v1232_v40  ;;  %v1237_v36 = vadd.f32 %v4268_v60, %v1031_v49  ;;  %v1672_v62 = vadd.f32 %v4278_v61, %v1491_v30  ;;  %v1676_v60 = vadd.f32 %v4286_v13, %v1495_v56  ;;  %v4619_v40 = vld [vmem:[#allocation3_spill] sm:$0xff]  ;;  %v4627_v30 = vld [vmem:[#allocation4_spill] sm:$0xff] }
 0x161   : > { %v4347_v48 = vpop.f32.mrf.mxu0  ;;  %v1492_v29 = vadd.f32 %v1447_v6, %v1230_v42  ;;  %v1496_v57 = vadd.f32 %v1463_v19, %v1234_v22  ;;  %v1240_v39 = vadd.f32 %v4272_v63, %v1034_v52  ;;  %v1679_v3 = vadd.f32 %v4288_v16, %v1498_v55  ;;  %v4378_v4 = vpop.permute.xlu0 %2463  ;;  %v4617_v19 = vld [vmem:[#allocation7_spill] sm:$0xff] }
 0x162   : > { %v4349_v11 = vpop.f32.mrf.mxu1  ;;  %v1675_v0 = vadd.f32 %v4280_v5, %v1494_v53  ;;  %v1501_v63 = vadd.f32 %v4292_v23, %v1239_v33  ;;  %v1880_v61 = vadd.f32 %v4308_v37, %v1674_v50  ;;  %v1884_v9 = vadd.f32 %v3432_v32, %v1678_v41  ;;  %v4620_v37 = vld [vmem:[#allocation13_spill] sm:$0xff]  ;;  %v4621_v32 = vld [vmem:[#allocation16_spill] sm:$0xff]  ;;  %v4625_v22 = vld [vmem:[#allocation15_spill] sm:$0xff] }
 0x163   : > { %v3437_v58 = vpop.f32.mrf.mxu0  ;;  %v1673_v20 = vadd.f32 %v4282_v7, %v1492_v29  ;;  %v1677_v1 = vadd.f32 %v4290_v21, %v1496_v57  ;;  %v1885_v10 = vadd.f32 %v3433_v34, %v1679_v3  ;;  %v1499_v12 = vadd.f32 %v4296_v27, %v1237_v36  ;;  %v4392_v21 = vpop.permute.xlu1 %2469  ;;  %v4629_v29 = vld [vmem:[#allocation8_spill] sm:$0xff]  ;;  %v4630_v57 = vld [vmem:[#allocation11_spill] sm:$0xff]  ;;  %v4631_v41 = vld [vmem:[#allocation14_spill] sm:$0xff] }
 0x164   : > { %v4365_v24 = vpop.f32.mrf.mxu1  ;;  %v1881_v5 = vadd.f32 %v3429_v43, %v1675_v0  ;;  %v1502_v16 = vadd.f32 %v4616_v15, %v1240_v39  ;;  %v1500_v7 = vadd.f32 %v4617_v19, %v1238_v46  ;;  %v1878_v13 = vadd.f32 %v4618_v35, %v1672_v62  ;;  %v4626_v52 = vld [vmem:[#allocation18_spill] sm:$0xff] }
 0x165   : > { %v1866_v6 = vpop.f32.mrf.mxu0  ;;  %vm2495_vm15 = vcmp.eq.s32.totalorder %v4356_v26, 1  ;;  %v1682_v42 = vadd.f32 %v4619_v40, %v1501_v63  ;;  %v1879_v43 = vadd.f32 %v4620_v37, %v1673_v20  ;;  %v1882_v34 = vadd.f32 %v4621_v32, %v1676_v60  ;;  %v4622_v44 = vld [vmem:[#allocation19_spill] sm:$0xff]  ;;  %v4402_v18 = vpop.permute.xlu0 %2472  ;;  %v4632_v20 = vld [vmem:[#allocation17_spill] sm:$0xff] }
 0x166   : > { %v4384_v2 = vpop.f32.mrf.mxu1  ;;  %v1883_v27 = vadd.f32 %v4622_v44, %v1677_v1  ;;  %v2142_v14 = vadd.f32 %v4623_v8, %v1880_v61  ;;  %v2143_v17 = vadd.f32 %v4624_v51, %v1881_v5  ;;  %v2146_v49 = vadd.f32 %v4625_v22, %v1884_v9  ;;  %v4633_v63 = vld [vmem:[#allocation20_spill] sm:$0xff] }
 0x167   : > { %v2147_v47 = vadd.f32 %v4626_v52, %v1885_v10  ;;  %v1680_v53 = vadd.f32 %v4627_v30, %v1499_v12  ;;  %v1683_v55 = vadd.f32 %v4628_v54, %v1502_v16  ;;  %v1681_v56 = vadd.f32 %v4629_v29, %v1500_v7  ;;  %v4434_v7 = vpop.permute.xlu1 %2475 }
 0x168   : > { %v2140_v33 = vadd.f32 %v4630_v57, %v1878_v13  ;;  %v2141_v3 = vadd.f32 %v4631_v41, %v1879_v43  ;;  %v2144_v60 = vadd.f32 %v4632_v20, %v1882_v34  ;;  %v2145_v1 = vadd.f32 %v4633_v63, %v1883_v27 }
 0x169   : > { %v1888_v10 = vadd.f32 %v4337_v31, %v1682_v42  ;;  %v1889_v12 = vadd.f32 %v3437_v58, %v1683_v55  ;;  %v1886_v19 = vadd.f32 %v4347_v48, %v1680_v53  ;;  %vm2496_vm0 = vcmp.eq.s32.totalorder %v4378_v4, 1  ;;  %v4446_v58 = vpop.permute.xlu0 %2478 }
 0x16a   : > { %vm2497_vm1 = vcmp.eq.s32.totalorder %v4368_v59, 1  ;;  %v1887_v31 = vadd.f32 %v1866_v6, %v1681_v56  ;;  %vm2498_vm2 = vcmp.eq.s32.totalorder %v4392_v21, 1  ;;  %vm2499_vm3 = vcmp.eq.s32.totalorder %v4402_v18, 1 }
 0x16b   : > { %v2150_v43 = vadd.f32 %v4339_v28, %v1888_v10  ;;  %v2151_v32 = vadd.f32 %v4365_v24, %v1889_v12  ;;  %v2148_v44 = vadd.f32 %v4349_v11, %v1886_v19  ;;  %vm2500_vm4 = vcmp.eq.s32.totalorder %v4434_v7, 1 }
 0x16c   : > { %vm2501_vm5 = vcmp.eq.s32.totalorder %v4446_v58, 1 }
 0x16d   : > { %v4485_v52 = vpop.permute.xlu0 %2484 }
 0x16e   : > { %vm2503_vm7 = vcmp.eq.s32.totalorder %v4485_v52, 1 }
 0x16f   : > { %v3484_v38 = vpop.f32.mrf.mxu0 }
 0x170   : > { %v3488_v23 = vpop.f32.mrf.mxu1  ;;  %v4408_v46 = vadd.f32 %v3484_v38, %v2142_v14  ;;  %v4474_v14 = vpop.permute.xlu1 %2481 }
 0x171   : > { %v2274_v25 = vpop.f32.mrf.mxu0  ;;  %v4410_v50 = vadd.f32 %v3488_v23, %v2146_v49  ;;  %vm2502_vm6 = vcmp.eq.s32.totalorder %v4474_v14, 1 }
 0x172   : > { %v2290_v45 = vpop.f32.mrf.mxu1  ;;  %v4419_v61 = vadd.f32 %v2274_v25, %v2140_v33  ;;  %v2509_v27 = vsel %vm2497_vm1, %v4408_v46, 0.0  ;;  %v4504_v33 = vpop.permute.xlu0 %2490 }
 0x173   : > { %v3485_v36 = vpop.f32.mrf.mxu0  ;;  %v4436_v35 = vadd.f32 %v2290_v45, %v2144_v60  ;;  %v2149_v45 = vadd.f32 %v4384_v2, %v1887_v31  ;;  %v2513_v29 = vsel %vm2501_vm5, %v4410_v50, 0.0  ;;  %vm2505_vm9 = vcmp.eq.s32.totalorder %v4504_v33, 1 }
 0x174   : > { %v3489_v39 = vpop.f32.mrf.mxu1  ;;  %v4412_v62 = vadd.f32 %v3485_v36, %v2143_v17  ;;  %v2507_v48 = vsel %vm2495_vm15, %v4419_v61, 0.0  ;;  %v4502_v56 = vpop.permute.xlu1 %2487 }
 0x175   : > { %v4414_v0 = vadd.f32 %v3489_v39, %v2147_v47  ;;  %v2277_v5 = vpop.f32.mrf.mxu0  ;;  %v2511_v47 = vsel %vm2499_vm3, %v4436_v35, 0.0  ;;  %vm2504_vm8 = vcmp.eq.s32.totalorder %v4502_v56, 1 }
 0x176   : > { %v2293_v9 = vpop.f32.mrf.mxu1  ;;  %v3089_v15 = vpack.c.bf16 %v4412_v62, %v4408_v46  ;;  %v4438_v13 = vadd.f32 %v2277_v5, %v2141_v3  ;;  %v2510_v11 = vsel %vm2498_vm2, %v4412_v62, 0.0 }
 0x177   : > { %v3099_v16 = vpack.c.bf16 %v4414_v0, %v4410_v50  ;;  %v4440_v38 = vadd.f32 %v2293_v9, %v2145_v1  ;;  %v2514_v36 = vsel %vm2502_vm6, %v4414_v0, 0.0  ;;  %v2540_v1 = vpop.permute.xlu0 %2539 }
 0x178   : > { %v3492_v23 = vpop.f32.mrf.mxu1  ;;  %3111 = vst [vmem:[%s4426_s7 + $0x8] sm:$0xff] %v3089_v15   ;;  %v3084_v40 = vpack.c.bf16 %v4438_v13, %v4419_v61  ;;  %v2508_v42 = vsel %vm2496_vm0, %v4438_v13, 0.0  ;;  %v4514_v20 = vpop.permute.xlu1 %2493  ;;  %3663 = vrcp.f32 %v2540_v1 }
 0x179   : > { %3113 = vst [vmem:[%s4426_s7 + $0x18] sm:$0xff] %v3099_v16   ;;  %v3094_v6 = vpack.c.bf16 %v4440_v38, %v4436_v35  ;;  %v2519_v34 = vadd.f32 %v2508_v42, %v2507_v48  ;;  %v4469_v8 = vadd.f32 %v3492_v23, %v2150_v43  ;;  %v2512_v54 = vsel %vm2500_vm4, %v4440_v38, 0.0 }
 0x17a   : > { %v2306_v37 = vpop.f32.mrf.mxu1  ;;  %3085 = vst [vmem:[%s4426_s7] sm:$0xff] %v3084_v40   ;;  %vm2506_vm10 = vcmp.eq.s32.totalorder %v4514_v20, 1 }
 0x17b   : > { %3112 = vst [vmem:[%s4426_s7 + $0x10] sm:$0xff] %v3094_v6   ;;  %v2520_v28 = vadd.f32 %v2519_v34, %v2509_v27  ;;  %v4479_v22 = vadd.f32 %v2306_v37, %v2148_v44  ;;  %v2517_v5 = vsel %vm2505_vm9, %v4469_v8, 0.0 }
 0x17c   : > { %v3493_v25 = vpop.f32.mrf.mxu1 }
 0x17d   : > { %v4471_v24 = vadd.f32 %v3493_v25, %v2151_v32  ;;  %v2521_v17 = vadd.f32 %v2520_v28, %v2510_v11  ;;  %v2515_v41 = vsel %vm2503_vm7, %v4479_v22, 0.0 }
 0x17e   : > { %v2309_v51 = vpop.f32.mrf.mxu1 }
 0x17f   : > { %v3109_v2 = vpack.c.bf16 %v4471_v24, %v4469_v8  ;;  %v4483_v49 = vadd.f32 %v2309_v51, %v2149_v45  ;;  %v2522_v30 = vadd.f32 %v2521_v17, %v2511_v47  ;;  %v2518_v10 = vsel %vm2506_vm10, %v4471_v24, 0.0 }
 0x181   : > { %3115 = vst [vmem:[%s4426_s7 + $0x28] sm:$0xff] %v3109_v2   ;;  %v3104_v53 = vpack.c.bf16 %v4483_v49, %v4479_v22  ;;  %v2523_v55 = vadd.f32 %v2522_v30, %v2512_v54  ;;  %v2516_v60 = vsel %vm2504_vm8, %v4483_v49, 0.0 }
 0x183   : > { %3114 = vst [vmem:[%s4426_s7 + $0x20] sm:$0xff] %v3104_v53   ;;  %v2524_v57 = vadd.f32 %v2523_v55, %v2513_v29 }
 0x185   : > { %v2525_v39 = vadd.f32 %v2524_v57, %v2514_v36  ;;  %v3664_v40 = vpop.eup %3663 }
 0x187   : > { %v2526_v3 = vadd.f32 %v2525_v39, %v2515_v41 }
 0x189   : > { %v2527_v63 = vadd.f32 %v2526_v3, %v2516_v60 }
 0x18b   : > { %v2528_v9 = vadd.f32 %v2527_v63, %v2517_v5 }
 0x18d   : > { %v2529_v12 = vadd.f32 %v2528_v9, %v2518_v10 }
 0x18f   : > { %v2530_v15 = vrot.slane %v2529_v12, 4 }
 0x191   : > { %v2531_v16 = vadd.f32 %v2530_v15, %v2529_v12 }
 0x193   : > { %v2532_v19 = vrot.slane %v2531_v16, 2 }
 0x195   : > { %v2533_v23 = vadd.f32 %v2532_v19, %v2531_v16 }
 0x197   : > { %v2534_v31 = vrot.slane %v2533_v23, 1 }
 0x199   : > { %v2535_v48 = vadd.f32 %v2534_v31, %v2533_v23 }
 0x19b   : > { %v2543_v42 = vmul.f32 %v3664_v40, %v2535_v48  ;;  %2568 = vst [vmem:[%s406_s8] sm:$0x1] %v2535_v48 }
 0x19d   : > { %v2544_v6 = vsub.f32 %v4419_v61, %v2543_v42  ;;  %v2545_v37 = vsub.f32 %v4438_v13, %v2543_v42  ;;  %v2546_v43 = vsub.f32 %v4408_v46, %v2543_v42  ;;  %v2547_v32 = vsub.f32 %v4412_v62, %v2543_v42 }
 0x19e   : > { %v2548_v34 = vsub.f32 %v4436_v35, %v2543_v42  ;;  %v2549_v44 = vsub.f32 %v4440_v38, %v2543_v42  ;;  %v2550_v27 = vsub.f32 %v4410_v50, %v2543_v42  ;;  %v2551_v25 = vsub.f32 %v4414_v0, %v2543_v42 }
 0x19f   : > { %v2552_v45 = vsub.f32 %v4479_v22, %v2543_v42  ;;  %v2553_v28 = vsub.f32 %v4483_v49, %v2543_v42  ;;  %v2554_v61 = vsub.f32 %v4469_v8, %v2543_v42  ;;  %v2555_v13 = vsub.f32 %v4471_v24, %v2543_v42 }
 0x1a0   : > { %v2556_v46 = vsel %vm2495_vm15, %v2544_v6, 0.0  ;;  %v2557_v62 = vsel %vm2496_vm0, %v2545_v37, 0.0  ;;  %v2558_v35 = vsel %vm2497_vm1, %v2546_v43, 0.0  ;;  %v2559_v0 = vsel %vm2498_vm2, %v2547_v32, 0.0 }
 0x1a1   : > { %v2569_v50 = vmul.f32 %v2556_v46, %v2556_v46  ;;  %v2570_v38 = vmul.f32 %v2557_v62, %v2557_v62  ;;  %v2571_v11 = vmul.f32 %v2558_v35, %v2558_v35  ;;  %v2560_v8 = vsel %vm2499_vm3, %v2548_v34, 0.0 }
 0x1a2   : > { %v2572_v24 = vmul.f32 %v2559_v0, %v2559_v0  ;;  %v2561_v26 = vsel %vm2500_vm4, %v2549_v44, 0.0  ;;  %v2573_v4 = vmul.f32 %v2560_v8, %v2560_v8  ;;  %v2562_v59 = vsel %vm2501_vm5, %v2550_v27, 0.0 }
 0x1a3   : > { %v2581_v51 = vadd.f32 %v2570_v38, %v2569_v50  ;;  %v2574_v2 = vmul.f32 %v2561_v26, %v2561_v26  ;;  %v2563_v21 = vsel %vm2502_vm6, %v2551_v25, 0.0  ;;  %v2575_v47 = vmul.f32 %v2562_v59, %v2562_v59 }
 0x1a4   : > { %v2564_v18 = vsel %vm2503_vm7, %v2552_v45, 0.0  ;;  %v2576_v53 = vmul.f32 %v2563_v21, %v2563_v21  ;;  %v2565_v7 = vsel %vm2504_vm8, %v2553_v28, 0.0  ;;  %v2566_v58 = vsel %vm2505_vm9, %v2554_v61, 0.0 }
 0x1a5   : > { %v2582_v17 = vadd.f32 %v2581_v51, %v2571_v11  ;;  %v2577_v55 = vmul.f32 %v2564_v18, %v2564_v18  ;;  %v2578_v57 = vmul.f32 %v2565_v7, %v2565_v7  ;;  %v2567_v14 = vsel %vm2506_vm10, %v2555_v13, 0.0 }
 0x1a6   : > { %v2579_v39 = vmul.f32 %v2566_v58, %v2566_v58  ;;  %v2580_v52 = vmul.f32 %v2567_v14, %v2567_v14 }
 0x1a7   : > { %v2583_v22 = vadd.f32 %v2582_v17, %v2572_v24 }
 0x1a9   : > { %v2584_v49 = vadd.f32 %v2583_v22, %v2573_v4 }
 0x1ab   : > { %v2585_v30 = vadd.f32 %v2584_v49, %v2574_v2 }
 0x1ad   : > { %v2586_v54 = vadd.f32 %v2585_v30, %v2575_v47 }
 0x1af   : > { %v2587_v29 = vadd.f32 %v2586_v54, %v2576_v53 }
 0x1b1   : > { %v2588_v36 = vadd.f32 %v2587_v29, %v2577_v55 }
 0x1b3   : > { %v2589_v41 = vadd.f32 %v2588_v36, %v2578_v57 }
 0x1b5   : > { %v2590_v3 = vadd.f32 %v2589_v41, %v2579_v39 }
 0x1b7   : > { %v2591_v60 = vadd.f32 %v2590_v3, %v2580_v52 }
 0x1b9   : > { %v2592_v63 = vrot.slane %v2591_v60, 4 }
 0x1bb   : > { %v2593_v1 = vadd.f32 %v2592_v63, %v2591_v60 }
 0x1bd   : > { %v2594_v56 = vrot.slane %v2593_v1, 2 }
 0x1bf   : > { %v2595_v5 = vadd.f32 %v2594_v56, %v2593_v1 }
 0x1c1   : > { %v2596_v9 = vrot.slane %v2595_v5, 1 }
 0x1c3   : > { %v2597_v33 = vadd.f32 %v2596_v9, %v2595_v5 }
 0x1c5   : > { %2598 = vst [vmem:[%s413_s17] sm:$0x1] %v2597_v33 }
 0x1c6 PF: > { %s17_s25 = sadd.s32 1, %s3703_s25   ;;  %s4634_s21 = smov %s3695_s23 }
 0x1c7   : > { %p14_p10 = scmp.ge.s32.totalorder %s17_s25, 8   ;;  %s4635_s22 = smov %s3699_s24 }
 0x1c8   : > { %s4636_s23 = smov %s4639_s26  ;;  %s4637_s24 = smov %s4643_s27 }
 0x1c9   :  { %16 = sbr.rel (!%p14_p10) target bundleno = 3 (0x3), region = 104 }

</bundles_post_ra>
